<compile_context>
chip_gen: v6e
topology: v6e:2x2x1
jax: 0.10.0
libtpu: 0.0.40
codegen_flags: <defaults>
</compile_context>

<pallas_src>
import functools
import math

import jax
import jax.numpy as jnp
from jax.experimental import pallas as pl
from jax.experimental.pallas import tpu as pltpu

LN_EPS = 1e-5

# exp of the (N,N) attention scores: bf16 uses the EUP bf16 path on v6e/v7x
# and halves the probability-tensor footprint; max-subtract and the row-sum
# accumulation stay in f32.
# TODO(synk): set to jnp.float32 on v5e (no bf16 EUP/VPU there).
_EXP_DTYPE = jnp.bfloat16


def _round_up(x, m):
    return (x + m - 1) // m * m


# ----------------------------- in-kernel helpers -----------------------------

def _erf(x):
    # Abramowitz & Stegun 7.1.26 polynomial approximation of erf (|err|<~1e-4).
    # Division goes to the EUP via approx reciprocal.
    # TODO(synk): switch to jax.lax.erf / tanh-GELU if VALU-bound on v5e.
    a1, a2, a3, a4, a5 = (0.254829592, -0.284496736, 1.421413741,
                          -1.453152027, 1.061405429)
    p = 0.3275911
    ax = jnp.abs(x)
    t = pl.reciprocal(1.0 + p * ax, approx=True)
    poly = ((((a5 * t + a4) * t + a3) * t + a2) * t + a1) * t
    r = 1.0 - poly * jnp.exp(-ax * ax)
    return jnp.where(x >= 0, r, -r)


def _gelu(x):
    # erf-based GELU, matching torch.nn.GELU() default
    return 0.5 * x * (1.0 + _erf(x * (1.0 / math.sqrt(2.0))))


def _layernorm(x, gamma, beta):
    mu = jnp.mean(x, axis=-1, keepdims=True)
    var = jnp.mean((x - mu) ** 2, axis=-1, keepdims=True)
    return (x - mu) * jax.lax.rsqrt(var + LN_EPS) * gamma + beta


# --------------- kernel 1: fused transformer stack + mean pool ---------------

def _stack_kernel(x_ref,
                  g1_ref, be1_ref,
                  wqkv_ref, bqkv_ref,
                  woh_ref, bo_ref,
                  g2_ref, be2_ref,
                  w1_ref, b1_ref,
                  w2_ref, b2_ref,
                  pooled_ref,
                  tok_scr, qkvT_scr,
                  *, num_heads, emb_size, n_valid):
    d = pl.program_id(1)
    E = emb_size
    H = num_heads
    dh = E // H
    n_pad = tok_scr.shape[0]

    # Tokens are resident in VMEM scratch across the depth (arbitrary) axis.
    @pl.when(d == 0)
    def _():
        tok_scr[...] = x_ref[0]

    x = tok_scr[...]                                     # (N, E) f32

    # ------------------------- MHA sublayer -------------------------
    # LN -> fused QKV matmul (scale already folded into wq/bq) -> per-head attn
    xl = _layernorm(x, g1_ref[d], be1_ref[d]).astype(jnp.bfloat16)
    qkv = jnp.dot(xl, wqkv_ref[d],
                  preferred_element_type=jnp.float32) + bqkv_ref[d]   # (N, 3E)
    # Feature-major scratch: per-head slices become *sublane* slices (pl.ds),
    # avoiding dynamic lane slicing inside the head loop.
    qkvT_scr[...] = jnp.transpose(qkv).astype(jnp.bfloat16)          # (3E, N)

    # Additive key mask for the zero-padded tokens (static shapes).
    if n_valid < n_pad:
        col = jax.lax.broadcasted_iota(jnp.int32, (1, n_pad), 1)
        key_bias = jnp.where(col < n_valid, 0.0, -1e30).astype(jnp.float32)
    else:
        key_bias = None

    # Residual + output-projection bias; per-head projections accumulate here.
    tok_scr[...] = x + bo_ref[d]

    def head_body(h, carry):
        # fori_loop (not a static unroll) bounds the (N,N) temporaries to one
        # head's tile.
        qo = pl.multiple_of(h * dh, dh)
        ko = pl.multiple_of(E + h * dh, dh)
        vo = pl.multiple_of(2 * E + h * dh, dh)
        qT = qkvT_scr[pl.ds(qo, dh), :]                  # (dh, N) bf16
        kT = qkvT_scr[pl.ds(ko, dh), :]
        vT = qkvT_scr[pl.ds(vo, dh), :]

        s = jax.lax.dot_general(qT, kT, (((0,), (0,)), ((), ())),
                                preferred_element_type=jnp.float32)  # (N, N)
        if key_bias is not None:
            s = s + key_bias
        m = jnp.max(s, axis=-1, keepdims=True)                       # f32
        p = jnp.exp((s - m).astype(_EXP_DTYPE))                      # bf16 exp
        row_sum = jnp.sum(p, axis=-1, keepdims=True,
                          dtype=jnp.float32)                         # f32 acc
        oh = jax.lax.dot_general(p.astype(jnp.bfloat16), vT,
                                 (((1,), (1,)), ((), ())),
                                 preferred_element_type=jnp.float32)  # (N, dh)
        # Softmax normalization folded AFTER the PV matmul (N*dh, not N*N).
        oh = oh / row_sum
        tok_scr[...] += jnp.dot(oh.astype(jnp.bfloat16),
                                woh_ref[d * H + h],
                                preferred_element_type=jnp.float32)
        return carry

    jax.lax.fori_loop(0, H, head_body, 0)

    x1 = tok_scr[...]

    # ------------------------- FFN sublayer -------------------------
    x2l = _layernorm(x1, g2_ref[d], be2_ref[d]).astype(jnp.bfloat16)
    hdn = _gelu(jnp.dot(x2l, w1_ref[d],
                        preferred_element_type=jnp.float32) + b1_ref[d])
    ff = jnp.dot(hdn.astype(jnp.bfloat16), w2_ref[d],
                 preferred_element_type=jnp.float32) + b2_ref[d]
    x2 = x1 + ff
    tok_scr[...] = x2

    # Mean-pool ('b n e -> b e') over VALID tokens, fused into the last layer.
    @pl.when(d == pl.num_programs(1) - 1)
    def _():
        if n_valid < n_pad:
            rows = jax.lax.broadcasted_iota(jnp.int32, (n_pad, 1), 0)
            xm = jnp.where(rows < n_valid, x2, 0.0)
        else:
            xm = x2
        pooled_ref[0] = jnp.sum(xm, axis=0, keepdims=True) * (1.0 / n_valid)


_STACKED_NAMES = ("g1", "be1", "wqkv", "bqkv", "woh", "bo",
                  "g2", "be2", "w1", "b1", "w2", "b2")


def _stack_vmem_bytes(n_pad, emb, hid, weights):
    """Explicit scoped-VMEM budget for the stack kernel (review item)."""
    def padded_bytes(a):
        s = list(a.shape)
        sub = 8 * 4 // a.dtype.itemsize          # 8 for f32, 16 for bf16
        if len(s) >= 2:
            s[-1] = _round_up(s[-1], 128)
            s[-2] = _round_up(s[-2], sub)
        n = 1
        for v in s:
            n *= v
        return n * a.dtype.itemsize

    est = 0
    est += n_pad * emb * 4                                   # tok_scr (f32)
    est += 3 * emb * n_pad * 2                               # qkvT scratch
    est += 2 * n_pad * _round_up(emb, 128) * 4               # token block x2
    est += 2 * 8 * 128 * 4                                   # pooled block x2
    est += sum(2 * padded_bytes(w) for w in weights)         # resident weights
    est += n_pad * n_pad * (4 + 4 + 2)                       # one head s/p
    est += n_pad * _round_up(hid, 128) * (4 + 2)             # FFN hidden
    est += 6 * n_pad * _round_up(3 * emb, 128) * 4           # qkv/LN temps
    est = int(est * 1.5) + (2 << 20)                         # headroom
    # cap at 64 MiB: v7x physical VMEM per TensorCore
    return max(16 << 20, min(est, 64 << 20))


def encoder_stack(tokens, stacked, *, num_heads, n_valid):
    B, n_pad, E = tokens.shape
    depth = stacked["wqkv"].shape[0]
    hid = stacked["w1"].shape[-1]
    plist = [stacked[n] for n in _STACKED_NAMES]

    def resident(a):
        # Full-array block, constant index_map -> fetched once, stays in VMEM.
        zeros = (0,) * a.ndim
        return pl.BlockSpec(a.shape, lambda b, d, _z=zeros: _z)

    kern = functools.partial(_stack_kernel, num_heads=num_heads,
                             emb_size=E, n_valid=n_valid)
    pooled = pl.pallas_call(
        kern,
        grid=(B, depth),
        in_specs=[pl.BlockSpec((1, n_pad, E), lambda b, d: (b, 0, 0))]
                 + [resident(p) for p in plist],
        out_specs=pl.BlockSpec((1, 1, E), lambda b, d: (b, 0, 0)),
        out_shape=jax.ShapeDtypeStruct((B, 1, E), jnp.float32),
        scratch_shapes=[pltpu.VMEM((n_pad, E), jnp.float32),
                        pltpu.VMEM((3 * E, n_pad), jnp.bfloat16)],
        compiler_params=pltpu.CompilerParams(
            dimension_semantics=("parallel", "arbitrary"),
            vmem_limit_bytes=_stack_vmem_bytes(n_pad, E, hid, plist)),
    )(tokens, *plist)
    return pooled


# ------------- kernel 2: fc_mu / fc_logvar (fused) + reparameterize ----------

def _head_kernel(pooled_ref, w_ref, b_ref, eps_ref,
                 lat_ref, mu_ref, lv_ref, *, latent_dim):
    pooled = pooled_ref[...]                                          # (B, E)
    out = jnp.dot(pooled.astype(jnp.bfloat16), w_ref[...],
                  preferred_element_type=jnp.float32) + b_ref[...]    # (B, 2L)
    mu = out[:, :latent_dim]
    lv = out[:, latent_dim:]
    mu_ref[...] = mu
    lv_ref[...] = lv
    lat_ref[...] = mu + eps_ref[...] * jnp.exp(0.5 * lv)              # reparam


def encoder_head(pooled2d, w_head, b_head, eps, *, latent_dim):
    B = pooled2d.shape[0]
    out_sds = jax.ShapeDtypeStruct((B, latent_dim), jnp.float32)
    kern = functools.partial(_head_kernel, latent_dim=latent_dim)
    return pl.pallas_call(
        kern,
        out_shape=(out_sds, out_sds, out_sds),
    )(pooled2d, w_head, b_head, eps)


# --------------------------- parameter packing --------------------------------

def _pack_layers(layers, *, emb_size, num_heads):
    E, H = emb_size, num_heads
    dh = E // H
    depth = len(layers)
    inv_scale = 1.0 / math.sqrt(E)          # torch: softmax(energy / sqrt(E))

    def stack(name):
        return jnp.stack([l[name] for l in layers], axis=0)

    # fused QKV with the 1/sqrt(E) scale folded into the q weight & bias (exact)
    wqkv = jnp.stack(
        [jnp.concatenate([l["wq"] * inv_scale, l["wk"], l["wv"]], axis=1)
         for l in layers], axis=0).astype(jnp.bfloat16)        # (D, E, 3E)
    bqkv = jnp.stack(
        [jnp.concatenate([l["bq"] * inv_scale, l["bk"], l["bv"]], axis=1)
         for l in layers], axis=0)                             # (D, 1, 3E)
    # output projection packed head-major: (D*H, dh, E)
    woh = stack("wo").reshape(depth, H, dh, E).reshape(
        depth * H, dh, E).astype(jnp.bfloat16)
    return {
        "g1": stack("g1"), "be1": stack("be1"),
        "wqkv": wqkv, "bqkv": bqkv,
        "woh": woh, "bo": stack("bo"),
        "g2": stack("g2"), "be2": stack("be2"),
        "w1": stack("w1").astype(jnp.bfloat16), "b1": stack("b1"),
        "w2": stack("w2").astype(jnp.bfloat16), "b2": stack("b2"),
    }


# ------------------------------- full forward --------------------------------

def encoder_forward(x, params, eps, *, patch_size, num_heads):
    # layout: x is NCHW (b, c, h, w), exactly as the PyTorch module expects.
    b, c, h, w = x.shape
    s2 = patch_size
    # Rearrange 'b c (h s1) (w s2) -> b (h w) (s1 s2 c)'  with s1=1, s2=patch
    xp = x.reshape(b, c, h, w // s2, s2)
    xp = jnp.transpose(xp, (0, 2, 3, 4, 1)).reshape(b, h * (w // s2), s2 * c)

    # Patch projection: K = patch*channels (=2) contraction -> plain jnp; XLA
    # fuses it with the cls/pos glue (a dedicated pallas_call was pure overhead
    # and an extra HBM round-trip of the tokens).
    proj = jnp.dot(xp, params["pe_w"]) + params["pe_b"]
    E = proj.shape[-1]
    cls = jnp.broadcast_to(params["cls"], (b, 1, E))
    tokens = jnp.concatenate([cls, proj], axis=1) + params["pos"][None]

    # Pad token count to a multiple of 128 (lane/sublane friendly); padded keys
    # are masked inside the kernel and excluded from the mean-pool.
    n_valid = tokens.shape[1]
    n_pad = _round_up(n_valid, 128)
    if n_pad != n_valid:
        tokens = jnp.pad(tokens, ((0, 0), (0, n_pad - n_valid), (0, 0)))

    # fused transformer stack + masked mean pool (single Pallas kernel)
    stacked = _pack_layers(params["layers"], emb_size=E, num_heads=num_heads)
    pooled = encoder_stack(tokens, stacked, num_heads=num_heads,
                           n_valid=n_valid)                    # (b, 1, E)
    pooled2d = pooled[:, 0, :]                                 # (b, E)

    # mu / logvar / reparameterize (single Pallas kernel, fused weights)
    w_head = jnp.concatenate([params["w_mu"], params["w_lv"]],
                             axis=1).astype(jnp.bfloat16)      # (E, 2L)
    b_head = jnp.concatenate([params["b_mu"], params["b_lv"]], axis=1)
    latent_dim = params["w_mu"].shape[1]
    return encoder_head(pooled2d, w_head, b_head, eps, latent_dim=latent_dim)


# --------------------------- deterministic params ----------------------------

def init_params(key, *, in_channels, patch_size, emb_size, seq_length,
                depth, num_heads, latent_dim):
    del num_heads  # shape-independent here
    n_tokens = seq_length // patch_size + 1
    keys = iter(jax.random.split(key, 16 + depth * 8))

    def nrm(shape, scale=0.02):
        return (scale * jax.random.normal(next(keys), shape)).astype(jnp.float32)

    params = {
        "pe_w": nrm((patch_size * in_channels, emb_size)),
        "pe_b": jnp.zeros((1, emb_size), jnp.float32),
        "cls": nrm((1, 1, emb_size), 1.0),
        "pos": nrm((n_tokens, emb_size), 1.0),
        "w_mu": nrm((emb_size, latent_dim)),
        "b_mu": jnp.zeros((1, latent_dim), jnp.float32),
        "w_lv": nrm((emb_size, latent_dim)),
        "b_lv": jnp.zeros((1, latent_dim), jnp.float32),
        "layers": [],
    }
    hid = 4 * emb_size  # forward_expansion=4
    for _ in range(depth):
        layer = {
            "g1": jnp.ones((1, emb_size), jnp.float32),
            "be1": jnp.zeros((1, emb_size), jnp.float32),
            "wq": nrm((emb_size, emb_size)),
            "bq": jnp.zeros((1, emb_size), jnp.float32),
            "wk": nrm((emb_size, emb_size)),
            "bk": jnp.zeros((1, emb_size), jnp.float32),
            "wv": nrm((emb_size, emb_size)),
            "bv": jnp.zeros((1, emb_size), jnp.float32),
            "wo": nrm((emb_size, emb_size)),
            "bo": jnp.zeros((1, emb_size), jnp.float32),
            "g2": jnp.ones((1, emb_size), jnp.float32),
            "be2": jnp.zeros((1, emb_size), jnp.float32),
            "w1": nrm((emb_size, hid)),
            "b1": jnp.zeros((1, hid), jnp.float32),
            "w2": nrm((hid, emb_size)),
            "b2": jnp.zeros((1, emb_size), jnp.float32),
        }
        params["layers"].append(layer)
    return params


# ----------------------------------- main -------------------------------------

if __name__ == "__main__":
    # small shapes consistent with the module (module defaults: patch_size=2,
    # emb_size=64, seq_length=2190, depth=8, num_heads=4, latent_dim=1000)
    in_channels = 1
    patch_size = 2
    emb_size = 64
    seq_length = 16       # reduced from 2190
    depth = 2             # reduced from 8
    num_heads = 4
    latent_dim = 32       # reduced from 1000
    batch = 2

    key = jax.random.PRNGKey(0)
    kx, kp, keps = jax.random.split(key, 3)
    params = init_params(kp, in_channels=in_channels, patch_size=patch_size,
                         emb_size=emb_size, seq_length=seq_length, depth=depth,
                         num_heads=num_heads, latent_dim=latent_dim)

    x = jax.random.normal(kx, (batch, in_channels, 1, seq_length),
                          dtype=jnp.float32)
    # eps for reparameterize (torch.randn_like equivalent, made explicit)
    eps = jax.random.normal(keps, (batch, latent_dim), dtype=jnp.float32)

    fwd = jax.jit(functools.partial(encoder_forward,
                                    patch_size=patch_size,
                                    num_heads=num_heads))
    latent, mu, logvar = fwd(x, params, eps)
    jax.block_until_ready((latent, mu, logvar))

    assert latent.shape == (batch, latent_dim)
    assert mu.shape == (batch, latent_dim)
    assert logvar.shape == (batch, latent_dim)
    assert bool(jnp.all(jnp.isfinite(latent)))
    assert bool(jnp.all(jnp.isfinite(mu)))
    assert bool(jnp.all(jnp.isfinite(logvar)))
    print("KERNEL_OK")
</pallas_src>

<mosaic_0001>
module attributes {stable_mosaic.version = 11 : i64} {
  func.func @_head_kernel(%arg0: memref<2x64xf32, #tpu.memory_space<vmem>>, %arg1: memref<64x64xbf16, #tpu.memory_space<vmem>>, %arg2: memref<1x64xf32, #tpu.memory_space<vmem>>, %arg3: memref<2x32xf32, #tpu.memory_space<vmem>>, %arg4: memref<2x32xf32, #tpu.memory_space<vmem>>, %arg5: memref<2x32xf32, #tpu.memory_space<vmem>>, %arg6: memref<2x32xf32, #tpu.memory_space<vmem>>) attributes {dimension_semantics = [], scalar_prefetch = 0 : i64, scratch_operands = 0 : i64, tpu.core_type = #tpu.core_type<tc>} {
    %c0 = arith.constant 0 : index
    %c0_0 = arith.constant 0 : index
    %0 = vector.load %arg0[%c0, %c0_0] : memref<2x64xf32, #tpu.memory_space<vmem>>, vector<2x64xf32>
    %1 = arith.truncf %0 : vector<2x64xf32> to vector<2x64xbf16>
    %c0_1 = arith.constant 0 : index
    %c0_2 = arith.constant 0 : index
    %2 = vector.load %arg1[%c0_1, %c0_2] : memref<64x64xbf16, #tpu.memory_space<vmem>>, vector<64x64xbf16>
    %cst = arith.constant dense<0.000000e+00> : vector<2x64xf32>
    %3 = tpu.matmul %1, %2, %cst {dimension_numbers = #tpu.dot_dimension_numbers<[1], [0], [0], [1], [0, 0, 1, 1], [], []>} : vector<2x64xbf16>, vector<64x64xbf16>, vector<2x64xf32> -> vector<2x64xf32>
    %c0_3 = arith.constant 0 : index
    %c0_4 = arith.constant 0 : index
    %4 = vector.load %arg2[%c0_3, %c0_4] : memref<1x64xf32, #tpu.memory_space<vmem>>, vector<1x64xf32>
    %5 = vector.broadcast %4 : vector<1x64xf32> to vector<2x64xf32>
    %6 = arith.addf %3, %5 : vector<2x64xf32>
    %7 = vector.extract_strided_slice %6 {offsets = [0, 0], sizes = [2, 32], strides = [1, 1]} : vector<2x64xf32> to vector<2x32xf32>
    %8 = vector.extract_strided_slice %6 {offsets = [0, 32], sizes = [2, 32], strides = [1, 1]} : vector<2x64xf32> to vector<2x32xf32>
    %c0_5 = arith.constant 0 : index
    %c0_6 = arith.constant 0 : index
    %9 = vector.load %arg5[%c0_5, %c0_6] : memref<2x32xf32, #tpu.memory_space<vmem>>, vector<2x32xf32>
    tpu.vector_store %arg5[%c0_5, %c0_6], %7 {strides = array<i32>} : memref<2x32xf32, #tpu.memory_space<vmem>>, vector<2x32xf32>,
    %c0_7 = arith.constant 0 : index
    %c0_8 = arith.constant 0 : index
    %10 = vector.load %arg6[%c0_7, %c0_8] : memref<2x32xf32, #tpu.memory_space<vmem>>, vector<2x32xf32>
    tpu.vector_store %arg6[%c0_7, %c0_8], %8 {strides = array<i32>} : memref<2x32xf32, #tpu.memory_space<vmem>>, vector<2x32xf32>,
    %c0_9 = arith.constant 0 : index
    %c0_10 = arith.constant 0 : index
    %11 = vector.load %arg3[%c0_9, %c0_10] : memref<2x32xf32, #tpu.memory_space<vmem>>, vector<2x32xf32>
    %cst_11 = arith.constant 5.000000e-01 : f32
    %12 = vector.broadcast %cst_11 : f32 to vector<2x32xf32>
    %13 = arith.mulf %12, %8 : vector<2x32xf32>
    %14 = math.exp %13 : vector<2x32xf32>
    %15 = arith.mulf %11, %14 : vector<2x32xf32>
    %16 = arith.addf %7, %15 : vector<2x32xf32>
    %c0_12 = arith.constant 0 : index
    %c0_13 = arith.constant 0 : index
    %17 = vector.load %arg4[%c0_12, %c0_13] : memref<2x32xf32, #tpu.memory_space<vmem>>, vector<2x32xf32>
    tpu.vector_store %arg4[%c0_12, %c0_13], %16 {strides = array<i32>} : memref<2x32xf32, #tpu.memory_space<vmem>>, vector<2x32xf32>,
    return
  }
}

module attributes {stable_mosaic.version = 11 : i64} {
  func.func @_stack_kernel(%arg0: i32, %arg1: i32, %arg2: memref<1x128x64xf32, #tpu.memory_space<vmem>>, %arg3: memref<2x1x64xf32, #tpu.memory_space<vmem>>, %arg4: memref<2x1x64xf32, #tpu.memory_space<vmem>>, %arg5: memref<2x64x192xbf16, #tpu.memory_space<vmem>>, %arg6: memref<2x1x192xf32, #tpu.memory_space<vmem>>, %arg7: memref<8x16x64xbf16, #tpu.memory_space<vmem>>, %arg8: memref<2x1x64xf32, #tpu.memory_space<vmem>>, %arg9: memref<2x1x64xf32, #tpu.memory_space<vmem>>, %arg10: memref<2x1x64xf32, #tpu.memory_space<vmem>>, %arg11: memref<2x64x256xbf16, #tpu.memory_space<vmem>>, %arg12: memref<2x1x256xf32, #tpu.memory_space<vmem>>, %arg13: memref<2x256x64xbf16, #tpu.memory_space<vmem>>, %arg14: memref<2x1x64xf32, #tpu.memory_space<vmem>>, %arg15: memref<1x1x64xf32, #tpu.memory_space<vmem>>, %arg16: memref<128x64xf32, #tpu.memory_space<vmem>>, %arg17: memref<192x128xbf16, #tpu.memory_space<vmem>>) attributes {dimension_semantics = [#tpu.dimension_semantics<parallel>, #tpu.dimension_semantics<arbitrary>], iteration_bounds = array<i64: 2, 2>, scalar_prefetch = 0 : i64, scratch_operands = 2 : i64, tpu.core_type = #tpu.core_type<tc>, window_params = [{transform_indices = @transform_0, window_bounds = array<i64: 1, 128, 64>}, {pipeline_mode = #tpu.pipeline_mode<synchronous>, transform_indices = @transform_1, window_bounds = array<i64: 2, 1, 64>}, {pipeline_mode = #tpu.pipeline_mode<synchronous>, transform_indices = @transform_2, window_bounds = array<i64: 2, 1, 64>}, {pipeline_mode = #tpu.pipeline_mode<synchronous>, transform_indices = @transform_3, window_bounds = array<i64: 2, 64, 192>}, {pipeline_mode = #tpu.pipeline_mode<synchronous>, transform_indices = @transform_4, window_bounds = array<i64: 2, 1, 192>}, {pipeline_mode = #tpu.pipeline_mode<synchronous>, transform_indices = @transform_5, window_bounds = array<i64: 8, 16, 64>}, {pipeline_mode = #tpu.pipeline_mode<synchronous>, transform_indices = @transform_6, window_bounds = array<i64: 2, 1, 64>}, {pipeline_mode = #tpu.pipeline_mode<synchronous>, transform_indices = @transform_7, window_bounds = array<i64: 2, 1, 64>}, {pipeline_mode = #tpu.pipeline_mode<synchronous>, transform_indices = @transform_8, window_bounds = array<i64: 2, 1, 64>}, {pipeline_mode = #tpu.pipeline_mode<synchronous>, transform_indices = @transform_9, window_bounds = array<i64: 2, 64, 256>}, {pipeline_mode = #tpu.pipeline_mode<synchronous>, transform_indices = @transform_10, window_bounds = array<i64: 2, 1, 256>}, {pipeline_mode = #tpu.pipeline_mode<synchronous>, transform_indices = @transform_11, window_bounds = array<i64: 2, 256, 64>}, {pipeline_mode = #tpu.pipeline_mode<synchronous>, transform_indices = @transform_12, window_bounds = array<i64: 2, 1, 64>}, {transform_indices = @transform_13, window_bounds = array<i64: 1, 1, 64>}]} {
    %c0_i32 = arith.constant 0 : i32
    %0 = arith.cmpi eq, %arg1, %c0_i32 : i32
    %1 = arith.extui %0 : i1 to i32
    %c0_i32_0 = arith.constant 0 : i32
    %2 = arith.cmpi ne, %1, %c0_i32_0 : i32
    scf.if %2 {
      %c0_64 = arith.constant 0 : index
      %c0_65 = arith.constant 0 : index
      %c0_66 = arith.constant 0 : index
      %151 = vector.load %arg2[%c0_64, %c0_65, %c0_66] : memref<1x128x64xf32, #tpu.memory_space<vmem>>, vector<1x128x64xf32>
      %152 = vector.shape_cast %151 : vector<1x128x64xf32> to vector<128x64xf32>
      %c0_67 = arith.constant 0 : index
      %c0_68 = arith.constant 0 : index
      %153 = vector.load %arg16[%c0_67, %c0_68] : memref<128x64xf32, #tpu.memory_space<vmem>>, vector<128x64xf32>
      tpu.vector_store %arg16[%c0_67, %c0_68], %152 {strides = array<i32>} : memref<128x64xf32, #tpu.memory_space<vmem>>, vector<128x64xf32>,
    } else {
    }
    %c0 = arith.constant 0 : index
    %c0_1 = arith.constant 0 : index
    %3 = vector.load %arg16[%c0, %c0_1] : memref<128x64xf32, #tpu.memory_space<vmem>>, vector<128x64xf32>
    %4 = arith.index_cast %arg1 : i32 to index
    %c0_2 = arith.constant 0 : index
    %c0_3 = arith.constant 0 : index
    %5 = vector.load %arg3[%4, %c0_2, %c0_3] : memref<2x1x64xf32, #tpu.memory_space<vmem>>, vector<1x1x64xf32>
    %6 = vector.shape_cast %5 : vector<1x1x64xf32> to vector<1x64xf32>
    %7 = arith.index_cast %arg1 : i32 to index
    %c0_4 = arith.constant 0 : index
    %c0_5 = arith.constant 0 : index
    %8 = vector.load %arg4[%7, %c0_4, %c0_5] : memref<2x1x64xf32, #tpu.memory_space<vmem>>, vector<1x1x64xf32>
    %9 = vector.shape_cast %8 : vector<1x1x64xf32> to vector<1x64xf32>
    %cst = arith.constant dense<0.000000e+00> : vector<128xf32>
    %10 = vector.multi_reduction <add>, %3, %cst [1] : vector<128x64xf32> to vector<128xf32>
    %11 = vector.shape_cast %10 : vector<128xf32> to vector<128x1xf32>
    %cst_6 = arith.constant 6.400000e+01 : f32
    %12 = vector.broadcast %cst_6 : f32 to vector<128x1xf32>
    %13 = arith.divf %11, %12 : vector<128x1xf32>
    %14 = vector.broadcast %13 : vector<128x1xf32> to vector<128x64xf32>
    %15 = arith.subf %3, %14 : vector<128x64xf32>
    %16 = arith.mulf %15, %15 : vector<128x64xf32>
    %cst_7 = arith.constant dense<0.000000e+00> : vector<128xf32>
    %17 = vector.multi_reduction <add>, %16, %cst_7 [1] : vector<128x64xf32> to vector<128xf32>
    %18 = vector.shape_cast %17 : vector<128xf32> to vector<128x1xf32>
    %cst_8 = arith.constant 6.400000e+01 : f32
    %19 = vector.broadcast %cst_8 : f32 to vector<128x1xf32>
    %20 = arith.divf %18, %19 : vector<128x1xf32>
    %21 = vector.broadcast %13 : vector<128x1xf32> to vector<128x64xf32>
    %22 = arith.subf %3, %21 : vector<128x64xf32>
    %cst_9 = arith.constant 9.99999974E-6 : f32
    %23 = vector.broadcast %cst_9 : f32 to vector<128x1xf32>
    %24 = arith.addf %20, %23 : vector<128x1xf32>
    %25 = math.rsqrt %24 : vector<128x1xf32>
    %26 = vector.broadcast %25 : vector<128x1xf32> to vector<128x64xf32>
    %27 = arith.mulf %22, %26 : vector<128x64xf32>
    %28 = vector.broadcast %6 : vector<1x64xf32> to vector<128x64xf32>
    %29 = arith.mulf %27, %28 : vector<128x64xf32>
    %30 = vector.broadcast %9 : vector<1x64xf32> to vector<128x64xf32>
    %31 = arith.addf %29, %30 : vector<128x64xf32>
    %32 = arith.truncf %31 : vector<128x64xf32> to vector<128x64xbf16>
    %33 = arith.index_cast %arg1 : i32 to index
    %c0_10 = arith.constant 0 : index
    %c0_11 = arith.constant 0 : index
    %34 = vector.load %arg5[%33, %c0_10, %c0_11] : memref<2x64x192xbf16, #tpu.memory_space<vmem>>, vector<1x64x192xbf16>
    %35 = vector.shape_cast %34 : vector<1x64x192xbf16> to vector<64x192xbf16>
    %cst_12 = arith.constant dense<0.000000e+00> : vector<128x192xf32>
    %36 = tpu.matmul %32, %35, %cst_12 {dimension_numbers = #tpu.dot_dimension_numbers<[1], [0], [0], [1], [0, 0, 1, 1], [], []>} : vector<128x64xbf16>, vector<64x192xbf16>, vector<128x192xf32> -> vector<128x192xf32>
    %37 = arith.index_cast %arg1 : i32 to index
    %c0_13 = arith.constant 0 : index
    %c0_14 = arith.constant 0 : index
    %38 = vector.load %arg6[%37, %c0_13, %c0_14] : memref<2x1x192xf32, #tpu.memory_space<vmem>>, vector<1x1x192xf32>
    %39 = vector.shape_cast %38 : vector<1x1x192xf32> to vector<1x192xf32>
    %40 = vector.broadcast %39 : vector<1x192xf32> to vector<128x192xf32>
    %41 = arith.addf %36, %40 : vector<128x192xf32>
    %42 = tpu.transpose %41, [1, 0] : vector<128x192xf32> -> vector<192x128xf32>
    %43 = arith.truncf %42 : vector<192x128xf32> to vector<192x128xbf16>
    %c0_15 = arith.constant 0 : index
    %c0_16 = arith.constant 0 : index
    %44 = vector.load %arg17[%c0_15, %c0_16] : memref<192x128xbf16, #tpu.memory_space<vmem>>, vector<192x128xbf16>
    tpu.vector_store %arg17[%c0_15, %c0_16], %43 {strides = array<i32>} : memref<192x128xbf16, #tpu.memory_space<vmem>>, vector<192x128xbf16>,
    %45 = tpu.iota {dimensions = array<i32: 1>} : vector<1x128xi32>
    %c9_i32 = arith.constant 9 : i32
    %46 = vector.broadcast %c9_i32 : i32 to vector<1x128xi32>
    %47 = arith.cmpi slt, %45, %46 : vector<1x128xi32>
    %cst_17 = arith.constant 0.000000e+00 : f32
    %cst_18 = arith.constant -1.000000e+30 : f32
    %48 = vector.broadcast %cst_17 : f32 to vector<1x128xf32>
    %49 = vector.broadcast %cst_18 : f32 to vector<1x128xf32>
    %50 = arith.select %47, %48, %49 : vector<1x128xi1>, vector<1x128xf32>
    %51 = arith.index_cast %arg1 : i32 to index
    %c0_19 = arith.constant 0 : index
    %c0_20 = arith.constant 0 : index
    %52 = vector.load %arg8[%51, %c0_19, %c0_20] : memref<2x1x64xf32, #tpu.memory_space<vmem>>, vector<1x1x64xf32>
    %53 = vector.shape_cast %52 : vector<1x1x64xf32> to vector<1x64xf32>
    %54 = vector.broadcast %53 : vector<1x64xf32> to vector<128x64xf32>
    %55 = arith.addf %3, %54 : vector<128x64xf32>
    %c0_21 = arith.constant 0 : index
    %c0_22 = arith.constant 0 : index
    %56 = vector.load %arg16[%c0_21, %c0_22] : memref<128x64xf32, #tpu.memory_space<vmem>>, vector<128x64xf32>
    tpu.vector_store %arg16[%c0_21, %c0_22], %55 {strides = array<i32>} : memref<128x64xf32, #tpu.memory_space<vmem>>, vector<128x64xf32>,
    %c0_i32_23 = arith.constant 0 : i32
    %c4_i32 = arith.constant 4 : i32
    %57 = arith.addi %c0_i32_23, %c4_i32 : i32
    %c1_i32 = arith.constant 1 : i32
    scf.for %arg18 = %c0_i32_23 to %57 step %c1_i32  : i32 {
      %c16_i32 = arith.constant 16 : i32
      %151 = arith.muli %arg18, %c16_i32 : i32
      %152 = tpu.assume_multiple %151, 16 : i32
      %c16_i32_64 = arith.constant 16 : i32
      %153 = arith.muli %arg18, %c16_i32_64 : i32
      %c64_i32 = arith.constant 64 : i32
      %154 = arith.addi %c64_i32, %153 : i32
      %155 = tpu.assume_multiple %154, 16 : i32
      %c16_i32_65 = arith.constant 16 : i32
      %156 = arith.muli %arg18, %c16_i32_65 : i32
      %c128_i32 = arith.constant 128 : i32
      %157 = arith.addi %c128_i32, %156 : i32
      %158 = tpu.assume_multiple %157, 16 : i32
      %159 = arith.index_cast %152 : i32 to index
      %c0_66 = arith.constant 0 : index
      %160 = vector.load %arg17[%159, %c0_66] : memref<192x128xbf16, #tpu.memory_space<vmem>>, vector<16x128xbf16>
      %161 = arith.index_cast %155 : i32 to index
      %c0_67 = arith.constant 0 : index
      %162 = vector.load %arg17[%161, %c0_67] : memref<192x128xbf16, #tpu.memory_space<vmem>>, vector<16x128xbf16>
      %163 = arith.index_cast %158 : i32 to index
      %c0_68 = arith.constant 0 : index
      %164 = vector.load %arg17[%163, %c0_68] : memref<192x128xbf16, #tpu.memory_space<vmem>>, vector<16x128xbf16>
      %cst_69 = arith.constant dense<0.000000e+00> : vector<128x128xf32>
      %165 = tpu.matmul %160, %162, %cst_69 {dimension_numbers = #tpu.dot_dimension_numbers<[0], [0], [1], [1], [0, 1, 1, 1], [], []>} : vector<16x128xbf16>, vector<16x128xbf16>, vector<128x128xf32> -> vector<128x128xf32>
      %166 = vector.broadcast %50 : vector<1x128xf32> to vector<128x128xf32>
      %167 = arith.addf %165, %166 : vector<128x128xf32>
      %cst_70 = arith.constant dense<0xFF800000> : vector<128xf32>
      %168 = vector.multi_reduction <maximumf>, %167, %cst_70 [1] : vector<128x128xf32> to vector<128xf32>
      %169 = vector.shape_cast %168 : vector<128xf32> to vector<128x1xf32>
      %170 = vector.broadcast %169 : vector<128x1xf32> to vector<128x128xf32>
      %171 = arith.subf %167, %170 : vector<128x128xf32>
      %172 = arith.truncf %171 : vector<128x128xf32> to vector<128x128xbf16>
      %173 = math.exp %172 : vector<128x128xbf16>
      %174 = arith.extf %173 : vector<128x128xbf16> to vector<128x128xf32>
      %cst_71 = arith.constant dense<0.000000e+00> : vector<128xf32>
      %175 = vector.multi_reduction <add>, %174, %cst_71 [1] : vector<128x128xf32> to vector<128xf32>
      %176 = vector.shape_cast %175 : vector<128xf32> to vector<128x1xf32>
      %cst_72 = arith.constant dense<0.000000e+00> : vector<128x16xf32>
      %177 = tpu.matmul %173, %164, %cst_72 {dimension_numbers = #tpu.dot_dimension_numbers<[1], [1], [0], [0], [0, 0, 1, 0], [], []>} : vector<128x128xbf16>, vector<16x128xbf16>, vector<128x16xf32> -> vector<128x16xf32>
      %178 = vector.broadcast %176 : vector<128x1xf32> to vector<128x16xf32>
      %179 = arith.divf %177, %178 : vector<128x16xf32>
      %c0_73 = arith.constant 0 : index
      %c0_74 = arith.constant 0 : index
      %180 = vector.load %arg16[%c0_73, %c0_74] : memref<128x64xf32, #tpu.memory_space<vmem>>, vector<128x64xf32>
      %181 = arith.truncf %179 : vector<128x16xf32> to vector<128x16xbf16>
      %c4_i32_75 = arith.constant 4 : i32
      %182 = arith.muli %arg1, %c4_i32_75 : i32
      %183 = arith.addi %182, %arg18 : i32
      %184 = arith.index_cast %183 : i32 to index
      %c0_76 = arith.constant 0 : index
      %c0_77 = arith.constant 0 : index
      %185 = vector.load %arg7[%184, %c0_76, %c0_77] : memref<8x16x64xbf16, #tpu.memory_space<vmem>>, vector<1x16x64xbf16>
      %186 = vector.shape_cast %185 : vector<1x16x64xbf16> to vector<16x64xbf16>
      %cst_78 = arith.constant dense<0.000000e+00> : vector<128x64xf32>
      %187 = tpu.matmul %181, %186, %cst_78 {dimension_numbers = #tpu.dot_dimension_numbers<[1], [0], [0], [1], [0, 0, 1, 1], [], []>} : vector<128x16xbf16>, vector<16x64xbf16>, vector<128x64xf32> -> vector<128x64xf32>
      %188 = arith.addf %180, %187 : vector<128x64xf32>
      %c0_79 = arith.constant 0 : index
      %c0_80 = arith.constant 0 : index
      %189 = vector.load %arg16[%c0_79, %c0_80] : memref<128x64xf32, #tpu.memory_space<vmem>>, vector<128x64xf32>
      tpu.vector_store %arg16[%c0_79, %c0_80], %188 {strides = array<i32>} : memref<128x64xf32, #tpu.memory_space<vmem>>, vector<128x64xf32>,
    }
    %c4_i32_24 = arith.constant 4 : i32
    %c0_25 = arith.constant 0 : index
    %c0_26 = arith.constant 0 : index
    %58 = vector.load %arg16[%c0_25, %c0_26] : memref<128x64xf32, #tpu.memory_space<vmem>>, vector<128x64xf32>
    %59 = arith.index_cast %arg1 : i32 to index
    %c0_27 = arith.constant 0 : index
    %c0_28 = arith.constant 0 : index
    %60 = vector.load %arg9[%59, %c0_27, %c0_28] : memref<2x1x64xf32, #tpu.memory_space<vmem>>, vector<1x1x64xf32>
    %61 = vector.shape_cast %60 : vector<1x1x64xf32> to vector<1x64xf32>
    %62 = arith.index_cast %arg1 : i32 to index
    %c0_29 = arith.constant 0 : index
    %c0_30 = arith.constant 0 : index
    %63 = vector.load %arg10[%62, %c0_29, %c0_30] : memref<2x1x64xf32, #tpu.memory_space<vmem>>, vector<1x1x64xf32>
    %64 = vector.shape_cast %63 : vector<1x1x64xf32> to vector<1x64xf32>
    %cst_31 = arith.constant dense<0.000000e+00> : vector<128xf32>
    %65 = vector.multi_reduction <add>, %58, %cst_31 [1] : vector<128x64xf32> to vector<128xf32>
    %66 = vector.shape_cast %65 : vector<128xf32> to vector<128x1xf32>
    %cst_32 = arith.constant 6.400000e+01 : f32
    %67 = vector.broadcast %cst_32 : f32 to vector<128x1xf32>
    %68 = arith.divf %66, %67 : vector<128x1xf32>
    %69 = vector.broadcast %68 : vector<128x1xf32> to vector<128x64xf32>
    %70 = arith.subf %58, %69 : vector<128x64xf32>
    %71 = arith.mulf %70, %70 : vector<128x64xf32>
    %cst_33 = arith.constant dense<0.000000e+00> : vector<128xf32>
    %72 = vector.multi_reduction <add>, %71, %cst_33 [1] : vector<128x64xf32> to vector<128xf32>
    %73 = vector.shape_cast %72 : vector<128xf32> to vector<128x1xf32>
    %cst_34 = arith.constant 6.400000e+01 : f32
    %74 = vector.broadcast %cst_34 : f32 to vector<128x1xf32>
    %75 = arith.divf %73, %74 : vector<128x1xf32>
    %76 = vector.broadcast %68 : vector<128x1xf32> to vector<128x64xf32>
    %77 = arith.subf %58, %76 : vector<128x64xf32>
    %cst_35 = arith.constant 9.99999974E-6 : f32
    %78 = vector.broadcast %cst_35 : f32 to vector<128x1xf32>
    %79 = arith.addf %75, %78 : vector<128x1xf32>
    %80 = math.rsqrt %79 : vector<128x1xf32>
    %81 = vector.broadcast %80 : vector<128x1xf32> to vector<128x64xf32>
    %82 = arith.mulf %77, %81 : vector<128x64xf32>
    %83 = vector.broadcast %61 : vector<1x64xf32> to vector<128x64xf32>
    %84 = arith.mulf %82, %83 : vector<128x64xf32>
    %85 = vector.broadcast %64 : vector<1x64xf32> to vector<128x64xf32>
    %86 = arith.addf %84, %85 : vector<128x64xf32>
    %87 = arith.truncf %86 : vector<128x64xf32> to vector<128x64xbf16>
    %88 = arith.index_cast %arg1 : i32 to index
    %c0_36 = arith.constant 0 : index
    %c0_37 = arith.constant 0 : index
    %89 = vector.load %arg11[%88, %c0_36, %c0_37] : memref<2x64x256xbf16, #tpu.memory_space<vmem>>, vector<1x64x256xbf16>
    %90 = vector.shape_cast %89 : vector<1x64x256xbf16> to vector<64x256xbf16>
    %cst_38 = arith.constant dense<0.000000e+00> : vector<128x256xf32>
    %91 = tpu.matmul %87, %90, %cst_38 {dimension_numbers = #tpu.dot_dimension_numbers<[1], [0], [0], [1], [0, 0, 1, 1], [], []>} : vector<128x64xbf16>, vector<64x256xbf16>, vector<128x256xf32> -> vector<128x256xf32>
    %92 = arith.index_cast %arg1 : i32 to index
    %c0_39 = arith.constant 0 : index
    %c0_40 = arith.constant 0 : index
    %93 = vector.load %arg12[%92, %c0_39, %c0_40] : memref<2x1x256xf32, #tpu.memory_space<vmem>>, vector<1x1x256xf32>
    %94 = vector.shape_cast %93 : vector<1x1x256xf32> to vector<1x256xf32>
    %95 = vector.broadcast %94 : vector<1x256xf32> to vector<128x256xf32>
    %96 = arith.addf %91, %95 : vector<128x256xf32>
    %cst_41 = arith.constant 5.000000e-01 : f32
    %97 = vector.broadcast %cst_41 : f32 to vector<128x256xf32>
    %98 = arith.mulf %97, %96 : vector<128x256xf32>
    %cst_42 = arith.constant 0.707106769 : f32
    %99 = vector.broadcast %cst_42 : f32 to vector<128x256xf32>
    %100 = arith.mulf %96, %99 : vector<128x256xf32>
    %101 = math.absf %100 : vector<128x256xf32>
    %cst_43 = arith.constant 0.327591091 : f32
    %102 = vector.broadcast %cst_43 : f32 to vector<128x256xf32>
    %103 = arith.mulf %102, %101 : vector<128x256xf32>
    %cst_44 = arith.constant 1.000000e+00 : f32
    %104 = vector.broadcast %cst_44 : f32 to vector<128x256xf32>
    %105 = arith.addf %104, %103 : vector<128x256xf32>
    %106 = tpu.reciprocal %105 {approx = true} : vector<128x256xf32> -> vector<128x256xf32>
    %cst_45 = arith.constant 1.06140542 : f32
    %107 = vector.broadcast %cst_45 : f32 to vector<128x256xf32>
    %108 = arith.mulf %107, %106 : vector<128x256xf32>
    %cst_46 = arith.constant -1.45315206 : f32
    %109 = vector.broadcast %cst_46 : f32 to vector<128x256xf32>
    %110 = arith.addf %108, %109 : vector<128x256xf32>
    %111 = arith.mulf %110, %106 : vector<128x256xf32>
    %cst_47 = arith.constant 1.42141378 : f32
    %112 = vector.broadcast %cst_47 : f32 to vector<128x256xf32>
    %113 = arith.addf %111, %112 : vector<128x256xf32>
    %114 = arith.mulf %113, %106 : vector<128x256xf32>
    %cst_48 = arith.constant -0.284496725 : f32
    %115 = vector.broadcast %cst_48 : f32 to vector<128x256xf32>
    %116 = arith.addf %114, %115 : vector<128x256xf32>
    %117 = arith.mulf %116, %106 : vector<128x256xf32>
    %cst_49 = arith.constant 0.254829586 : f32
    %118 = vector.broadcast %cst_49 : f32 to vector<128x256xf32>
    %119 = arith.addf %117, %118 : vector<128x256xf32>
    %120 = arith.mulf %119, %106 : vector<128x256xf32>
    %cst_50 = arith.constant 0.000000e+00 : f32
    %121 = vector.broadcast %cst_50 : f32 to vector<128x256xf32>
    %122 = arith.subf %121, %101 : vector<128x256xf32>
    %123 = arith.mulf %122, %101 : vector<128x256xf32>
    %124 = math.exp %123 : vector<128x256xf32>
    %125 = arith.mulf %120, %124 : vector<128x256xf32>
    %cst_51 = arith.constant 1.000000e+00 : f32
    %126 = vector.broadcast %cst_51 : f32 to vector<128x256xf32>
    %127 = arith.subf %126, %125 : vector<128x256xf32>
    %cst_52 = arith.constant 0.000000e+00 : f32
    %128 = vector.broadcast %cst_52 : f32 to vector<128x256xf32>
    %129 = arith.cmpf oge, %100, %128 : vector<128x256xf32>
    %cst_53 = arith.constant 0.000000e+00 : f32
    %130 = vector.broadcast %cst_53 : f32 to vector<128x256xf32>
    %131 = arith.subf %130, %127 : vector<128x256xf32>
    %132 = arith.select %129, %127, %131 : vector<128x256xi1>, vector<128x256xf32>
    %cst_54 = arith.constant 1.000000e+00 : f32
    %133 = vector.broadcast %cst_54 : f32 to vector<128x256xf32>
    %134 = arith.addf %133, %132 : vector<128x256xf32>
    %135 = arith.mulf %98, %134 : vector<128x256xf32>
    %136 = arith.truncf %135 : vector<128x256xf32> to vector<128x256xbf16>
    %137 = arith.index_cast %arg1 : i32 to index
    %c0_55 = arith.constant 0 : index
    %c0_56 = arith.constant 0 : index
    %138 = vector.load %arg13[%137, %c0_55, %c0_56] : memref<2x256x64xbf16, #tpu.memory_space<vmem>>, vector<1x256x64xbf16>
    %139 = vector.shape_cast %138 : vector<1x256x64xbf16> to vector<256x64xbf16>
    %cst_57 = arith.constant dense<0.000000e+00> : vector<128x64xf32>
    %140 = tpu.matmul %136, %139, %cst_57 {dimension_numbers = #tpu.dot_dimension_numbers<[1], [0], [0], [1], [0, 0, 1, 1], [], []>} : vector<128x256xbf16>, vector<256x64xbf16>, vector<128x64xf32> -> vector<128x64xf32>
    %141 = arith.index_cast %arg1 : i32 to index
    %c0_58 = arith.constant 0 : index
    %c0_59 = arith.constant 0 : index
    %142 = vector.load %arg14[%141, %c0_58, %c0_59] : memref<2x1x64xf32, #tpu.memory_space<vmem>>, vector<1x1x64xf32>
    %143 = vector.shape_cast %142 : vector<1x1x64xf32> to vector<1x64xf32>
    %144 = vector.broadcast %143 : vector<1x64xf32> to vector<128x64xf32>
    %145 = arith.addf %140, %144 : vector<128x64xf32>
    %146 = arith.addf %58, %145 : vector<128x64xf32>
    %c0_60 = arith.constant 0 : index
    %c0_61 = arith.constant 0 : index
    %147 = vector.load %arg16[%c0_60, %c0_61] : memref<128x64xf32, #tpu.memory_space<vmem>>, vector<128x64xf32>
    tpu.vector_store %arg16[%c0_60, %c0_61], %146 {strides = array<i32>} : memref<128x64xf32, #tpu.memory_space<vmem>>, vector<128x64xf32>,
    %c1_i32_62 = arith.constant 1 : i32
    %148 = arith.cmpi eq, %arg1, %c1_i32_62 : i32
    %149 = arith.extui %148 : i1 to i32
    %c0_i32_63 = arith.constant 0 : i32
    %150 = arith.cmpi ne, %149, %c0_i32_63 : i32
    scf.if %150 {
      %151 = tpu.iota {dimensions = array<i32: 0>} : vector<128x1xi32>
      %c9_i32_64 = arith.constant 9 : i32
      %152 = vector.broadcast %c9_i32_64 : i32 to vector<128x1xi32>
      %153 = arith.cmpi slt, %151, %152 : vector<128x1xi32>
      %cst_65 = arith.constant 0.000000e+00 : f32
      %154 = vector.shape_cast %153 : vector<128x1xi1> to vector<128x1xi1>
      %155 = vector.broadcast %154 : vector<128x1xi1> to vector<128x64xi1>
      %156 = vector.broadcast %cst_65 : f32 to vector<128x64xf32>
      %157 = arith.select %155, %146, %156 : vector<128x64xi1>, vector<128x64xf32>
      %cst_66 = arith.constant dense<0.000000e+00> : vector<64xf32>
      %158 = vector.multi_reduction <add>, %157, %cst_66 [0] : vector<128x64xf32> to vector<64xf32>
      %159 = vector.shape_cast %158 : vector<64xf32> to vector<1x64xf32>
      %cst_67 = arith.constant 0.111111112 : f32
      %160 = vector.broadcast %cst_67 : f32 to vector<1x64xf32>
      %161 = arith.mulf %159, %160 : vector<1x64xf32>
      %c0_68 = arith.constant 0 : index
      %c0_69 = arith.constant 0 : index
      %c0_70 = arith.constant 0 : index
      %162 = vector.load %arg15[%c0_68, %c0_69, %c0_70] : memref<1x1x64xf32, #tpu.memory_space<vmem>>, vector<1x1x64xf32>
      %163 = vector.shape_cast %162 : vector<1x1x64xf32> to vector<1x64xf32>
      %164 = vector.shape_cast %161 : vector<1x64xf32> to vector<1x1x64xf32>
      tpu.vector_store %arg15[%c0_68, %c0_69, %c0_70], %164 {strides = array<i32>} : memref<1x1x64xf32, #tpu.memory_space<vmem>>, vector<1x1x64xf32>,
    } else {
    }
    return
  }
  func.func @transform_0(%arg0: i32, %arg1: i32) -> (i32, i32, i32) {
    %c0_i32 = arith.constant 0 : i32
    %c0_i32_0 = arith.constant 0 : i32
    %c0_i32_1 = arith.constant 0 : i32
    return %arg0, %c0_i32, %c0_i32_0 : i32, i32, i32
  }
  func.func @transform_1(%arg0: i32, %arg1: i32) -> (i32, i32, i32) {
    %c0_i32 = arith.constant 0 : i32
    %c0_i32_0 = arith.constant 0 : i32
    %c0_i32_1 = arith.constant 0 : i32
    %c0_i32_2 = arith.constant 0 : i32
    return %c0_i32, %c0_i32_0, %c0_i32_1 : i32, i32, i32
  }
  func.func @transform_2(%arg0: i32, %arg1: i32) -> (i32, i32, i32) {
    %c0_i32 = arith.constant 0 : i32
    %c0_i32_0 = arith.constant 0 : i32
    %c0_i32_1 = arith.constant 0 : i32
    %c0_i32_2 = arith.constant 0 : i32
    return %c0_i32, %c0_i32_0, %c0_i32_1 : i32, i32, i32
  }
  func.func @transform_3(%arg0: i32, %arg1: i32) -> (i32, i32, i32) {
    %c0_i32 = arith.constant 0 : i32
    %c0_i32_0 = arith.constant 0 : i32
    %c0_i32_1 = arith.constant 0 : i32
    %c0_i32_2 = arith.constant 0 : i32
    return %c0_i32, %c0_i32_0, %c0_i32_1 : i32, i32, i32
  }
  func.func @transform_4(%arg0: i32, %arg1: i32) -> (i32, i32, i32) {
    %c0_i32 = arith.constant 0 : i32
    %c0_i32_0 = arith.constant 0 : i32
    %c0_i32_1 = arith.constant 0 : i32
    %c0_i32_2 = arith.constant 0 : i32
    return %c0_i32, %c0_i32_0, %c0_i32_1 : i32, i32, i32
  }
  func.func @transform_5(%arg0: i32, %arg1: i32) -> (i32, i32, i32) {
    %c0_i32 = arith.constant 0 : i32
    %c0_i32_0 = arith.constant 0 : i32
    %c0_i32_1 = arith.constant 0 : i32
    %c0_i32_2 = arith.constant 0 : i32
    return %c0_i32, %c0_i32_0, %c0_i32_1 : i32, i32, i32
  }
  func.func @transform_6(%arg0: i32, %arg1: i32) -> (i32, i32, i32) {
    %c0_i32 = arith.constant 0 : i32
    %c0_i32_0 = arith.constant 0 : i32
    %c0_i32_1 = arith.constant 0 : i32
    %c0_i32_2 = arith.constant 0 : i32
    return %c0_i32, %c0_i32_0, %c0_i32_1 : i32, i32, i32
  }
  func.func @transform_7(%arg0: i32, %arg1: i32) -> (i32, i32, i32) {
    %c0_i32 = arith.constant 0 : i32
    %c0_i32_0 = arith.constant 0 : i32
    %c0_i32_1 = arith.constant 0 : i32
    %c0_i32_2 = arith.constant 0 : i32
    return %c0_i32, %c0_i32_0, %c0_i32_1 : i32, i32, i32
  }
  func.func @transform_8(%arg0: i32, %arg1: i32) -> (i32, i32, i32) {
    %c0_i32 = arith.constant 0 : i32
    %c0_i32_0 = arith.constant 0 : i32
    %c0_i32_1 = arith.constant 0 : i32
    %c0_i32_2 = arith.constant 0 : i32
    return %c0_i32, %c0_i32_0, %c0_i32_1 : i32, i32, i32
  }
  func.func @transform_9(%arg0: i32, %arg1: i32) -> (i32, i32, i32) {
    %c0_i32 = arith.constant 0 : i32
    %c0_i32_0 = arith.constant 0 : i32
    %c0_i32_1 = arith.constant 0 : i32
    %c0_i32_2 = arith.constant 0 : i32
    return %c0_i32, %c0_i32_0, %c0_i32_1 : i32, i32, i32
  }
  func.func @transform_10(%arg0: i32, %arg1: i32) -> (i32, i32, i32) {
    %c0_i32 = arith.constant 0 : i32
    %c0_i32_0 = arith.constant 0 : i32
    %c0_i32_1 = arith.constant 0 : i32
    %c0_i32_2 = arith.constant 0 : i32
    return %c0_i32, %c0_i32_0, %c0_i32_1 : i32, i32, i32
  }
  func.func @transform_11(%arg0: i32, %arg1: i32) -> (i32, i32, i32) {
    %c0_i32 = arith.constant 0 : i32
    %c0_i32_0 = arith.constant 0 : i32
    %c0_i32_1 = arith.constant 0 : i32
    %c0_i32_2 = arith.constant 0 : i32
    return %c0_i32, %c0_i32_0, %c0_i32_1 : i32, i32, i32
  }
  func.func @transform_12(%arg0: i32, %arg1: i32) -> (i32, i32, i32) {
    %c0_i32 = arith.constant 0 : i32
    %c0_i32_0 = arith.constant 0 : i32
    %c0_i32_1 = arith.constant 0 : i32
    %c0_i32_2 = arith.constant 0 : i32
    return %c0_i32, %c0_i32_0, %c0_i32_1 : i32, i32, i32
  }
  func.func @transform_13(%arg0: i32, %arg1: i32) -> (i32, i32, i32) {
    %c0_i32 = arith.constant 0 : i32
    %c0_i32_0 = arith.constant 0 : i32
    %c0_i32_1 = arith.constant 0 : i32
    return %arg0, %c0_i32, %c0_i32_0 : i32, i32, i32
  }
}

</mosaic_0001>

<bundles_post_ra>
// kernel: encoder_forward.3
= control target key start
LH: loop header
LB: loop body
LE: loop exit
PB: predicated region body
PF: predicated region fallthrough
CT: control target
= control target key end

     0   :  { %12 = vsyncpa [#allocation3], 0  ;;  %v266_v1 = vmov 0.0   ;;  %vm267_vm0 = vmmov 0   ;;  %s340_s0 = inlined_call_operand.vmem [shape: f32[2,64], index: 0, kind: input, shape index: {}]   ;;  %s341_s1 = inlined_call_operand.vmem [shape: bf16[64,64], index: 1, kind: input, shape index: {}]   ;;  %s342_s2 = inlined_call_operand.vmem [shape: f32[1,64], index: 2, kind: input, shape index: {}]   ;;  %s343_s3 = inlined_call_operand.vmem [shape: f32[2,32], index: 3, kind: input, shape index: {}]   ;;  %s344_s4 = inlined_call_operand.hbm [shape: f32[2,32], index: 4, kind: output, shape index: {0}]   ;;  %s345_s5 = inlined_call_operand.hbm [shape: f32[2,32], index: 5, kind: output, shape index: {1}]   ;;  %s346_s6 = inlined_call_operand.hbm [shape: f32[2,32], index: 6, kind: output, shape index: {2}]  }
   0x1   :  { %v196_v0 = vld [vmem:[%s341_s1 + $0x18] sm:$0xff]   ;;  %178 = vmatprep.subr.bf16.mxu0 %v266_v1  ;;  %v197_v2 = vld [vmem:[%s341_s1 + $0x10] sm:$0xff]   ;;  %186 = vmatprep.mubr.msk.bf16.mxu0 %vm267_vm0, %v266_v1 }
   0x2   :  { %179 = vmatpush3.bf16.msra.mxu0 %v196_v0 }
   0x3   :  { %180 = vmatprep.subr.bf16.mxu0 %v266_v1 }
   0x4   :  { %13 = vsyncpa [#allocation5], 0  ;;  %v198_v3 = vld [vmem:[%s341_s1 + $0x8] sm:$0xff]   ;;  %v199_v4 = vld [vmem:[%s341_s1] sm:$0xff]   ;;  %vm64_vm1 = vcmask 523264   ;;  %vm108_vm2 = vcmask 254976  }
   0x5   :  { %v23_v5 = vld [vmem:[%s340_s0] sm:$0x3]  ;;  %s268_s0 = smov [#allocation4]  }
   0x6   :  { %181 = vmatpush3.bf16.msra.mxu0 %v197_v2  ;;  %v24_v6 = vpack.c.bf16 %v23_v5, %v23_v5  ;;  %v167_v7 = vld [vmem:[%s342_s2] ss:$0 sm:$0xff]  ;;  %s142_s1 = sshll.u32 %s268_s0, 4  ;;  %s143_s1 = int_to_ptr.vmem [resolvable:$true] %s142_s1 }
   0x7   :  { %182 = vmatprep.subr.bf16.mxu0 %v266_v1  ;;  %s202_s9 = scalar_lea.vmem %s143_s1, 32  ;;  %p207_p1 = scmp.lt.s32.totalorder %s143_s1, %s143_s1 }
   0x8   :  { %p203_p0 = scmp.ne.s32.totalorder %s143_s1, %s202_s9  ;;  %p208_p2 = scmp.lt.s32.totalorder %s202_s9, %s202_s9 }
   0xa   :  { %183 = vmatpush3.bf16.msra.mxu0 %v198_v3  ;;  %p209_p3 = por %p208_p2, %p207_p1 }
   0xb   :  { %184 = vmatprep.subr.bf16.mxu0 %v266_v1 }
   0xc   :  { %p210_p4 = pnand %p209_p3, %p203_p0 }
   0xe   :  { %185 = vmatpush3.bf16.msra.mxu0 %v199_v4 }
  0x11   :  { %187 = vmatmul.mubr.msk.bf16.vlgmr.msra.gmra.mxu0 %vm64_vm1, %v24_v6 }
  0xd1   :  { %v102_v8 = vpop.f32.mrf.mxu0 }
  0xd2   :  { %v103_v9 = vadd.f32 %v167_v7, %v102_v8 }
  0xd3   :  { %v188_v10 = vpop.f32.mrf.mxu0 }
  0xd4   :  { %v116_v11 = vmul.f32 0.5, %v103_v9  ;;  %109 = vst.msk [vmem:[#allocation4] sm:$0x3] %vm108_vm2, %v103_v9 }
  0xd5   :  { %v105_v12 = vpop.f32.mrf.mxu0 }
  0xd6   :  { %v117_v13 = vmul.f32 1.442695, %v116_v11 }
  0xd7   :  { %v189_v14 = vpop.f32.mrf.mxu0 }
  0xd8   :  { %200 = vpow2.f32 %v117_v13 }
  0xd9   :  { %213 = shalt.err (!%p210_p4)
}
  0xda   :  { %145 = dma.vmem_to_hbm [thread:$0]  %s143_s1, 32, %s345_s5, [#allocation5]   ;;  %v115_v16 = vld [vmem:[%s343_s3] sm:$0x3] }
  0xdb   :  { %s269_s11 = smov 96   ;;  %s270_s14 = smov [#allocation2]  }
  0xdc   :  { %s132_s15 = sshll.u32 %s270_s14, 4  ;;  %s271_s16 = smov [#allocation6]   ;;  %s133_s15 = int_to_ptr.vmem [resolvable:$true] %s132_s15 }
  0xdd   :  { %s152_s17 = sshll.u32 %s271_s16, 4  ;;  %s222_s5 = scalar_lea.vmem %s133_s15, 32  ;;  %s153_s17 = int_to_ptr.vmem [resolvable:$true] %s152_s17 }
  0xde   :  { %p223_p5 = scmp.ne.s32.totalorder %s133_s15, %s222_s5  ;;  %p227_p6 = scmp.lt.s32.totalorder %s133_s15, %s133_s15 }
  0xdf   :  { %p228_p7 = scmp.lt.s32.totalorder %s222_s5, %s222_s5 }
  0xe1   :  { %p229_p8 = por %p228_p7, %p227_p6 }
  0xe3   :  { %p230_p9 = pnand %p229_p8, %p223_p5 }
  0xe5   :  { %v201_v15 = vpop.eup %200 }
  0xe6   :  { %120 = vrot.lane.b32.xlu0 %v201_v15, %s269_s11 }
  0xea   :  { %111 = vrot.lane.b32.xlu0 %v103_v9, %s269_s11 }
 0x158   :  { %v121_v17 = vpop.permute.xlu0 %120 }
 0x159   :  { %v123_v18 = vmul.f32 %v121_v17, %v115_v16 }
 0x15b   :  { %v124_v19 = vadd.f32 %v123_v18, %v103_v9 }
 0x15c   :  { %v112_v20 = vpop.permute.xlu0 %111 }
 0x15d   :  { %114 = vst.msk [vmem:[#allocation6] sm:$0x3] %vm108_vm2, %v112_v20  ;;  %125 = vst.msk [vmem:[#allocation2] sm:$0x3] %vm108_vm2, %v124_v19 }
 0x15e   :  { %233 = shalt.err (!%p230_p9)
}
 0x15f   :  { %135 = dma.vmem_to_hbm [thread:$0]  %s133_s15, 32, %s344_s4, [#allocation3]  }
 0x160   :  { %s242_s19 = scalar_lea.vmem %s153_s17, 32  ;;  %p247_p11 = scmp.lt.s32.totalorder %s153_s17, %s153_s17 }
 0x161   :  { %p243_p10 = scmp.ne.s32.totalorder %s153_s17, %s242_s19  ;;  %p248_p12 = scmp.lt.s32.totalorder %s242_s19, %s242_s19 }
 0x163   :  { %p249_p13 = por %p248_p12, %p247_p11 }
 0x165   :  { %p250_p0 = pnand %p249_p13, %p243_p10 }
 0x167   :  { %253 = shalt.err (!%p250_p0)
}
 0x168   :  { %155 = dma.vmem_to_hbm [thread:$0]  %s153_s17, 32, %s346_s6, [#allocation5]  }
 0x169   :  { %262 = dma.done.wait [#allocation3], 32  }
 0x16a   :  { %263 = vsyncadd [#allocation3], 4294967264 }
 0x16b   :  { %264 = dma.done.wait [#allocation5], 64  }
 0x16c   :  { %265 = vsyncadd [#allocation5], 4294967232 }
 0x16d   :  { %165 = vsyncpa [#allocation3], 1 }
 0x16e   :  { %166 = vsyncpa [#allocation5], 1 }

// kernel: encoder_forward.2
= control target key start
LH: loop header
LB: loop body
LE: loop exit
PB: predicated region body
PF: predicated region fallthrough
CT: control target
= control target key end

     0   :  { %s4503_s25 = smov 0   ;;  %s4505_s26 = smov 0   ;;  %s6222_s0 = inlined_call_operand.vmem [shape: f32[2,128,64], index: 0, kind: input, shape index: {}]   ;;  %s6223_s1 = inlined_call_operand.vmem [shape: f32[2,1,64], index: 1, kind: input, shape index: {}]   ;;  %s6224_s2 = inlined_call_operand.vmem [shape: f32[2,1,64], index: 2, kind: input, shape index: {}]   ;;  %s6225_s3 = inlined_call_operand.vmem [shape: bf16[2,64,192], index: 3, kind: input, shape index: {}]   ;;  %s6226_s4 = inlined_call_operand.vmem [shape: f32[2,1,192], index: 4, kind: input, shape index: {}]   ;;  %s6227_s5 = inlined_call_operand.vmem [shape: bf16[8,16,64], index: 5, kind: input, shape index: {}]   ;;  %s6228_s6 = inlined_call_operand.vmem [shape: f32[2,1,64], index: 6, kind: input, shape index: {}]   ;;  %s6229_s7 = inlined_call_operand.vmem [shape: f32[2,1,64], index: 7, kind: input, shape index: {}]   ;;  %s6230_s8 = inlined_call_operand.vmem [shape: f32[2,1,64], index: 8, kind: input, shape index: {}]   ;;  %s6231_s9 = inlined_call_operand.vmem [shape: bf16[2,64,256], index: 9, kind: input, shape index: {}]   ;;  %s6232_s10 = inlined_call_operand.vmem [shape: f32[2,1,256], index: 10, kind: input, shape index: {}]   ;;  %s6233_s11 = inlined_call_operand.vmem [shape: bf16[2,256,64], index: 11, kind: input, shape index: {}]   ;;  %s6234_s12 = inlined_call_operand.vmem [shape: f32[2,1,64], index: 12, kind: input, shape index: {}]   ;;  %s6235_s13 = inlined_call_operand.vmem [shape: f32[2,1,64], index: 13, kind: output, shape index: {}]  }
   0x1   :  { %s4507_s27 = smov 0   ;;  %s4509_s28 = smov 0  }
   0x2   :  { %s4511_s29 = smov 0  }
   0x3 LB: > { %s32_s30 = sadd.s32 1, %s4417_s27  ;;  %s35_s14 = sadd.s32 1, %s4421_s28  ;;  %s4425_s29 = sphi %s4511_s29, %s23_s29   ;;  %s4421_s28 = sphi %s4509_s28, %s6394_s28   ;;  %s4417_s27 = sphi %s4507_s27, %s6393_s27   ;;  %s4413_s26 = sphi %s4505_s26, %s6392_s26   ;;  %s4409_s25 = sphi %s4503_s25, %s6391_s25  }
   0x4   : > { %p33_p0 = scmp.ge.s32.totalorder %s32_s30, 2  ;;  %p3643_p1 = scmp.ge.s32.totalorder %s4425_s29, 1 }
   0x5   : > { %p399_p2 = scmp.lt.s32.totalorder %s4425_s29, 5 }
   0x6   : > { %s6396_s30 = smov (%p33_p0, %s32_s30), 0  ;;  %s6398_s14 = smov (!%p33_p0, %s35_s14), %s4421_s28 }
   0x7   : > { %p400_p3 = pnand %p3643_p1, %p399_p2  ;;  %p37_p4 = scmp.ge.s32.totalorder %s6398_s14, 2 }
   0x9   : > { %s6400_s14 = smov (%p37_p4, %s6398_s14), 0  ;;  %403 = sbr.rel (%p400_p3) target bundleno = 2584 (0xa18), region = 72 }
   0xe   : > { %p441_p5 = scmp.lt.s32.totalorder %s4413_s26, 1  ;;  %p3646_p6 = scmp.ne.s32.totalorder %s4409_s25, 0 }
  0x10   : > { %s6402_s26 = smov (!%p441_p5, %s4413_s26), 1  ;;  %453 = sbr.rel (%p3646_p6) target bundleno = 30 (0x1e), region = 76 }
  0x11   : > { %s3761_s15 = sshll.u32 %s6402_s26, 7 }
  0x12   : > { %s4545_s21 = scalar_lea.vmem %s6222_s0, %s3761_s15 }
  0x15   : > { %v454_v0 = vld [vmem:[%s4545_s21] sm:$0xff]  ;;  %vm470_vm0 = vcmask 523264   ;;  %v455_v1 = vld [vmem:[%s4545_s21 + $0x8] sm:$0xff]  ;;  %v456_v2 = vld [vmem:[%s4545_s21 + $0x10] sm:$0xff] }
  0x16   : > { %471 = vst.msk [vmem:[#allocation2] sm:$0xff] %vm470_vm0, %v454_v0  ;;  %472 = vst.msk [vmem:[#allocation2 + $0x8] sm:$0xff] %vm470_vm0, %v455_v1  ;;  %v457_v3 = vld [vmem:[%s4545_s21 + $0x18] sm:$0xff]  ;;  %v458_v4 = vld [vmem:[%s4545_s21 + $0x20] sm:$0xff] }
  0x17   : > { %473 = vst.msk [vmem:[#allocation2 + $0x10] sm:$0xff] %vm470_vm0, %v456_v2  ;;  %v459_v5 = vld [vmem:[%s4545_s21 + $0x28] sm:$0xff]  ;;  %474 = vst.msk [vmem:[#allocation2 + $0x18] sm:$0xff] %vm470_vm0, %v457_v3  ;;  %v460_v6 = vld [vmem:[%s4545_s21 + $0x30] sm:$0xff] }
  0x18   : > { %475 = vst.msk [vmem:[#allocation2 + $0x20] sm:$0xff] %vm470_vm0, %v458_v4  ;;  %476 = vst.msk [vmem:[#allocation2 + $0x28] sm:$0xff] %vm470_vm0, %v459_v5  ;;  %v461_v7 = vld [vmem:[%s4545_s21 + $0x38] sm:$0xff]  ;;  %v462_v8 = vld [vmem:[%s4545_s21 + $0x40] sm:$0xff] }
  0x19   : > { %477 = vst.msk [vmem:[#allocation2 + $0x30] sm:$0xff] %vm470_vm0, %v460_v6  ;;  %478 = vst.msk [vmem:[#allocation2 + $0x38] sm:$0xff] %vm470_vm0, %v461_v7  ;;  %v463_v9 = vld [vmem:[%s4545_s21 + $0x48] sm:$0xff]  ;;  %v464_v10 = vld [vmem:[%s4545_s21 + $0x50] sm:$0xff] }
  0x1a   : > { %479 = vst.msk [vmem:[#allocation2 + $0x40] sm:$0xff] %vm470_vm0, %v462_v8  ;;  %v465_v11 = vld [vmem:[%s4545_s21 + $0x58] sm:$0xff]  ;;  %480 = vst.msk [vmem:[#allocation2 + $0x48] sm:$0xff] %vm470_vm0, %v463_v9  ;;  %v466_v12 = vld [vmem:[%s4545_s21 + $0x60] sm:$0xff] }
  0x1b   : > { %481 = vst.msk [vmem:[#allocation2 + $0x50] sm:$0xff] %vm470_vm0, %v464_v10  ;;  %482 = vst.msk [vmem:[#allocation2 + $0x58] sm:$0xff] %vm470_vm0, %v465_v11  ;;  %v467_v13 = vld [vmem:[%s4545_s21 + $0x68] sm:$0xff]  ;;  %v468_v14 = vld [vmem:[%s4545_s21 + $0x70] sm:$0xff] }
  0x1c   : > { %483 = vst.msk [vmem:[#allocation2 + $0x60] sm:$0xff] %vm470_vm0, %v466_v12  ;;  %484 = vst.msk [vmem:[#allocation2 + $0x68] sm:$0xff] %vm470_vm0, %v467_v13  ;;  %v469_v15 = vld [vmem:[%s4545_s21 + $0x78] sm:$0xff] }
  0x1d   : > { %485 = vst.msk [vmem:[#allocation2 + $0x70] sm:$0xff] %vm470_vm0, %v468_v14  ;;  %486 = vst.msk [vmem:[#allocation2 + $0x78] sm:$0xff] %vm470_vm0, %v469_v15 }
  0x1e PF: > { %v4580_v16 = vld [vmem:[#allocation2] sm:$0xff]  ;;  %vm507_vm1 = vcmask 523264   ;;  %s1159_s24 = scalar_lea.vmem %s6228_s6, %s4409_s25  ;;  %v4586_v17 = vld [vmem:[#allocation2 + $0x10] sm:$0xff]  ;;  %v4588_v18 = vld [vmem:[#allocation2 + $0x8] sm:$0xff]  ;;  %s3762_s15 = sshll.u32 %s4409_s25, 6 }
  0x1f   : > { %v508_v19 = vsel %vm507_vm1, %v4580_v16, 0.0  ;;  %v3692_v20 = vld [vmem:[%s1159_s24] ss:$0 sm:$0xff]  ;;  %v514_v21 = vsel %vm507_vm1, %v4586_v17, 0.0  ;;  %v4594_v22 = vld [vmem:[#allocation2 + $0x18] sm:$0xff]  ;;  %v511_v27 = vsel %vm507_vm1, %v4588_v18, 0.0  ;;  %s4768_s19 = scalar_lea.vmem %s6225_s3, %s3762_s15  ;;  %s503_s22 = scalar_lea.vmem %s6223_s1, %s4409_s25 }
  0x20   : > { %v1167_v23 = vadd.f32 %v3692_v20, %v4580_v16  ;;  %509 = vadd.xlane.f32.xlu0 %v508_v19  ;;  %v1169_v24 = vadd.f32 %v3692_v20, %v4586_v17  ;;  %515 = vadd.xlane.f32.xlu1 %v514_v21  ;;  %v1168_v25 = vadd.f32 %v3692_v20, %v4588_v18  ;;  %v4599_v26 = vld [vmem:[#allocation2 + $0x20] sm:$0xff]  ;;  %v517_v28 = vsel %vm507_vm1, %v4594_v22, 0.0  ;;  %v4607_v31 = vld [vmem:[#allocation2 + $0x28] sm:$0xff]  ;;  %v4618_v36 = vld [vmem:[#allocation2 + $0x30] sm:$0xff]  ;;  %s505_s16 = scalar_lea.vmem %s6224_s2, %s4409_s25  ;;  %s6236_s17 = sshll.u32 %s4409_s25, 1 }
  0x21   : > { %v1170_v29 = vadd.f32 %v3692_v20, %v4594_v22  ;;  %v1171_v30 = vadd.f32 %v3692_v20, %v4599_v26  ;;  %v4609_v32 = vld [vmem:[#allocation2 + $0x40] sm:$0xff]  ;;  %v1172_v33 = vadd.f32 %v3692_v20, %v4607_v31  ;;  %v4616_v35 = vld [vmem:[#allocation2 + $0x48] sm:$0xff]  ;;  %v1173_v38 = vadd.f32 %v3692_v20, %v4618_v36  ;;  %v4624_v39 = vld [vmem:[#allocation2 + $0x38] sm:$0xff]  ;;  %s781_s21 = scalar_lea.vmem %s6226_s4, %s6236_s17 }
  0x22   : > { %1183 = vst.msk [vmem:[#allocation2] sm:$0xff] %vm507_vm1, %v1167_v23  ;;  %1185 = vst.msk [vmem:[#allocation2 + $0x10] sm:$0xff] %vm507_vm1, %v1169_v24  ;;  %v1175_v34 = vadd.f32 %v3692_v20, %v4609_v32  ;;  %v1176_v37 = vadd.f32 %v3692_v20, %v4616_v35  ;;  %v4626_v40 = vld [vmem:[#allocation2 + $0x50] sm:$0xff]  ;;  %v1174_v41 = vadd.f32 %v3692_v20, %v4624_v39  ;;  %v4632_v43 = vld [vmem:[#allocation2 + $0x58] sm:$0xff]  ;;  %v520_v45 = vsel %vm507_vm1, %v4599_v26, 0.0 }
  0x23   : > { %1184 = vst.msk [vmem:[#allocation2 + $0x8] sm:$0xff] %vm507_vm1, %v1168_v25  ;;  %1186 = vst.msk [vmem:[#allocation2 + $0x18] sm:$0xff] %vm507_vm1, %v1170_v29  ;;  %v1177_v42 = vadd.f32 %v3692_v20, %v4626_v40  ;;  %v4634_v44 = vld [vmem:[#allocation2 + $0x60] sm:$0xff]  ;;  %v523_v46 = vsel %vm507_vm1, %v4607_v31, 0.0  ;;  %v1178_v47 = vadd.f32 %v3692_v20, %v4632_v43  ;;  %v4644_v49 = vld [vmem:[#allocation2 + $0x68] sm:$0xff]  ;;  %v532_v55 = vsel %vm507_vm1, %v4609_v32, 0.0 }
  0x24   : > { %1187 = vst.msk [vmem:[#allocation2 + $0x20] sm:$0xff] %vm507_vm1, %v1171_v30  ;;  %512 = vadd.xlane.f32.xlu0 %v511_v27  ;;  %518 = vadd.xlane.f32.xlu1 %v517_v28  ;;  %1188 = vst.msk [vmem:[#allocation2 + $0x28] sm:$0xff] %vm507_vm1, %v1172_v33  ;;  %v1179_v48 = vadd.f32 %v3692_v20, %v4634_v44  ;;  %v4646_v50 = vld [vmem:[#allocation2 + $0x70] sm:$0xff]  ;;  %v1180_v51 = vadd.f32 %v3692_v20, %v4644_v49  ;;  %v4652_v53 = vld [vmem:[#allocation2 + $0x78] sm:$0xff]  ;;  %v535_v56 = vsel %vm507_vm1, %v4616_v35, 0.0 }
  0x25   : > { %1191 = vst.msk [vmem:[#allocation2 + $0x40] sm:$0xff] %vm507_vm1, %v1175_v34  ;;  %1192 = vst.msk [vmem:[#allocation2 + $0x48] sm:$0xff] %vm507_vm1, %v1176_v37  ;;  %v1181_v52 = vadd.f32 %v3692_v20, %v4646_v50  ;;  %v1182_v54 = vadd.f32 %v3692_v20, %v4652_v53  ;;  %v526_v57 = vsel %vm507_vm1, %v4618_v36, 0.0  ;;  %v529_v58 = vsel %vm507_vm1, %v4624_v39, 0.0 }
  0x26   : > { %1189 = vst.msk [vmem:[#allocation2 + $0x30] sm:$0xff] %vm507_vm1, %v1173_v38  ;;  %1190 = vst.msk [vmem:[#allocation2 + $0x38] sm:$0xff] %vm507_vm1, %v1174_v41  ;;  %v538_v59 = vsel %vm507_vm1, %v4626_v40, 0.0  ;;  %v541_v60 = vsel %vm507_vm1, %v4632_v43, 0.0  ;;  %v544_v61 = vsel %vm507_vm1, %v4634_v44, 0.0  ;;  %v547_v62 = vsel %vm507_vm1, %v4644_v49, 0.0 }
  0x27   : > { %1193 = vst.msk [vmem:[#allocation2 + $0x50] sm:$0xff] %vm507_vm1, %v1177_v42  ;;  %1194 = vst.msk [vmem:[#allocation2 + $0x58] sm:$0xff] %vm507_vm1, %v1178_v47  ;;  %v550_v63 = vsel %vm507_vm1, %v4646_v50, 0.0  ;;  %v553_v0 = vsel %vm507_vm1, %v4652_v53, 0.0 }
  0x28   : > { %1195 = vst.msk [vmem:[#allocation2 + $0x60] sm:$0xff] %vm507_vm1, %v1179_v48  ;;  %521 = vadd.xlane.f32.xlu0 %v520_v45  ;;  %524 = vadd.xlane.f32.xlu1 %v523_v46  ;;  %1196 = vst.msk [vmem:[#allocation2 + $0x68] sm:$0xff] %vm507_vm1, %v1180_v51 }
  0x29   : > { %1197 = vst.msk [vmem:[#allocation2 + $0x70] sm:$0xff] %vm507_vm1, %v1181_v52  ;;  %1198 = vst.msk [vmem:[#allocation2 + $0x78] sm:$0xff] %vm507_vm1, %v1182_v54 }
  0x2c   : > { %533 = vadd.xlane.f32.xlu0 %v532_v55  ;;  %536 = vadd.xlane.f32.xlu1 %v535_v56 }
  0x30   : > { %527 = vadd.xlane.f32.xlu0 %v526_v57  ;;  %530 = vadd.xlane.f32.xlu1 %v529_v58 }
  0x34   : > { %539 = vadd.xlane.f32.xlu0 %v538_v59  ;;  %542 = vadd.xlane.f32.xlu1 %v541_v60 }
  0x38   : > { %545 = vadd.xlane.f32.xlu0 %v544_v61  ;;  %548 = vadd.xlane.f32.xlu1 %v547_v62 }
  0x3c   : > { %551 = vadd.xlane.f32.xlu0 %v550_v63  ;;  %554 = vadd.xlane.f32.xlu1 %v553_v0 }
  0xa9   : > { %v510_v1 = vpop.xlane.xlu0 %509  ;;  %v516_v2 = vpop.xlane.xlu1 %515 }
  0xaa   : > { %v557_v3 = vmul.f32 0.015625, %v510_v1  ;;  %v559_v4 = vmul.f32 0.015625, %v516_v2 }
  0xac   : > { %v4681_v5 = vsub.f32 %v4580_v16, %v557_v3  ;;  %v4684_v6 = vsub.f32 %v4586_v17, %v559_v4 }
  0xad   : > { %v513_v7 = vpop.xlane.xlu0 %512  ;;  %v519_v8 = vpop.xlane.xlu1 %518 }
  0xae   : > { %v558_v9 = vmul.f32 0.015625, %v513_v7  ;;  %v560_v10 = vmul.f32 0.015625, %v519_v8  ;;  %v589_v11 = vmul.f32 %v4681_v5, %v4681_v5  ;;  %v591_v12 = vmul.f32 %v4684_v6, %v4684_v6 }
  0xb0   : > { %v4691_v13 = vsub.f32 %v4588_v18, %v558_v9  ;;  %v4694_v14 = vsub.f32 %v4594_v22, %v560_v10  ;;  %v605_v15 = vsel %vm507_vm1, %v589_v11, 0.0  ;;  %v611_v19 = vsel %vm507_vm1, %v591_v12, 0.0 }
  0xb1   : > { %606 = vadd.xlane.f32.xlu0 %v605_v15  ;;  %v522_v16 = vpop.xlane.xlu0 %521  ;;  %v525_v17 = vpop.xlane.xlu1 %524 }
  0xb2   : > { %v561_v20 = vmul.f32 0.015625, %v522_v16  ;;  %v562_v21 = vmul.f32 0.015625, %v525_v17  ;;  %v590_v23 = vmul.f32 %v4691_v13, %v4691_v13  ;;  %v592_v24 = vmul.f32 %v4694_v14, %v4694_v14 }
  0xb4   : > { %v4703_v18 = vsub.f32 %v4599_v26, %v561_v20  ;;  %v4706_v22 = vsub.f32 %v4607_v31, %v562_v21  ;;  %v608_v25 = vsel %vm507_vm1, %v590_v23, 0.0  ;;  %v614_v29 = vsel %vm507_vm1, %v592_v24, 0.0  ;;  %v4085_v20 = vld [vmem:[%s4768_s19 + $0x30] ss:$8 sps:$4 sm:$0xff]   ;;  %v4086_v24 = vld [vmem:[%s4768_s19 + $0x24] ss:$8 sps:$4 sm:$0xff]  }
  0xb5   : > { %612 = vadd.xlane.f32.xlu0 %v611_v19  ;;  %609 = vadd.xlane.f32.xlu1 %v608_v25  ;;  %v534_v27 = vpop.xlane.xlu0 %533  ;;  %v537_v28 = vpop.xlane.xlu1 %536  ;;  %v4083_v19 = vld [vmem:[%s4768_s19 + $0x34] ss:$8 sps:$4 sm:$0xff]   ;;  %v4088_v25 = vld [vmem:[%s4768_s19 + $0x20] ss:$8 sps:$4 sm:$0xff]  }
  0xb6   : > { %v565_v30 = vmul.f32 0.015625, %v534_v27  ;;  %v566_v33 = vmul.f32 0.015625, %v537_v28  ;;  %v593_v34 = vmul.f32 %v4703_v18, %v4703_v18  ;;  %v594_v26 = vmul.f32 %v4706_v22, %v4706_v22  ;;  %866 = vmatprep.subr.bf16.mxu0 %v4083_v19  ;;  %4006 = vmatprep.subr.bf16.mxu1 %v4083_v19  ;;  %v4089_v28 = vld [vmem:[%s4768_s19 + $0x14] ss:$8 sps:$4 sm:$0xff]  }
  0xb7   : > { %867 = vmatpush1.bf16.msra.mxu0 %v4085_v20  ;;  %4010 = vmatpush1.bf16.msra.mxu1 %v4085_v20 }
  0xb8   : > { %v4715_v37 = vsub.f32 %v4609_v32, %v565_v30  ;;  %v4718_v31 = vsub.f32 %v4616_v35, %v566_v33  ;;  %v617_v38 = vsel %vm507_vm1, %v593_v34, 0.0  ;;  %v620_v45 = vsel %vm507_vm1, %v594_v26, 0.0  ;;  %868 = vmatprep.subr.bf16.mxu0 %v4086_v24  ;;  %4007 = vmatprep.subr.bf16.mxu1 %v4086_v24  ;;  %v4092_v30 = vld [vmem:[%s4768_s19 + $0x4] ss:$8 sps:$4 sm:$0xff]   ;;  %v4094_v33 = vld [vmem:[%s4768_s19] ss:$8 sps:$4 sm:$0xff]  }
  0xb9   : > { %615 = vadd.xlane.f32.xlu1 %v614_v29  ;;  %618 = vadd.xlane.f32.xlu0 %v617_v38  ;;  %v528_v41 = vpop.xlane.xlu0 %527  ;;  %v531_v42 = vpop.xlane.xlu1 %530  ;;  %v4091_v29 = vld [vmem:[%s4768_s19 + $0x10] ss:$8 sps:$4 sm:$0xff]   ;;  %v4431_v34 = vmov 0  }
  0xba   : > { %v563_v46 = vmul.f32 0.015625, %v528_v41  ;;  %v564_v47 = vmul.f32 0.015625, %v531_v42  ;;  %v597_v48 = vmul.f32 %v4715_v37, %v4715_v37  ;;  %v598_v32 = vmul.f32 %v4718_v31, %v4718_v31  ;;  %890 = vmatprep.mubr.bf16.mxu0 %v4431_v34  ;;  %930 = vmatprep.mubr.bf16.mxu1 %v4431_v34 }
  0xbb   : > { %869 = vmatpush1.bf16.msra.mxu0 %v4088_v25  ;;  %4011 = vmatpush1.bf16.msra.mxu1 %v4088_v25 }
  0xbc   : > { %v4727_v51 = vsub.f32 %v4618_v36, %v563_v46  ;;  %v4730_v35 = vsub.f32 %v4624_v39, %v564_v47  ;;  %v629_v52 = vsel %vm507_vm1, %v597_v48, 0.0  ;;  %v632_v56 = vsel %vm507_vm1, %v598_v32, 0.0  ;;  %870 = vmatprep.subr.bf16.mxu0 %v4089_v28  ;;  %4008 = vmatprep.subr.bf16.mxu1 %v4089_v28 }
  0xbd   : > { %621 = vadd.xlane.f32.xlu1 %v620_v45  ;;  %630 = vadd.xlane.f32.xlu0 %v629_v52  ;;  %v540_v54 = vpop.xlane.xlu0 %539  ;;  %v543_v55 = vpop.xlane.xlu1 %542 }
  0xbe   : > { %v567_v57 = vmul.f32 0.015625, %v540_v54  ;;  %v568_v58 = vmul.f32 0.015625, %v543_v55  ;;  %v595_v59 = vmul.f32 %v4727_v51, %v4727_v51  ;;  %v596_v36 = vmul.f32 %v4730_v35, %v4730_v35 }
  0xbf   : > { %871 = vmatpush1.bf16.msra.mxu0 %v4091_v29  ;;  %4012 = vmatpush1.bf16.msra.mxu1 %v4091_v29 }
  0xc0   : > { %v4739_v60 = vsub.f32 %v4626_v40, %v567_v57  ;;  %v4742_v39 = vsub.f32 %v4632_v43, %v568_v58  ;;  %v623_v61 = vsel %vm507_vm1, %v595_v59, 0.0  ;;  %v626_v0 = vsel %vm507_vm1, %v596_v36, 0.0  ;;  %872 = vmatprep.subr.bf16.mxu0 %v4092_v30  ;;  %4009 = vmatprep.subr.bf16.mxu1 %v4092_v30 }
  0xc1   : > { %633 = vadd.xlane.f32.xlu1 %v632_v56  ;;  %624 = vadd.xlane.f32.xlu0 %v623_v61  ;;  %v546_v62 = vpop.xlane.xlu0 %545  ;;  %v549_v63 = vpop.xlane.xlu1 %548 }
  0xc2   : > { %v569_v1 = vmul.f32 0.015625, %v546_v62  ;;  %v570_v2 = vmul.f32 0.015625, %v549_v63  ;;  %v599_v3 = vmul.f32 %v4739_v60, %v4739_v60  ;;  %v600_v40 = vmul.f32 %v4742_v39, %v4742_v39 }
  0xc3   : > { %873 = vmatpush1.bf16.msra.mxu0 %v4094_v33  ;;  %4013 = vmatpush1.bf16.msra.mxu1 %v4094_v33 }
  0xc4   : > { %v4751_v43 = vsub.f32 %v4634_v44, %v569_v1  ;;  %v4754_v4 = vsub.f32 %v4644_v49, %v570_v2  ;;  %v635_v7 = vsel %vm507_vm1, %v599_v3, 0.0  ;;  %v638_v10 = vsel %vm507_vm1, %v600_v40, 0.0 }
  0xc5   : > { %627 = vadd.xlane.f32.xlu1 %v626_v0  ;;  %636 = vadd.xlane.f32.xlu0 %v635_v7  ;;  %v552_v8 = vpop.xlane.xlu0 %551  ;;  %v555_v9 = vpop.xlane.xlu1 %554 }
  0xc6   : > { %v571_v11 = vmul.f32 0.015625, %v552_v8  ;;  %v572_v12 = vmul.f32 0.015625, %v555_v9  ;;  %v601_v15 = vmul.f32 %v4751_v43, %v4751_v43  ;;  %v602_v44 = vmul.f32 %v4754_v4, %v4754_v4  ;;  %v4798_v9 = vld [vmem:[%s503_s22] ss:$0 sm:$0xff]  ;;  %s4920_s22 = smov 0  }
  0xc8   : > { %v4771_v49 = vsub.f32 %v4646_v50, %v571_v11  ;;  %v4774_v16 = vsub.f32 %v4652_v53, %v572_v12  ;;  %v641_v17 = vsel %vm507_vm1, %v601_v15, 0.0  ;;  %v644_v21 = vsel %vm507_vm1, %v602_v44, 0.0 }
  0xc9   : > { %639 = vadd.xlane.f32.xlu1 %v638_v10  ;;  %642 = vadd.xlane.f32.xlu0 %v641_v17 }
  0xca   : > { %v603_v23 = vmul.f32 %v4771_v49, %v4771_v49  ;;  %v604_v50 = vmul.f32 %v4774_v16, %v4774_v16 }
  0xcc   : > { %v647_v53 = vsel %vm507_vm1, %v603_v23, 0.0  ;;  %v650_v27 = vsel %vm507_vm1, %v604_v50, 0.0 }
  0xcd   : > { %645 = vadd.xlane.f32.xlu1 %v644_v21  ;;  %648 = vadd.xlane.f32.xlu0 %v647_v53  ;;  %v4806_v53 = vld [vmem:[%s505_s16] ss:$0 sm:$0xff] }
  0xd1   : > { %651 = vadd.xlane.f32.xlu1 %v650_v27 }
 0x13a   : > { %v607_v26 = vpop.xlane.xlu0 %606 }
 0x13b   : > { %v653_v38 = vmul.f32 0.015625, %v607_v26 }
 0x13d   : > { %v669_v41 = vadd.f32 1e-05, %v653_v38 }
 0x13e   : > { %v610_v42 = vpop.xlane.xlu1 %609  ;;  %v613_v45 = vpop.xlane.xlu0 %612 }
 0x13f   : > { %4095 = vrsqrt.f32 %v669_v41  ;;  %v654_v46 = vmul.f32 0.015625, %v610_v42  ;;  %v655_v47 = vmul.f32 0.015625, %v613_v45 }
 0x141   : > { %v670_v48 = vadd.f32 1e-05, %v654_v46  ;;  %v671_v32 = vadd.f32 1e-05, %v655_v47 }
 0x142   : > { %v616_v52 = vpop.xlane.xlu1 %615  ;;  %v619_v54 = vpop.xlane.xlu0 %618 }
 0x143   : > { %4097 = vrsqrt.f32 %v670_v48  ;;  %v656_v55 = vmul.f32 0.015625, %v616_v52  ;;  %v657_v56 = vmul.f32 0.015625, %v619_v54 }
 0x144   : > { %4099 = vrsqrt.f32 %v671_v32 }
 0x145   : > { %v672_v57 = vadd.f32 1e-05, %v656_v55  ;;  %v673_v58 = vadd.f32 1e-05, %v657_v56 }
 0x146   : > { %v622_v59 = vpop.xlane.xlu1 %621  ;;  %v631_v36 = vpop.xlane.xlu0 %630 }
 0x147   : > { %4101 = vrsqrt.f32 %v672_v57  ;;  %v658_v61 = vmul.f32 0.015625, %v622_v59  ;;  %v661_v62 = vmul.f32 0.015625, %v631_v36 }
 0x148   : > { %4103 = vrsqrt.f32 %v673_v58 }
 0x149   : > { %v674_v63 = vadd.f32 1e-05, %v658_v61  ;;  %v677_v0 = vadd.f32 1e-05, %v661_v62 }
 0x14a   : > { %v634_v1 = vpop.xlane.xlu1 %633  ;;  %v625_v2 = vpop.xlane.xlu0 %624 }
 0x14b   : > { %4105 = vrsqrt.f32 %v674_v63  ;;  %v662_v3 = vmul.f32 0.015625, %v634_v1  ;;  %v659_v40 = vmul.f32 0.015625, %v625_v2 }
 0x14c   : > { %v4096_v7 = vpop.eup %4095  ;;  %4107 = vrsqrt.f32 %v677_v0 }
 0x14d   : > { %v678_v8 = vadd.f32 1e-05, %v662_v3  ;;  %v701_v10 = vmul.f32 %v4096_v7, %v4681_v5  ;;  %v675_v11 = vadd.f32 1e-05, %v659_v40 }
 0x14e   : > { %v628_v12 = vpop.xlane.xlu1 %627  ;;  %v637_v15 = vpop.xlane.xlu0 %636 }
 0x14f   : > { %4109 = vrsqrt.f32 %v678_v8  ;;  %v660_v44 = vmul.f32 0.015625, %v628_v12  ;;  %v663_v17 = vmul.f32 0.015625, %v637_v15  ;;  %v723_v20 = vmul.f32 %v4798_v9, %v701_v10 }
 0x150   : > { %v4098_v19 = vpop.eup %4097  ;;  %4111 = vrsqrt.f32 %v675_v11 }
 0x151   : > { %v4100_v21 = vpop.eup %4099  ;;  %v676_v23 = vadd.f32 1e-05, %v660_v44  ;;  %v679_v50 = vadd.f32 1e-05, %v663_v17  ;;  %v702_v5 = vmul.f32 %v4098_v19, %v4691_v13  ;;  %v745_v33 = vadd.f32 %v4806_v53, %v723_v20 }
 0x152   : > { %v640_v24 = vpop.xlane.xlu1 %639  ;;  %v643_v25 = vpop.xlane.xlu0 %642  ;;  %v703_v26 = vmul.f32 %v4100_v21, %v4684_v6 }
 0x153   : > { %4113 = vrsqrt.f32 %v676_v23  ;;  %v664_v27 = vmul.f32 0.015625, %v640_v24  ;;  %v665_v28 = vmul.f32 0.015625, %v643_v25  ;;  %v724_v29 = vmul.f32 %v4798_v9, %v702_v5 }
 0x154   : > { %v4102_v30 = vpop.eup %4101  ;;  %4115 = vrsqrt.f32 %v679_v50  ;;  %v725_v54 = vmul.f32 %v4798_v9, %v703_v26 }
 0x155   : > { %v680_v38 = vadd.f32 1e-05, %v664_v27  ;;  %v681_v41 = vadd.f32 1e-05, %v665_v28  ;;  %v746_v42 = vadd.f32 %v4806_v53, %v724_v29  ;;  %v704_v13 = vmul.f32 %v4102_v30, %v4694_v14  ;;  %v4104_v47 = vpop.eup %4103 }
 0x156   : > { %v646_v45 = vpop.xlane.xlu1 %645  ;;  %v649_v46 = vpop.xlane.xlu0 %648  ;;  %v747_v63 = vadd.f32 %v4806_v53, %v725_v54  ;;  %v705_v0 = vmul.f32 %v4104_v47, %v4703_v18 }
 0x157   : > { %4117 = vrsqrt.f32 %v680_v38  ;;  %v666_v48 = vmul.f32 0.015625, %v646_v45  ;;  %v761_v32 = vpack.c.bf16 %v746_v42, %v745_v33  ;;  %v726_v55 = vmul.f32 %v4798_v9, %v704_v13 }
 0x158   : > { %v4106_v52 = vpop.eup %4105  ;;  %4119 = vrsqrt.f32 %v681_v41  ;;  %v667_v57 = vmul.f32 0.015625, %v649_v46 }
 0x159   : > { %v4108_v56 = vpop.eup %4107  ;;  %v682_v6 = vadd.f32 1e-05, %v666_v48  ;;  %3660 = vmatmul.mubr.msk.bf16.vlgmr.msra.gmra.mxu0 %vm507_vm1, %v761_v32  ;;  %v748_v36 = vadd.f32 %v4806_v53, %v726_v55  ;;  %v706_v61 = vmul.f32 %v4106_v52, %v4706_v22 }
 0x15a   : > { %v652_v58 = vpop.xlane.xlu1 %651  ;;  %900 = vmatprep.mubr.bf16.mxu0 %v4431_v34  ;;  %v709_v14 = vmul.f32 %v4108_v56, %v4715_v37  ;;  %v683_v1 = vadd.f32 1e-05, %v667_v57 }
 0x15b   : > { %4121 = vrsqrt.f32 %v682_v6  ;;  %v668_v59 = vmul.f32 0.015625, %v652_v58  ;;  %v762_v37 = vpack.c.bf16 %v748_v36, %v747_v63  ;;  %v728_v10 = vmul.f32 %v4798_v9, %v706_v61 }
 0x15c   : > { %v4110_v62 = vpop.eup %4109  ;;  %v731_v40 = vmul.f32 %v4798_v9, %v709_v14  ;;  %v784_v6 = vlaneseq }
 0x15d   : > { %v684_v2 = vadd.f32 1e-05, %v668_v59  ;;  %v710_v3 = vmul.f32 %v4110_v62, %v4718_v31  ;;  %v4112_v7 = vpop.eup %4111  ;;  %v727_v31 = vmul.f32 %v4798_v9, %v705_v0  ;;  %v750_v17 = vadd.f32 %v4806_v53, %v728_v10 }
 0x15e   : > { %v753_v18 = vadd.f32 %v4806_v53, %v731_v40  ;;  %v707_v21 = vmul.f32 %v4112_v7, %v4727_v51  ;;  %v1156_v57 = vand.u32 127, %v784_v6  ;;  %v4871_v14 = vshrl.u32 %v784_v6, 7 }
 0x15f   : > { %4123 = vrsqrt.f32 %v684_v2  ;;  %v732_v8 = vmul.f32 %v4798_v9, %v710_v3  ;;  %v749_v23 = vadd.f32 %v4806_v53, %v727_v31 }
 0x160   : > { %v4114_v11 = vpop.eup %4113  ;;  %4125 = vrsqrt.f32 %v683_v1  ;;  %v729_v28 = vmul.f32 %v4798_v9, %v707_v21  ;;  %vm1157_vm2 = vcmp.lt.s32.totalorder %v1156_v57, 9  ;;  %6286 = vst [vmem:[#allocation4_spill] sm:$0xff] %v4871_v14  ;;  %v790_v59 = vsub.s32 1, %v4871_v14 }
 0x161   : > { %v4116_v22 = vpop.eup %4115  ;;  %3661 = vmatmul.mubr.msk.bf16.gmra.mxu0 %vm507_vm1, %v762_v37  ;;  %v754_v12 = vadd.f32 %v4806_v53, %v732_v8  ;;  %v708_v19 = vmul.f32 %v4114_v11, %v4730_v35 }
 0x162   : > { %910 = vmatprep.mubr.bf16.mxu0 %v4431_v34  ;;  %v711_v15 = vmul.f32 %v4116_v22, %v4739_v60  ;;  %v763_v60 = vpack.c.bf16 %v750_v17, %v749_v23  ;;  %v751_v42 = vadd.f32 %v4806_v53, %v729_v28 }
 0x163   : > { %v765_v44 = vpack.c.bf16 %v754_v12, %v753_v18  ;;  %v730_v27 = vmul.f32 %v4798_v9, %v708_v19 }
 0x164   : > { %v4118_v20 = vpop.eup %4117  ;;  %v733_v5 = vmul.f32 %v4798_v9, %v711_v15 }
 0x165   : > { %3664 = vmatmul.mubr.msk.bf16.vlgmr.msra.gmra.mxu1 %vm507_vm1, %v765_v44  ;;  %v712_v50 = vmul.f32 %v4118_v20, %v4742_v39  ;;  %v4120_v24 = vpop.eup %4119  ;;  %v752_v26 = vadd.f32 %v4806_v53, %v730_v27 }
 0x166   : > { %940 = vmatprep.mubr.bf16.mxu1 %v4431_v34  ;;  %v755_v51 = vadd.f32 %v4806_v53, %v733_v5  ;;  %v713_v39 = vmul.f32 %v4120_v24, %v4751_v43 }
 0x167   : > { %v734_v25 = vmul.f32 %v4798_v9, %v712_v50  ;;  %v764_v43 = vpack.c.bf16 %v752_v26, %v751_v42 }
 0x168   : > { %v4122_v35 = vpop.eup %4121  ;;  %v735_v13 = vmul.f32 %v4798_v9, %v713_v39 }
 0x169   : > { %3662 = vmatmul.mubr.msk.bf16.gmra.mxu0 %vm507_vm1, %v763_v60  ;;  %v756_v29 = vadd.f32 %v4806_v53, %v734_v25  ;;  %v714_v30 = vmul.f32 %v4122_v35, %v4754_v4 }
 0x16a   : > { %920 = vmatprep.mubr.bf16.mxu0 %v4431_v34  ;;  %v757_v47 = vadd.f32 %v4806_v53, %v735_v13 }
 0x16b   : > { %v766_v33 = vpack.c.bf16 %v756_v29, %v755_v51  ;;  %v736_v38 = vmul.f32 %v4798_v9, %v714_v30 }
 0x16c   : > { %v4124_v41 = vpop.eup %4123 }
 0x16d   : > { %3665 = vmatmul.mubr.msk.bf16.gmra.mxu1 %vm507_vm1, %v766_v33  ;;  %v4126_v45 = vpop.eup %4125  ;;  %v758_v4 = vadd.f32 %v4806_v53, %v736_v38  ;;  %v716_v46 = vmul.f32 %v4124_v41, %v4774_v16 }
 0x16e   : > { %950 = vmatprep.mubr.bf16.mxu1 %v4431_v34  ;;  %v715_v48 = vmul.f32 %v4126_v45, %v4771_v49  ;;  %v4432_v49 = vmov -1e+30  }
 0x16f   : > { %v767_v32 = vpack.c.bf16 %v758_v4, %v757_v47  ;;  %v738_v52 = vmul.f32 %v4798_v9, %v716_v46  ;;  %v4868_v58 = vsel %vm1157_vm2, 0.0, %v4432_v49 }
 0x170   : > { %v737_v54 = vmul.f32 %v4798_v9, %v715_v48  ;;  %v786_v9 = vsub.s32 0, %v4871_v14 }
 0x171   : > { %3663 = vmatmul.mubr.msk.bf16.gmra.mxu0 %vm507_vm1, %v764_v43  ;;  %v760_v55 = vadd.f32 %v4806_v53, %v738_v52 }
 0x172   : > { %v759_v16 = vadd.f32 %v4806_v53, %v737_v54  ;;  %v782_v53 = vld [vmem:[%s781_s21] sm:$0x3] }
 0x173   : > { %v4882_v36 = vrot.slane %v782_v53, %v786_v9  ;;  %v4886_v61 = vrot.slane %v782_v53, %v790_v59 }
 0x174   : > { %v768_v56 = vpack.c.bf16 %v760_v55, %v759_v16 }
 0x175   : > { %3666 = vmatmul.mubr.msk.bf16.gmra.mxu1 %vm507_vm1, %v767_v32 }
 0x176   : > { %960 = vmatprep.mubr.bf16.mxu1 %v4431_v34 }
 0x17d   : > { %3667 = vmatmul.mubr.msk.bf16.gmra.mxu1 %vm507_vm1, %v768_v56 }
 0x219   : > { %v892_v62 = vpop.f32.mrf.mxu0 }
 0x21a   : > { %v893_v63 = vadd.f32 %v892_v62, %v4882_v36 }
 0x21b   : > { %v894_v0 = vpop.f32.mrf.mxu0 }
 0x21c   : > { %v895_v1 = vadd.f32 %v894_v0, %v4886_v61  ;;  %971 = vxpose.xlu0.b32.start [1/16] %v893_v63, 128 }
 0x21d   : > { %v896_v2 = vpop.f32.mrf.mxu0 }
 0x21e   : > { %v897_v3 = vadd.f32 %v896_v2, %v4882_v36  ;;  %1003 = vxpose.xlu1.b32.start [1/16] (narrow) %v895_v1, 64 }
 0x21f   : > { %v898_v40 = vpop.f32.mrf.mxu0 }
 0x220   : > { %v899_v7 = vadd.f32 %v898_v40, %v4886_v61  ;;  %972 = vxpose.xlu0.b32.cont [2/16] %v897_v3, 128 }
 0x221   : > { %v902_v37 = vpop.f32.mrf.mxu0 }
 0x222   : > { %v903_v8 = vadd.f32 %v902_v37, %v4882_v36  ;;  %1004 = vxpose.xlu1.b32.cont [2/16] (narrow) %v899_v7, 64 }
 0x223   : > { %v904_v10 = vpop.f32.mrf.mxu0 }
 0x224   : > { %v905_v11 = vadd.f32 %v904_v10, %v4886_v61  ;;  %973 = vxpose.xlu0.b32.cont [3/16] %v903_v8, 128 }
 0x225   : > { %v906_v22 = vpop.f32.mrf.mxu0  ;;  %v932_v18 = vpop.f32.mrf.mxu1 }
 0x226   : > { %v907_v12 = vadd.f32 %v906_v22, %v4882_v36  ;;  %1005 = vxpose.xlu1.b32.cont [3/16] (narrow) %v905_v11, 64  ;;  %v933_v45 = vadd.f32 %v932_v18, %v4882_v36 }
 0x227   : > { %v908_v31 = vpop.f32.mrf.mxu0  ;;  %v934_v15 = vpop.f32.mrf.mxu1 }
 0x228   : > { %v909_v44 = vadd.f32 %v908_v31, %v4886_v61  ;;  %974 = vxpose.xlu0.b32.cont [4/16] %v907_v12, 128  ;;  %v935_v43 = vadd.f32 %v934_v15, %v4886_v61 }
 0x229   : > { %v912_v17 = vpop.f32.mrf.mxu0  ;;  %v936_v19 = vpop.f32.mrf.mxu1 }
 0x22a   : > { %v913_v20 = vadd.f32 %v912_v17, %v4882_v36  ;;  %1006 = vxpose.xlu1.b32.cont [4/16] (narrow) %v909_v44, 64  ;;  %v937_v46 = vadd.f32 %v936_v19, %v4882_v36 }
 0x22b   : > { %v914_v21 = vpop.f32.mrf.mxu0  ;;  %v938_v23 = vpop.f32.mrf.mxu1 }
 0x22c   : > { %v915_v50 = vadd.f32 %v914_v21, %v4886_v61  ;;  %975 = vxpose.xlu0.b32.cont [5/16] %v913_v20, 128  ;;  %v939_v47 = vadd.f32 %v938_v23, %v4886_v61 }
 0x22d   : > { %v916_v5 = vpop.f32.mrf.mxu0  ;;  %v942_v24 = vpop.f32.mrf.mxu1 }
 0x22e   : > { %v917_v60 = vadd.f32 %v916_v5, %v4882_v36  ;;  %1007 = vxpose.xlu1.b32.cont [5/16] (narrow) %v915_v50, 64  ;;  %v943_v32 = vadd.f32 %v942_v24, %v4882_v36 }
 0x22f   : > { %v918_v25 = vpop.f32.mrf.mxu0  ;;  %v944_v27 = vpop.f32.mrf.mxu1 }
 0x230   : > { %v919_v35 = vadd.f32 %v918_v25, %v4886_v61  ;;  %976 = vxpose.xlu0.b32.cont [6/16] %v917_v60, 128  ;;  %v945_v52 = vadd.f32 %v944_v27, %v4886_v61 }
 0x231   : > { %v922_v28 = vpop.f32.mrf.mxu0  ;;  %v946_v51 = vpop.f32.mrf.mxu1 }
 0x232   : > { %v923_v29 = vadd.f32 %v922_v28, %v4882_v36  ;;  %1008 = vxpose.xlu1.b32.cont [6/16] (narrow) %v919_v35, 64  ;;  %v947_v55 = vadd.f32 %v946_v51, %v4882_v36 }
 0x233   : > { %v924_v39 = vpop.f32.mrf.mxu0  ;;  %v948_v33 = vpop.f32.mrf.mxu1 }
 0x234   : > { %v925_v30 = vadd.f32 %v924_v39, %v4886_v61  ;;  %977 = vxpose.xlu0.b32.cont [7/16] %v923_v29, 128  ;;  %v949_v16 = vadd.f32 %v948_v33, %v4886_v61 }
 0x235   : > { %v926_v26 = vpop.f32.mrf.mxu0  ;;  %v952_v13 = vpop.f32.mrf.mxu1 }
 0x236   : > { %v927_v38 = vadd.f32 %v926_v26, %v4882_v36  ;;  %1009 = vxpose.xlu1.b32.cont [7/16] (narrow) %v925_v30, 64  ;;  %v953_v6 = vadd.f32 %v952_v13, %v4882_v36 }
 0x237   : > { %v928_v41 = vpop.f32.mrf.mxu0  ;;  %v954_v4 = vpop.f32.mrf.mxu1 }
 0x238   : > { %v929_v42 = vadd.f32 %v928_v41, %v4886_v61  ;;  %978 = vxpose.xlu0.b32.cont [8/16] %v927_v38, 128  ;;  %v955_v57 = vadd.f32 %v954_v4, %v4886_v61 }
 0x239   : > { %v956_v48 = vpop.f32.mrf.mxu1 }
 0x23a   : > { %1010 = vxpose.xlu1.b32.cont [8/16] (narrow) %v929_v42, 64  ;;  %v957_v53 = vadd.f32 %v956_v48, %v4882_v36 }
 0x23b   : > { %v958_v54 = vpop.f32.mrf.mxu1 }
 0x23c   : > { %979 = vxpose.xlu0.b32.cont [9/16] %v933_v45, 128  ;;  %v959_v62 = vadd.f32 %v958_v54, %v4886_v61 }
 0x23d   : > { %v962_v56 = vpop.f32.mrf.mxu1 }
 0x23e   : > { %1011 = vxpose.xlu1.b32.cont [9/16] (narrow) %v935_v43, 64  ;;  %v963_v0 = vadd.f32 %v962_v56, %v4882_v36 }
 0x23f   : > { %v964_v49 = vpop.f32.mrf.mxu1 }
 0x240   : > { %980 = vxpose.xlu0.b32.cont [10/16] %v937_v46, 128  ;;  %v965_v1 = vadd.f32 %v964_v49, %v4886_v61 }
 0x241   : > { %v966_v63 = vpop.f32.mrf.mxu1 }
 0x242   : > { %1012 = vxpose.xlu1.b32.cont [10/16] (narrow) %v939_v47, 64  ;;  %v967_v3 = vadd.f32 %v966_v63, %v4882_v36 }
 0x243   : > { %v968_v2 = vpop.f32.mrf.mxu1 }
 0x244   : > { %981 = vxpose.xlu0.b32.cont [11/16] %v943_v32, 128  ;;  %v969_v40 = vadd.f32 %v968_v2, %v4886_v61 }
 0x246   : > { %1013 = vxpose.xlu1.b32.cont [11/16] (narrow) %v945_v52, 64 }
 0x248   : > { %982 = vxpose.xlu0.b32.cont [12/16] %v947_v55, 128 }
 0x24a   : > { %1014 = vxpose.xlu1.b32.cont [12/16] (narrow) %v949_v16, 64 }
 0x24c   : > { %983 = vxpose.xlu0.b32.cont [13/16] %v953_v6, 128 }
 0x24e   : > { %1015 = vxpose.xlu1.b32.cont [13/16] (narrow) %v955_v57, 64 }
 0x250   : > { %984 = vxpose.xlu0.b32.cont [14/16] %v957_v53, 128 }
 0x252   : > { %1016 = vxpose.xlu1.b32.cont [14/16] (narrow) %v959_v62, 64 }
 0x254   : > { %985 = vxpose.xlu0.b32.cont [15/16] %v963_v0, 128 }
 0x256   : > { %1017 = vxpose.xlu1.b32.cont [15/16] (narrow) %v965_v1, 64 }
 0x258   : > { %986 = vxpose.xlu0.b32.end [16/16] %v967_v3, 128 }
 0x25a   : > { %1018 = vxpose.xlu1.b32.end [16/16] (narrow) %v969_v40, 64 }
 0x298   : > { %v987_v7 = vpop.trf.xlu0 }
 0x29a   : > { %v1019_v37 = vpop.trf.xlu1 }
 0x29c   : > { %v988_v8 = vpop.trf.xlu0 }
 0x29d   : > { %v3793_v10 = vpack.c.bf16 %v988_v8, %v987_v7 }
 0x29e   : > { %v1020_v11 = vpop.trf.xlu1 }
 0x29f   : > { %3794 = vst [vmem:[#allocation3] sm:$0xff] %v3793_v10   ;;  %v3833_v22 = vpack.c.bf16 %v1020_v11, %v1019_v37 }
 0x2a0   : > { %v989_v18 = vpop.trf.xlu0 }
 0x2a1   : > { %3857 = vst [vmem:[#allocation3 + $0x40] sm:$0xff] %v3833_v22  }
 0x2a2   : > { %v1021_v12 = vpop.trf.xlu1 }
 0x2a4   : > { %v990_v31 = vpop.trf.xlu0 }
 0x2a5   : > { %v3798_v15 = vpack.c.bf16 %v990_v31, %v989_v18 }
 0x2a6   : > { %v1022_v44 = vpop.trf.xlu1 }
 0x2a7   : > { %3850 = vst [vmem:[#allocation3 + $0x8] sm:$0xff] %v3798_v15   ;;  %v3838_v36 = vpack.c.bf16 %v1022_v44, %v1021_v12 }
 0x2a8   : > { %v991_v17 = vpop.trf.xlu0 }
 0x2a9   : > { %3858 = vst [vmem:[#allocation3 + $0x48] sm:$0xff] %v3838_v36  }
 0x2aa   : > { %v1023_v61 = vpop.trf.xlu1 }
 0x2ac   : > { %v992_v19 = vpop.trf.xlu0 }
 0x2ad   : > { %v3803_v20 = vpack.c.bf16 %v992_v19, %v991_v17 }
 0x2ae   : > { %v1024_v21 = vpop.trf.xlu1 }
 0x2af   : > { %3851 = vst [vmem:[#allocation3 + $0x10] sm:$0xff] %v3803_v20   ;;  %v3843_v23 = vpack.c.bf16 %v1024_v21, %v1023_v61 }
 0x2b0   : > { %v993_v50 = vpop.trf.xlu0 }
 0x2b1   : > { %3859 = vst [vmem:[#allocation3 + $0x50] sm:$0xff] %v3843_v23  }
 0x2b2   : > { %v1025_v5 = vpop.trf.xlu1 }
 0x2b4   : > { %v994_v24 = vpop.trf.xlu0 }
 0x2b5   : > { %v3808_v60 = vpack.c.bf16 %v994_v24, %v993_v50 }
 0x2b6   : > { %v1026_v25 = vpop.trf.xlu1 }
 0x2b7   : > { %3852 = vst [vmem:[#allocation3 + $0x18] sm:$0xff] %v3808_v60   ;;  %v3848_v27 = vpack.c.bf16 %v1026_v25, %v1025_v5 }
 0x2b8   : > { %v995_v35 = vpop.trf.xlu0 }
 0x2b9   : > { %3860 = vst [vmem:[#allocation3 + $0x58] sm:$0xff] %v3848_v27  }
 0x2bc   : > { %v996_v28 = vpop.trf.xlu0 }
 0x2bd   : > { %v3813_v51 = vpack.c.bf16 %v996_v28, %v995_v35 }
 0x2bf   : > { %3853 = vst [vmem:[#allocation3 + $0x20] sm:$0xff] %v3813_v51  }
 0x2c0   : > { %v997_v29 = vpop.trf.xlu0 }
 0x2c4   : > { %v998_v39 = vpop.trf.xlu0 }
 0x2c5   : > { %v3818_v30 = vpack.c.bf16 %v998_v39, %v997_v29 }
 0x2c7   : > { %3854 = vst [vmem:[#allocation3 + $0x28] sm:$0xff] %v3818_v30  }
 0x2c8   : > { %v999_v33 = vpop.trf.xlu0 }
 0x2cc   : > { %v1000_v26 = vpop.trf.xlu0 }
 0x2cd   : > { %v3823_v38 = vpack.c.bf16 %v1000_v26, %v999_v33 }
 0x2cf   : > { %3855 = vst [vmem:[#allocation3 + $0x30] sm:$0xff] %v3823_v38  }
 0x2d0   : > { %v1001_v41 = vpop.trf.xlu0 }
 0x2d4   : > { %v1002_v42 = vpop.trf.xlu0 }
 0x2d5   : > { %v3828_v13 = vpack.c.bf16 %v1002_v42, %v1001_v41 }
 0x2d7   : > { %3856 = vst [vmem:[#allocation3 + $0x38] sm:$0xff] %v3828_v13  }
 0x2d8 LB: >> { %s4926_s23 = sshll.u32 %s4429_s22, 4  ;;  %vm1254_vm3 = vcmask 130048   ;;  %s4429_s22 = sphi %s4920_s22, %s1204_s22  }
 0x2d9   : >> { %s1208_s24 = sshra.s32 %s4926_s23, 3  ;;  %s1206_s16 = sadd.s32 64, %s4926_s23 }
 0x2da   : >> { %s3694_s19 = sshll.u32 %s1208_s24, 2  ;;  %s1214_s20 = sshra.s32 %s1206_s16, 3 }
 0x2db   : >> { %s3695_s21 = sshll.u32 %s1214_s20, 2  ;;  %s1211_s18 = scalar_lea.vmem [#allocation3], %s3694_s19 }
 0x2dc   : >> { %s1217_s17 = scalar_lea.vmem [#allocation3], %s3695_s21 }
 0x2de   : >> { %v4127_v45 = vld [vmem:[%s1211_s18] sm:$0xff]   ;;  %s1207_s18 = sadd.s32 128, %s4926_s23  ;;  %s3708_s23 = sshll.u32 %s4409_s25, 2 }
 0x2df   : >> { %v4128_v43 = vld [vmem:[%s1217_s17] sm:$0xff]   ;;  %1232 = vxpose.xlu0.c.b16.start.end [1/1] (short) %v4127_v45, 128  ;;  %s1220_s17 = sshra.s32 %s1207_s18, 3  ;;  %s1664_s19 = sadd.s32 %s4429_s22, %s3708_s23 }
 0x2e0   : >> { %3952 = vmatprep.subr.bf16.mxu0 %v4128_v43  ;;  %4014 = vmatprep.subr.bf16.mxu1 %v4128_v43  ;;  %s3696_s24 = sshll.u32 %s1220_s17, 2  ;;  %s3787_s20 = sshll.u32 %s1664_s19, 3 }
 0x2e1   : >> { %3953 = vmatpush3.bf16.msra.mxu0 %v4128_v43  ;;  %4015 = vmatpush3.bf16.msra.mxu1 %v4128_v43  ;;  %s1223_s16 = scalar_lea.vmem [#allocation3], %s3696_s24  ;;  %s1667_s17 = scalar_lea.vmem %s6227_s5, %s3787_s20 }
 0x2e2   : >> { %v4129_v20 = vld [vmem:[%s1223_s16] sm:$0xff]   ;;  %s1204_s22 = sadd.s32 1, %s4429_s22  }
 0x2e3   : >> { %3970 = vmatprep.subr.bf16.mxu1 %v4129_v20  ;;  %p1201_p7 = scmp.ge.s32.totalorder %s1204_s22, 4  }
 0x2e4   : > { %s2110_s16 = scalar_lea.vmem (%p1201_p7), %s6231_s9, %s3762_s15  ;;  %s1845_s19 = scalar_lea.vmem (%p1201_p7), %s6229_s7, %s4409_s25 }
 0x2e5   : > { %s1847_s18 = scalar_lea.vmem (%p1201_p7), %s6230_s8, %s4409_s25  ;;  %s6287_s15 = sshll.u32 (%p1201_p7), %s4409_s25, 1 }
 0x2e6   : > { %s2119_s20 = scalar_lea.vmem (%p1201_p7), %s6232_s10, %s6287_s15  ;;  %p3758_p8 = scmp.ne.s32.totalorder (%p1201_p7), %s4409_s25, 1 }
 0x341   : >> { %v1240_v4 = vpop.trf.xlu0 }
 0x342   : >> { %3954 = vmatprep.mubr.msk.bf16.mxu0 %vm1254_vm3, %v1240_v4 }
 0x345   : >> { %v1241_v46 = vpop.trf.xlu0 }
 0x346   : >> { %3955 = vmatmul.mubr.msk.bf16.vlgmr.msra.gmra.mxu0 %vm1254_vm3, %v1241_v46 }
 0x349   : >> { %v1242_v47 = vpop.trf.xlu0 }
 0x34a   : >> { %3958 = vmatprep.mubr.msk.bf16.mxu0 %vm1254_vm3, %v1242_v47 }
 0x34d   : >> { %v1243_v48 = vpop.trf.xlu0 }
 0x34e   : >> { %3959 = vmatmul.mubr.msk.bf16.gmra.mxu0 %vm1254_vm3, %v1243_v48 }
 0x351   : >> { %v1244_v32 = vpop.trf.xlu0 }
 0x352   : >> { %3962 = vmatprep.mubr.msk.bf16.mxu1 %vm1254_vm3, %v1244_v32 }
 0x355   : >> { %v1245_v52 = vpop.trf.xlu0 }
 0x356   : >> { %3963 = vmatmul.mubr.msk.bf16.vlgmr.msra.gmra.mxu1 %vm1254_vm3, %v1245_v52 }
 0x357   : >> { %3971 = vmatpush3.bf16.xpose.msra.mxu1 %v4129_v20 }
 0x359   : >> { %v1246_v54 = vpop.trf.xlu0 }
 0x35a   : >> { %3966 = vmatprep.mubr.msk.bf16.mxu1 %vm1254_vm3, %v1246_v54 }
 0x35d   : >> { %v1247_v55 = vpop.trf.xlu0 }
 0x35e   : >> { %3967 = vmatmul.mubr.msk.bf16.gmra.mxu1 %vm1254_vm3, %v1247_v55 }
 0x406   : >> { %v3956_v16 = vpop.f32.mrf.mxu0 }
 0x407   : >> { %v1322_v56 = vadd.f32 %v3956_v16, %v4868_v58 }
 0x408   : >> { %v1313_v6 = vpop.f32.mrf.mxu0 }
 0x409   : >> { %v1314_v57 = vadd.f32 %v1313_v6, %v4868_v58  ;;  %1380 = vmax.xlane.f32.xlu1 %v1322_v56 }
 0x40a   : >> { %v3957_v49 = vpop.f32.mrf.mxu0 }
 0x40b   : >> { %v1325_v53 = vadd.f32 %v3957_v49, %v4868_v58  ;;  %1376 = vmax.xlane.f32.xlu0 %v1314_v57 }
 0x40c   : >> { %v1316_v62 = vpop.f32.mrf.mxu0 }
 0x40d   : >> { %1382 = vmax.xlane.f32.xlu1 %v1325_v53  ;;  %v1317_v63 = vadd.f32 %v1316_v62, %v4868_v58 }
 0x40e   : >> { %v3960_v0 = vpop.f32.mrf.mxu0 }
 0x40f   : >> { %v4943_v1 = vadd.f32 %v3960_v0, %v4868_v58 }
 0x410   : >> { %v1329_v2 = vpop.f32.mrf.mxu0 }
 0x411   : >> { %1378 = vmax.xlane.f32.xlu1 %v1317_v63  ;;  %v1330_v40 = vadd.f32 %v1329_v2, %v4868_v58 }
 0x412   : >> { %v3961_v7 = vpop.f32.mrf.mxu0 }
 0x413   : >> { %v1341_v10 = vadd.f32 %v3961_v7, %v4868_v58 }
 0x414   : >> { %v1332_v11 = vpop.f32.mrf.mxu0 }
 0x415   : >> { %1388 = vmax.xlane.f32.xlu1 %v4943_v1  ;;  %v1333_v12 = vadd.f32 %v1332_v11, %v4868_v58 }
 0x416   : >> { %v3964_v3 = vpop.f32.mrf.mxu1 }
 0x417   : >> { %v4950_v15 = vadd.f32 %v3964_v3, %v4868_v58 }
 0x418   : >> { %v1345_v37 = vpop.f32.mrf.mxu1 }
 0x419   : >> { %1384 = vmax.xlane.f32.xlu1 %v1330_v40  ;;  %v4958_v61 = vadd.f32 %v1345_v37, %v4868_v58 }
 0x41a   : >> { %v3965_v8 = vpop.f32.mrf.mxu1 }
 0x41b   : >> { %v1357_v23 = vadd.f32 %v3965_v8, %v4868_v58 }
 0x41c   : >> { %v1348_v22 = vpop.f32.mrf.mxu1 }
 0x41d   : >> { %1390 = vmax.xlane.f32.xlu1 %v1341_v10  ;;  %v1349_v21 = vadd.f32 %v1348_v22, %v4868_v58 }
 0x41e   : >> { %v3968_v18 = vpop.f32.mrf.mxu1 }
 0x41f   : >> { %v4973_v5 = vadd.f32 %v3968_v18, %v4868_v58 }
 0x420   : >> { %v1361_v31 = vpop.f32.mrf.mxu1 }
 0x421   : >> { %1386 = vmax.xlane.f32.xlu1 %v1333_v12  ;;  %v4969_v50 = vadd.f32 %v1361_v31, %v4868_v58 }
 0x422   : >> { %v3969_v44 = vpop.f32.mrf.mxu1 }
 0x423   : >> { %v4961_v19 = vadd.f32 %v3969_v44, %v4868_v58 }
 0x424   : >> { %v1364_v36 = vpop.f32.mrf.mxu1 }
 0x425   : >> { %v4954_v17 = vadd.f32 %v1364_v36, %v4868_v58  ;;  %1396 = vmax.xlane.f32.xlu1 %v4950_v15 }
 0x427   : >> { %1402 = vmax.xlane.f32.xlu0 %v4954_v17 }
 0x429   : >> { %1392 = vmax.xlane.f32.xlu1 %v4958_v61 }
 0x42b   : >> { %1406 = vmax.xlane.f32.xlu0 %v4961_v19 }
 0x42d   : >> { %1394 = vmax.xlane.f32.xlu1 %v1349_v21 }
 0x431   : >> { %1398 = vmax.xlane.f32.xlu1 %v1357_v23 }
 0x435   : >> { %1400 = vmax.xlane.f32.xlu1 %v4969_v50 }
 0x439   : >> { %1404 = vmax.xlane.f32.xlu1 %v4973_v5 }
 0x492   : >> { %v1381_v24 = vpop.xlane.xlu1 %1380 }
 0x493   : >> { %v1410_v27 = vsub.f32 %v1322_v56, %v1381_v24 }
 0x494   : >> { %v1377_v35 = vpop.xlane.xlu0 %1376 }
 0x495   : >> { %v1408_v29 = vsub.f32 %v1314_v57, %v1377_v35 }
 0x496   : >> { %v1383_v60 = vpop.xlane.xlu1 %1382 }
 0x497   : >> { %v1411_v25 = vsub.f32 %v1325_v53, %v1383_v60 }
 0x499   : >> { %v1425_v28 = vpack.c.bf16 %v1411_v25, %v1410_v27 }
 0x49a   : >> { %v1379_v51 = vpop.xlane.xlu1 %1378 }
 0x49b   : >> { %v1409_v39 = vsub.f32 %v1317_v63, %v1379_v51  ;;  %v1436_v33 = vmul.bf16 1069105081, %v1425_v28 }
 0x49d   : >> { %v1424_v30 = vpack.c.bf16 %v1409_v39, %v1408_v29 }
 0x49e   : >> { %v1389_v26 = vpop.xlane.xlu1 %1388 }
 0x49f   : >> { %v1433_v38 = vmul.bf16 1069105081, %v1424_v30  ;;  %v1414_v45 = vsub.f32 %v4943_v1, %v1389_v26 }
 0x4a1   : >> { %4131 = vpow.bf16 %v1433_v38 }
 0x4a2   : >> { %4133 = vpow.bf16 %v1436_v33  ;;  %v1385_v41 = vpop.xlane.xlu1 %1384 }
 0x4a3   : >> { %v1412_v46 = vsub.f32 %v1330_v40, %v1385_v41  ;;  %v4130_v41 = vld [vmem:[%s1667_s17] sm:$0xff]   ;;  %s3789_s17 = sshll.u32 (%p1201_p7), %s4409_s25, 7 }
 0x4a4   : >> { %3988 = vmatprep.subr.bf16.mxu0 %v4130_v41 }
 0x4a5   : >> { %3989 = vmatpush3.bf16.msra.mxu0 %v4130_v41 }
 0x4a6   : >> { %v1391_v42 = vpop.xlane.xlu1 %1390 }
 0x4a7   : >> { %v1415_v13 = vsub.f32 %v1341_v10, %v1391_v42 }
 0x4a9   : >> { %v1427_v43 = vpack.c.bf16 %v1415_v13, %v1414_v45 }
 0x4aa   : >> { %v1387_v4 = vpop.xlane.xlu1 %1386 }
 0x4ab   : >> { %v1413_v47 = vsub.f32 %v1333_v12, %v1387_v4  ;;  %v1442_v32 = vmul.bf16 1069105081, %v1427_v43 }
 0x4ad   : >> { %v1426_v48 = vpack.c.bf16 %v1413_v47, %v1412_v46 }
 0x4ae   : >> { %v1397_v52 = vpop.xlane.xlu1 %1396 }
 0x4af   : >> { %v4132_v54 = vpop.eup %4131  ;;  %v1439_v55 = vmul.bf16 1069105081, %v1426_v48  ;;  %v1418_v40 = vsub.f32 %v4950_v15, %v1397_v52 }
 0x4b0   : >> { %v4134_v16 = vpop.eup %4133  ;;  %3972 = vmatprep.mubr.bf16.mxu1 %v4132_v54  ;;  %v1457_v56 = vunpack.c.h.bf16 %v4132_v54  ;;  %v1456_v6 = vunpack.c.l.bf16 %v4132_v54  ;;  %v1403_v2 = vpop.xlane.xlu0 %1402 }
 0x4b1   : >> { %4135 = vpow.bf16 %v1439_v55  ;;  %3973 = vmatmul.mubr.bf16.vlgmr.msra.gmra.mxu1 %v4134_v16  ;;  %v1459_v49 = vunpack.c.h.bf16 %v4134_v16  ;;  %v1458_v53 = vunpack.c.l.bf16 %v4134_v16  ;;  %v1421_v22 = vsub.f32 %v4954_v17, %v1403_v2 }
 0x4b2   : >> { %4137 = vpow.bf16 %v1442_v32  ;;  %v1393_v57 = vpop.xlane.xlu1 %1392  ;;  %1474 = vadd.xlane.f32.xlu0 %v1457_v56  ;;  %1472 = vadd.xlane.f32.xlu1 %v1456_v6 }
 0x4b3   : >> { %v1416_v63 = vsub.f32 %v4958_v61, %v1393_v57 }
 0x4b4   : >> { %v1407_v44 = vpop.xlane.xlu0 %1406 }
 0x4b6   : >> { %v1395_v62 = vpop.xlane.xlu1 %1394  ;;  %1478 = vadd.xlane.f32.xlu0 %v1459_v49  ;;  %1476 = vadd.xlane.f32.xlu1 %v1458_v53 }
 0x4b7   : >> { %v1417_v0 = vsub.f32 %v1349_v21, %v1395_v62  ;;  %v1423_v21 = vsub.f32 %v4961_v19, %v1407_v44 }
 0x4b9   : >> { %v1428_v1 = vpack.c.bf16 %v1417_v0, %v1416_v63 }
 0x4ba   : >> { %v1399_v3 = vpop.xlane.xlu1 %1398 }
 0x4bb   : >> { %v1445_v7 = vmul.bf16 1069105081, %v1428_v1  ;;  %v1419_v37 = vsub.f32 %v1357_v23, %v1399_v3 }
 0x4bd   : >> { %4139 = vpow.bf16 %v1445_v7  ;;  %v1429_v8 = vpack.c.bf16 %v1419_v37, %v1418_v40 }
 0x4be   : >> { %v1401_v10 = vpop.xlane.xlu1 %1400 }
 0x4bf   : >> { %v4136_v11 = vpop.eup %4135  ;;  %v1448_v18 = vmul.bf16 1069105081, %v1429_v8  ;;  %v1420_v12 = vsub.f32 %v4969_v50, %v1401_v10 }
 0x4c0   : >> { %v4138_v31 = vpop.eup %4137  ;;  %3976 = vmatprep.mubr.bf16.mxu1 %v4136_v11  ;;  %v1461_v36 = vunpack.c.h.bf16 %v4136_v11  ;;  %v1460_v61 = vunpack.c.l.bf16 %v4136_v11 }
 0x4c1   : >> { %4141 = vpow.bf16 %v1448_v18  ;;  %v1430_v20 = vpack.c.bf16 %v1421_v22, %v1420_v12  ;;  %3977 = vmatmul.mubr.bf16.gmra.mxu1 %v4138_v31  ;;  %v1463_v17 = vunpack.c.h.bf16 %v4138_v31  ;;  %v1462_v60 = vunpack.c.l.bf16 %v4138_v31 }
 0x4c2   : >> { %v1405_v15 = vpop.xlane.xlu1 %1404  ;;  %1482 = vadd.xlane.f32.xlu0 %v1461_v36  ;;  %1480 = vadd.xlane.f32.xlu1 %v1460_v61 }
 0x4c3   : >> { %v1451_v23 = vmul.bf16 1069105081, %v1430_v20  ;;  %v1422_v24 = vsub.f32 %v4973_v5, %v1405_v15 }
 0x4c5   : >> { %4143 = vpow.bf16 %v1451_v23  ;;  %v1431_v50 = vpack.c.bf16 %v1423_v21, %v1422_v24 }
 0x4c6   : >> { %1486 = vadd.xlane.f32.xlu0 %v1463_v17  ;;  %1484 = vadd.xlane.f32.xlu1 %v1462_v60 }
 0x4c7   : >> { %v1454_v25 = vmul.bf16 1069105081, %v1431_v50 }
 0x4c9   : >> { %4145 = vpow.bf16 %v1454_v25 }
 0x4cb   : >> { %v4140_v27 = vpop.eup %4139 }
 0x4cc   : >> { %3980 = vmatprep.mubr.bf16.mxu1 %v4140_v27  ;;  %v1465_v35 = vunpack.c.h.bf16 %v4140_v27  ;;  %v1464_v28 = vunpack.c.l.bf16 %v4140_v27 }
 0x4ce   : >> { %1490 = vadd.xlane.f32.xlu0 %v1465_v35  ;;  %1488 = vadd.xlane.f32.xlu1 %v1464_v28 }
 0x4cf   : >> { %v4142_v51 = vpop.eup %4141 }
 0x4d0   : >> { %3981 = vmatmul.mubr.bf16.gmra.mxu1 %v4142_v51  ;;  %v1467_v19 = vunpack.c.h.bf16 %v4142_v51  ;;  %v1466_v29 = vunpack.c.l.bf16 %v4142_v51 }
 0x4d2   : >> { %1494 = vadd.xlane.f32.xlu0 %v1467_v19  ;;  %1492 = vadd.xlane.f32.xlu1 %v1466_v29 }
 0x4d3   : >> { %v4144_v5 = vpop.eup %4143 }
 0x4d4   : >> { %3984 = vmatprep.mubr.bf16.mxu1 %v4144_v5  ;;  %v1469_v39 = vunpack.c.h.bf16 %v4144_v5  ;;  %v1468_v30 = vunpack.c.l.bf16 %v4144_v5 }
 0x4d6   : >> { %1498 = vadd.xlane.f32.xlu0 %v1469_v39  ;;  %1496 = vadd.xlane.f32.xlu1 %v1468_v30 }
 0x4d7   : >> { %v4146_v33 = vpop.eup %4145 }
 0x4d8   : >> { %3985 = vmatmul.mubr.bf16.gmra.mxu1 %v4146_v33  ;;  %v1471_v26 = vunpack.c.h.bf16 %v4146_v33  ;;  %v1470_v38 = vunpack.c.l.bf16 %v4146_v33 }
 0x4da   : >> { %1502 = vadd.xlane.f32.xlu0 %v1471_v26  ;;  %1500 = vadd.xlane.f32.xlu1 %v1470_v38 }
 0x53b   : >> { %v1475_v42 = vpop.xlane.xlu0 %1474  ;;  %v1473_v13 = vpop.xlane.xlu1 %1472 }
 0x53c   : >> { %4147 = vrcp.f32 %v1473_v13 }
 0x53f   : >> { %v1479_v45 = vpop.xlane.xlu0 %1478  ;;  %v1477_v43 = vpop.xlane.xlu1 %1476 }
 0x540   : >> { %4149 = vrcp.f32 %v1479_v45 }
 0x541   : >> { %4151 = vrcp.f32 %v1475_v42 }
 0x542   : >> { %4153 = vrcp.f32 %v1477_v43 }
 0x549   : >> { %v4148_v32 = vpop.eup %4147 }
 0x54b   : >> { %v1483_v4 = vpop.xlane.xlu0 %1482  ;;  %v1481_v47 = vpop.xlane.xlu1 %1480 }
 0x54c   : >> { %4155 = vrcp.f32 %v1481_v47 }
 0x54d   : >> { %v4150_v54 = vpop.eup %4149 }
 0x54e   : >> { %v4152_v16 = vpop.eup %4151 }
 0x54f   : >> { %v1487_v55 = vpop.xlane.xlu0 %1486  ;;  %v4154_v57 = vpop.eup %4153 }
 0x550   : >> { %v1485_v49 = vpop.xlane.xlu1 %1484  ;;  %4157 = vrcp.f32 %v1487_v55 }
 0x551   : >> { %4159 = vrcp.f32 %v1483_v4 }
 0x552   : >> { %4161 = vrcp.f32 %v1485_v49 }
 0x557   : >> { %v1491_v1 = vpop.xlane.xlu0 %1490  ;;  %v1489_v3 = vpop.xlane.xlu1 %1488 }
 0x558   : >> { %4163 = vrcp.f32 %v1489_v3 }
 0x559   : >> { %v4156_v10 = vpop.eup %4155 }
 0x55b   : >> { %v1495_v40 = vpop.xlane.xlu0 %1494  ;;  %v1493_v37 = vpop.xlane.xlu1 %1492 }
 0x55c   : >> { %4165 = vrcp.f32 %v1495_v40 }
 0x55d   : >> { %v4158_v22 = vpop.eup %4157  ;;  %4167 = vrcp.f32 %v1491_v1  ;;  %v1640_v1 = vld [vmem:[#allocation2 + $0x8] sm:$0xff] }
 0x55e   : >> { %v4160_v18 = vpop.eup %4159  ;;  %4169 = vrcp.f32 %v1493_v37 }
 0x55f   : >> { %v1499_v12 = vpop.xlane.xlu0 %1498  ;;  %v4162_v36 = vpop.eup %4161 }
 0x560   : >> { %v1497_v15 = vpop.xlane.xlu1 %1496 }
 0x561   : >> { %4171 = vrcp.f32 %v1497_v15 }
 0x563   : >> { %v1503_v17 = vpop.xlane.xlu0 %1502 }
 0x564   : >> { %v1501_v60 = vpop.xlane.xlu1 %1500  ;;  %4173 = vrcp.f32 %v1503_v17  ;;  %v1650_v17 = vld [vmem:[#allocation2 + $0x58] sm:$0xff] }
 0x565   : >> { %4175 = vrcp.f32 %v1499_v12  ;;  %v4164_v27 = vpop.eup %4163 }
 0x566   : >> { %4177 = vrcp.f32 %v1501_v60 }
 0x569   : >> { %v4166_v28 = vpop.eup %4165 }
 0x56a   : >> { %v4168_v51 = vpop.eup %4167 }
 0x56b   : >> { %v4170_v5 = vpop.eup %4169 }
 0x56e   : >> { %v4172_v13 = vpop.eup %4171 }
 0x571   : >> { %v3974_v46 = vpop.f32.mrf.mxu1  ;;  %v4174_v43 = vpop.eup %4173 }
 0x572   : >> { %v1612_v63 = vmul.f32 %v4154_v57, %v3974_v46  ;;  %v4176_v4 = vpop.eup %4175  ;;  %v1639_v57 = vld [vmem:[#allocation2] sm:$0xff] }
 0x573   : >> { %v1544_v48 = vpop.f32.mrf.mxu1 }
 0x574   : >> { %v1608_v53 = vmul.f32 %v4148_v32, %v1544_v48  ;;  %v4178_v48 = vpop.eup %4177 }
 0x575   : >> { %v3975_v52 = vpop.f32.mrf.mxu1 }
 0x576   : >> { %v1614_v56 = vmul.f32 %v4150_v54, %v3975_v52 }
 0x577   : >> { %v1547_v6 = vpop.f32.mrf.mxu1 }
 0x578   : >> { %v1610_v62 = vmul.f32 %v4152_v16, %v1547_v6  ;;  %v1656_v2 = vpack.c.bf16 %v1614_v56, %v1612_v63  ;;  %v1641_v56 = vld [vmem:[#allocation2 + $0x10] sm:$0xff] }
 0x57a   : >> { %v1655_v0 = vpack.c.bf16 %v1610_v62, %v1608_v53  ;;  %v1642_v62 = vld [vmem:[#allocation2 + $0x18] sm:$0xff] }
 0x57c   : >> { %3990 = vmatprep.mubr.msk.bf16.mxu0 %vm1254_vm3, %v1655_v0 }
 0x57d   : >> { %3991 = vmatmul.mubr.msk.bf16.vlgmr.msra.gmra.mxu0 %vm1254_vm3, %v1656_v2 }
 0x581   : >> { %v3978_v7 = vpop.f32.mrf.mxu1 }
 0x582   : >> { %v1620_v21 = vmul.f32 %v4162_v36, %v3978_v7  ;;  %v1645_v7 = vld [vmem:[#allocation2 + $0x30] sm:$0xff] }
 0x583   : >> { %v1560_v8 = vpop.f32.mrf.mxu1 }
 0x584   : >> { %v1616_v61 = vmul.f32 %v4156_v10, %v1560_v8  ;;  %v1643_v8 = vld [vmem:[#allocation2 + $0x20] sm:$0xff] }
 0x585   : >> { %v3979_v11 = vpop.f32.mrf.mxu1 }
 0x586   : >> { %v1622_v31 = vmul.f32 %v4158_v22, %v3979_v11  ;;  %v1646_v22 = vld [vmem:[#allocation2 + $0x38] sm:$0xff] }
 0x587   : >> { %v1563_v44 = vpop.f32.mrf.mxu1 }
 0x588   : >> { %v1618_v20 = vmul.f32 %v4160_v18, %v1563_v44  ;;  %v1658_v24 = vpack.c.bf16 %v1622_v31, %v1620_v21  ;;  %v1644_v31 = vld [vmem:[#allocation2 + $0x28] sm:$0xff]  ;;  %v1647_v21 = vld [vmem:[#allocation2 + $0x40] sm:$0xff] }
 0x58a   : >> { %v1657_v23 = vpack.c.bf16 %v1618_v20, %v1616_v61  ;;  %v1649_v20 = vld [vmem:[#allocation2 + $0x50] sm:$0xff] }
 0x58c   : >> { %3994 = vmatprep.mubr.msk.bf16.mxu0 %vm1254_vm3, %v1657_v23 }
 0x58d   : >> { %3995 = vmatmul.mubr.msk.bf16.gmra.mxu0 %vm1254_vm3, %v1658_v24 }
 0x590   : >> { %v3982_v50 = vpop.f32.mrf.mxu1 }
 0x591   : >> { %v1628_v33 = vmul.f32 %v4170_v5, %v3982_v50 }
 0x592   : >> { %v1576_v25 = vpop.f32.mrf.mxu1 }
 0x593   : >> { %v1624_v39 = vmul.f32 %v4164_v27, %v1576_v25  ;;  %v1648_v25 = vld [vmem:[#allocation2 + $0x48] sm:$0xff] }
 0x594   : >> { %v3983_v35 = vpop.f32.mrf.mxu1 }
 0x595   : >> { %v1630_v19 = vmul.f32 %v4166_v28, %v3983_v35  ;;  %v1653_v28 = vld [vmem:[#allocation2 + $0x70] sm:$0xff] }
 0x596   : >> { %v1579_v29 = vpop.f32.mrf.mxu1 }
 0x597   : >> { %v1626_v30 = vmul.f32 %v4168_v51, %v1579_v29  ;;  %v1660_v41 = vpack.c.bf16 %v1630_v19, %v1628_v33  ;;  %v1651_v29 = vld [vmem:[#allocation2 + $0x60] sm:$0xff] }
 0x598   : >> { %v3986_v26 = vpop.f32.mrf.mxu1 }
 0x599   : >> { %v1659_v38 = vpack.c.bf16 %v1626_v30, %v1624_v39  ;;  %v1636_v54 = vmul.f32 %v4178_v48, %v3986_v26  ;;  %v1654_v30 = vld [vmem:[#allocation2 + $0x78] sm:$0xff] }
 0x59a   : >> { %v1592_v42 = vpop.f32.mrf.mxu1 }
 0x59b   : >> { %3998 = vmatprep.mubr.msk.bf16.mxu0 %vm1254_vm3, %v1659_v38  ;;  %v1632_v32 = vmul.f32 %v4172_v13, %v1592_v42  ;;  %v1652_v38 = vld [vmem:[#allocation2 + $0x68] sm:$0xff] }
 0x59c   : >> { %v3987_v45 = vpop.f32.mrf.mxu1  ;;  %3999 = vmatmul.mubr.msk.bf16.gmra.mxu0 %vm1254_vm3, %v1660_v41 }
 0x59d   : >> { %v1638_v46 = vmul.f32 %v4174_v43, %v3987_v45 }
 0x59e   : >> { %v1595_v47 = vpop.f32.mrf.mxu1 }
 0x59f   : >> { %v1634_v52 = vmul.f32 %v4176_v4, %v1595_v47  ;;  %v1662_v16 = vpack.c.bf16 %v1638_v46, %v1636_v54 }
 0x5a1   : >> { %v1661_v55 = vpack.c.bf16 %v1634_v52, %v1632_v32 }
 0x5a3   : >> { %4002 = vmatprep.mubr.msk.bf16.mxu0 %vm1254_vm3, %v1661_v55 }
 0x5a4   : >> { %4003 = vmatmul.mubr.msk.bf16.gmra.mxu0 %vm1254_vm3, %v1662_v16 }
 0x5a5   : > { %2228 = vmatprep.mubr.bf16.mxu0 (%p1201_p7), %v4431_v34 }
 0x63d   : >> { %v3992_v6 = vpop.f32.mrf.mxu0 }
 0x63e   : >> { %v1799_v49 = vadd.f32 %v3992_v6, %v1641_v56 }
 0x63f   : >> { %v1734_v53 = vpop.f32.mrf.mxu0 }
 0x640   : >> { %1815 = vst.msk [vmem:[#allocation2 + $0x10] sm:$0xff] %vm507_vm1, %v1799_v49  ;;  %v1797_v63 = vadd.f32 %v1734_v53, %v1639_v57 }
 0x641   : >> { %v3993_v0 = vpop.f32.mrf.mxu0 }
 0x642   : >> { %1813 = vst.msk [vmem:[#allocation2] sm:$0xff] %vm507_vm1, %v1797_v63  ;;  %v1800_v2 = vadd.f32 %v3993_v0, %v1642_v62 }
 0x643   : >> { %v1737_v3 = vpop.f32.mrf.mxu0 }
 0x644   : >> { %1816 = vst.msk [vmem:[#allocation2 + $0x18] sm:$0xff] %vm507_vm1, %v1800_v2  ;;  %v1798_v40 = vadd.f32 %v1737_v3, %v1640_v1 }
 0x646   : >> { %1814 = vst.msk [vmem:[#allocation2 + $0x8] sm:$0xff] %vm507_vm1, %v1798_v40 }
 0x647   : > { %v1831_v43 = vld [vmem:[#allocation2 + $0x10] sm:$0xff] (%p1201_p7) }
 0x648   : > { %v1855_v47 = vsel (%p1201_p7), %vm507_vm1, %v1831_v43, 0.0 }
 0x649   : > { %v1829_v45 = vld [vmem:[#allocation2] sm:$0xff] (%p1201_p7)  ;;  %1856 = vadd.xlane.f32.xlu1 (%p1201_p7), %v1855_v47 }
 0x64a   : > { %v1849_v46 = vsel (%p1201_p7), %vm507_vm1, %v1829_v45, 0.0 }
 0x64b   : > { %v1832_v48 = vld [vmem:[#allocation2 + $0x18] sm:$0xff] (%p1201_p7)  ;;  %1850 = vadd.xlane.f32.xlu0 (%p1201_p7), %v1849_v46 }
 0x64c   : > { %v1858_v52 = vsel (%p1201_p7), %vm507_vm1, %v1832_v48, 0.0 }
 0x64d   : >> { %v3996_v37 = vpop.f32.mrf.mxu0  ;;  %v1830_v4 = vld [vmem:[#allocation2 + $0x8] sm:$0xff] (%p1201_p7)  ;;  %1859 = vadd.xlane.f32.xlu1 (%p1201_p7), %v1858_v52 }
 0x64e   : >> { %v1803_v10 = vadd.f32 %v3996_v37, %v1645_v7  ;;  %v1852_v32 = vsel (%p1201_p7), %vm507_vm1, %v1830_v4, 0.0 }
 0x64f   : >> { %v1750_v11 = vpop.f32.mrf.mxu0  ;;  %1853 = vadd.xlane.f32.xlu0 (%p1201_p7), %v1852_v32 }
 0x650   : >> { %1819 = vst.msk [vmem:[#allocation2 + $0x30] sm:$0xff] %vm507_vm1, %v1803_v10  ;;  %v1801_v18 = vadd.f32 %v1750_v11, %v1643_v8 }
 0x651   : >> { %v3997_v12 = vpop.f32.mrf.mxu0 }
 0x652   : >> { %1817 = vst.msk [vmem:[#allocation2 + $0x20] sm:$0xff] %vm507_vm1, %v1801_v18  ;;  %v1804_v44 = vadd.f32 %v3997_v12, %v1646_v22 }
 0x653   : >> { %v1753_v36 = vpop.f32.mrf.mxu0 }
 0x654   : >> { %1820 = vst.msk [vmem:[#allocation2 + $0x38] sm:$0xff] %vm507_vm1, %v1804_v44  ;;  %v1802_v61 = vadd.f32 %v1753_v36, %v1644_v31 }
 0x656   : >> { %1818 = vst.msk [vmem:[#allocation2 + $0x28] sm:$0xff] %vm507_vm1, %v1802_v61 }
 0x657   : > { %v5022_v56 = vld [vmem:[#allocation2 + $0x30] sm:$0xff] (%p1201_p7) }
 0x658   : > { %v1867_v57 = vsel (%p1201_p7), %vm507_vm1, %v5022_v56, 0.0 }
 0x659   : > { %v1833_v54 = vld [vmem:[#allocation2 + $0x20] sm:$0xff] (%p1201_p7) }
 0x65a   : > { %v1861_v58 = vsel (%p1201_p7), %vm507_vm1, %v1833_v54, 0.0 }
 0x65b   : > { %v5024_v6 = vld [vmem:[#allocation2 + $0x38] sm:$0xff] (%p1201_p7)  ;;  %1862 = vadd.xlane.f32.xlu0 (%p1201_p7), %v1861_v58 }
 0x65c   : >> { %v4000_v15 = vpop.f32.mrf.mxu0  ;;  %v1870_v49 = vsel (%p1201_p7), %vm507_vm1, %v5024_v6, 0.0 }
 0x65d   : >> { %v1807_v23 = vadd.f32 %v4000_v15, %v1649_v20  ;;  %v1834_v55 = vld [vmem:[#allocation2 + $0x28] sm:$0xff] (%p1201_p7) }
 0x65e   : >> { %v1766_v24 = vpop.f32.mrf.mxu0  ;;  %v1864_v16 = vsel (%p1201_p7), %vm507_vm1, %v1834_v55, 0.0 }
 0x65f   : >> { %1823 = vst.msk [vmem:[#allocation2 + $0x50] sm:$0xff] %vm507_vm1, %v1807_v23  ;;  %v1805_v60 = vadd.f32 %v1766_v24, %v1647_v21  ;;  %1865 = vadd.xlane.f32.xlu1 (%p1201_p7), %v1864_v16  ;;  %1868 = vadd.xlane.f32.xlu0 (%p1201_p7), %v1867_v57 }
 0x660   : >> { %v4001_v50 = vpop.f32.mrf.mxu0 }
 0x661   : >> { %1821 = vst.msk [vmem:[#allocation2 + $0x40] sm:$0xff] %vm507_vm1, %v1805_v60  ;;  %v1808_v27 = vadd.f32 %v4001_v50, %v1650_v17 }
 0x662   : >> { %v1769_v35 = vpop.f32.mrf.mxu0 }
 0x663   : >> { %1824 = vst.msk [vmem:[#allocation2 + $0x58] sm:$0xff] %vm507_vm1, %v1808_v27  ;;  %v1806_v51 = vadd.f32 %v1769_v35, %v1648_v25  ;;  %1871 = vadd.xlane.f32.xlu1 (%p1201_p7), %v1870_v49 }
 0x664   : >> { %v4004_v19 = vpop.f32.mrf.mxu0 }
 0x665   : >> { %1822 = vst.msk [vmem:[#allocation2 + $0x48] sm:$0xff] %vm507_vm1, %v1806_v51  ;;  %v1811_v5 = vadd.f32 %v4004_v19, %v1653_v28 }
 0x666   : >> { %v1782_v39 = vpop.f32.mrf.mxu0  ;;  %v5038_v1 = vld [vmem:[#allocation2 + $0x50] sm:$0xff] (%p1201_p7) }
 0x667   : >> { %1827 = vst.msk [vmem:[#allocation2 + $0x70] sm:$0xff] %vm507_vm1, %v1811_v5  ;;  %v1809_v33 = vadd.f32 %v1782_v39, %v1651_v29  ;;  %v1879_v3 = vsel (%p1201_p7), %vm507_vm1, %v5038_v1, 0.0 }
 0x668   : >> { %v4005_v26 = vpop.f32.mrf.mxu0  ;;  %v5030_v53 = vld [vmem:[#allocation2 + $0x40] sm:$0xff] (%p1201_p7) }
 0x669   : >> { %1825 = vst.msk [vmem:[#allocation2 + $0x60] sm:$0xff] %vm507_vm1, %v1809_v33  ;;  %v1812_v41 = vadd.f32 %v4005_v26, %v1654_v30  ;;  %1203 = sbr.rel (!%p1201_p7) target bundleno = 728 (0x2d8), region = 132  ;;  %v1873_v63 = vsel (%p1201_p7), %vm507_vm1, %v5030_v53, 0.0 }
 0x66a   : >> { %v1785_v42 = vpop.f32.mrf.mxu0  ;;  %v5040_v2 = vld [vmem:[#allocation2 + $0x58] sm:$0xff] (%p1201_p7)  ;;  %1874 = vadd.xlane.f32.xlu0 (%p1201_p7), %v1873_v63 }
 0x66b   : >> { %1828 = vst.msk [vmem:[#allocation2 + $0x78] sm:$0xff] %vm507_vm1, %v1812_v41  ;;  %v1810_v13 = vadd.f32 %v1785_v42, %v1652_v38  ;;  %v1882_v40 = vsel (%p1201_p7), %vm507_vm1, %v5040_v2, 0.0 }
 0x66c   : > { %v5032_v62 = vld [vmem:[#allocation2 + $0x48] sm:$0xff] (%p1201_p7) }
 0x66d   : >> { %1826 = vst.msk [vmem:[#allocation2 + $0x68] sm:$0xff] %vm507_vm1, %v1810_v13  ;;  %v1876_v0 = vsel (%p1201_p7), %vm507_vm1, %v5032_v62, 0.0 }
 0x66e   : > { %1877 = vadd.xlane.f32.xlu1 %v1876_v0  ;;  %1880 = vadd.xlane.f32.xlu0 %v1879_v3  ;;  %v5054_v11 = vld [vmem:[#allocation2 + $0x70] sm:$0xff]  ;;  %s6390_s24 = scalar_lea.vmem (!%p3758_p8), %s6235_s13, %s6402_s26 }
 0x66f   : > { %v1891_v18 = vsel %vm507_vm1, %v5054_v11, 0.0 }
 0x670   : > { %v5046_v7 = vld [vmem:[#allocation2 + $0x60] sm:$0xff] }
 0x671   : > { %v1885_v8 = vsel %vm507_vm1, %v5046_v7, 0.0 }
 0x672   : > { %1883 = vadd.xlane.f32.xlu1 %v1882_v40  ;;  %v5056_v22 = vld [vmem:[#allocation2 + $0x78] sm:$0xff]  ;;  %1886 = vadd.xlane.f32.xlu0 %v1885_v8 }
 0x673   : > { %v1894_v12 = vsel %vm507_vm1, %v5056_v22, 0.0 }
 0x674   : > { %v5048_v37 = vld [vmem:[#allocation2 + $0x68] sm:$0xff] }
 0x675   : > { %v1888_v10 = vsel %vm507_vm1, %v5048_v37, 0.0 }
 0x676   : > { %1889 = vadd.xlane.f32.xlu1 %v1888_v10  ;;  %1892 = vadd.xlane.f32.xlu0 %v1891_v18 }
 0x67a   : > { %1895 = vadd.xlane.f32.xlu1 %v1894_v12 }
 0x6d2   : > { %v1857_v44 = vpop.xlane.xlu1 %1856 }
 0x6d3   : > { %v1899_v61 = vmul.f32 0.015625, %v1857_v44 }
 0x6d4   : > { %v1851_v31 = vpop.xlane.xlu0 %1850 }
 0x6d5   : > { %v1897_v36 = vmul.f32 0.015625, %v1851_v31  ;;  %v5064_v15 = vsub.f32 %v1831_v43, %v1899_v61 }
 0x6d6   : > { %v1860_v23 = vpop.xlane.xlu1 %1859 }
 0x6d7   : > { %v5062_v20 = vsub.f32 %v1829_v45, %v1897_v36  ;;  %v1900_v17 = vmul.f32 0.015625, %v1860_v23  ;;  %v1931_v50 = vmul.f32 %v5064_v15, %v5064_v15 }
 0x6d8   : > { %v1854_v21 = vpop.xlane.xlu0 %1853 }
 0x6d9   : > { %v1898_v24 = vmul.f32 0.015625, %v1854_v21  ;;  %v1929_v60 = vmul.f32 %v5062_v20, %v5062_v20  ;;  %v5072_v27 = vsub.f32 %v1832_v48, %v1900_v17  ;;  %v1951_v19 = vsel %vm507_vm1, %v1931_v50, 0.0 }
 0x6db   : > { %v5070_v25 = vsub.f32 %v1830_v4, %v1898_v24  ;;  %v1945_v35 = vsel %vm507_vm1, %v1929_v60, 0.0  ;;  %v1932_v30 = vmul.f32 %v5072_v27, %v5072_v27 }
 0x6dc   : > { %1946 = vadd.xlane.f32.xlu0 %v1945_v35 }
 0x6dd   : > { %v1930_v39 = vmul.f32 %v5070_v25, %v5070_v25  ;;  %v1954_v13 = vsel %vm507_vm1, %v1932_v30, 0.0  ;;  %v4179_v30 = vld [vmem:[%s2110_s16 + $0x34] ss:$8 sps:$4 sm:$0xff]  }
 0x6de   : > { %2204 = vmatprep.subr.bf16.mxu0 %v4179_v30 }
 0x6df   : > { %v1948_v38 = vsel %vm507_vm1, %v1930_v39, 0.0 }
 0x6e0   : > { %1952 = vadd.xlane.f32.xlu0 %v1951_v19  ;;  %1949 = vadd.xlane.f32.xlu1 %v1948_v38  ;;  %v4181_v38 = vld [vmem:[%s2110_s16 + $0x30] ss:$8 sps:$4 sm:$0xff]  }
 0x6e1   : > { %2205 = vmatpush1.bf16.msra.mxu0 %v4181_v38 }
 0x6e4   : > { %v1863_v28 = vpop.xlane.xlu0 %1862  ;;  %1955 = vadd.xlane.f32.xlu1 %v1954_v13 }
 0x6e5   : > { %v1901_v29 = vmul.f32 0.015625, %v1863_v28 }
 0x6e7   : > { %v5080_v33 = vsub.f32 %v1833_v54, %v1901_v29 }
 0x6e8   : > { %v1866_v51 = vpop.xlane.xlu1 %1865  ;;  %v1869_v41 = vpop.xlane.xlu0 %1868 }
 0x6e9   : > { %v1902_v5 = vmul.f32 0.015625, %v1866_v51  ;;  %v1903_v45 = vmul.f32 0.015625, %v1869_v41  ;;  %v1933_v4 = vmul.f32 %v5080_v33, %v5080_v33 }
 0x6eb   : > { %v5082_v26 = vsub.f32 %v1834_v55, %v1902_v5  ;;  %v5091_v47 = vsub.f32 %v5022_v56, %v1903_v45  ;;  %v1957_v32 = vsel %vm507_vm1, %v1933_v4, 0.0  ;;  %v4184_v45 = vld [vmem:[%s2110_s16 + $0x20] ss:$8 sps:$4 sm:$0xff]   ;;  %v4185_v4 = vld [vmem:[%s2110_s16 + $0x14] ss:$8 sps:$4 sm:$0xff]  }
 0x6ec   : > { %v1872_v42 = vpop.xlane.xlu1 %1871  ;;  %1958 = vadd.xlane.f32.xlu0 %v1957_v32  ;;  %v4188_v32 = vld [vmem:[%s2110_s16 + $0x4] ss:$8 sps:$4 sm:$0xff]  }
 0x6ed   : > { %v1904_v43 = vmul.f32 0.015625, %v1872_v42  ;;  %v1934_v46 = vmul.f32 %v5082_v26, %v5082_v26  ;;  %v1935_v57 = vmul.f32 %v5091_v47, %v5091_v47 }
 0x6ef   : > { %v5094_v48 = vsub.f32 %v5024_v6, %v1904_v43  ;;  %v1960_v55 = vsel %vm507_vm1, %v1934_v46, 0.0  ;;  %v1963_v63 = vsel %vm507_vm1, %v1935_v57, 0.0  ;;  %v4187_v46 = vld [vmem:[%s2110_s16 + $0x10] ss:$8 sps:$4 sm:$0xff]  }
 0x6f0   : > { %1961 = vadd.xlane.f32.xlu1 %v1960_v55  ;;  %1964 = vadd.xlane.f32.xlu0 %v1963_v63 }
 0x6f1   : > { %v1936_v56 = vmul.f32 %v5094_v48, %v5094_v48 }
 0x6f3   : > { %v1875_v52 = vpop.xlane.xlu0 %1874  ;;  %v1966_v40 = vsel %vm507_vm1, %v1936_v56, 0.0 }
 0x6f4   : > { %v1905_v58 = vmul.f32 0.015625, %v1875_v52  ;;  %1967 = vadd.xlane.f32.xlu1 %v1966_v40  ;;  %v4190_v52 = vld [vmem:[%s2110_s16] ss:$8 sps:$4 sm:$0xff]  }
 0x6f6   : > { %v5103_v49 = vsub.f32 %v5030_v53, %v1905_v58 }
 0x6f7   : > { %v1878_v54 = vpop.xlane.xlu1 %1877  ;;  %v1881_v0 = vpop.xlane.xlu0 %1880 }
 0x6f8   : > { %v1906_v16 = vmul.f32 0.015625, %v1878_v54  ;;  %v1907_v8 = vmul.f32 0.015625, %v1881_v0  ;;  %v1937_v18 = vmul.f32 %v5103_v49, %v5103_v49 }
 0x6fa   : > { %v5106_v6 = vsub.f32 %v5032_v62, %v1906_v16  ;;  %v5115_v12 = vsub.f32 %v5038_v1, %v1907_v8  ;;  %v1969_v31 = vsel %vm507_vm1, %v1937_v18, 0.0 }
 0x6fb   : > { %v1884_v3 = vpop.xlane.xlu1 %1883  ;;  %1970 = vadd.xlane.f32.xlu0 %v1969_v31  ;;  %v1887_v44 = vpop.xlane.xlu0 %1886 }
 0x6fc   : > { %v1908_v10 = vmul.f32 0.015625, %v1884_v3  ;;  %v1938_v53 = vmul.f32 %v5106_v6, %v5106_v6  ;;  %v1909_v21 = vmul.f32 0.015625, %v1887_v44  ;;  %v1939_v24 = vmul.f32 %v5115_v12, %v5115_v12 }
 0x6fe   : > { %v5118_v62 = vsub.f32 %v5040_v2, %v1908_v10  ;;  %v1972_v61 = vsel %vm507_vm1, %v1938_v53, 0.0  ;;  %v5127_v2 = vsub.f32 %v5046_v7, %v1909_v21  ;;  %v1975_v60 = vsel %vm507_vm1, %v1939_v24, 0.0 }
 0x6ff   : > { %v1890_v36 = vpop.xlane.xlu1 %1889  ;;  %1973 = vadd.xlane.f32.xlu1 %v1972_v61  ;;  %1976 = vadd.xlane.f32.xlu0 %v1975_v60  ;;  %v1893_v50 = vpop.xlane.xlu0 %1892 }
 0x700   : > { %v1910_v23 = vmul.f32 0.015625, %v1890_v36  ;;  %v1940_v1 = vmul.f32 %v5118_v62, %v5118_v62  ;;  %v1911_v51 = vmul.f32 0.015625, %v1893_v50  ;;  %v1941_v29 = vmul.f32 %v5127_v2, %v5127_v2 }
 0x702   : > { %v5130_v17 = vsub.f32 %v5048_v37, %v1910_v23  ;;  %v1978_v28 = vsel %vm507_vm1, %v1940_v1, 0.0  ;;  %v5144_v37 = vsub.f32 %v5054_v11, %v1911_v51  ;;  %v1981_v39 = vsel %vm507_vm1, %v1941_v29, 0.0 }
 0x703   : > { %v1896_v35 = vpop.xlane.xlu1 %1895  ;;  %1979 = vadd.xlane.f32.xlu1 %v1978_v28  ;;  %1982 = vadd.xlane.f32.xlu0 %v1981_v39 }
 0x704   : > { %v1912_v19 = vmul.f32 0.015625, %v1896_v35  ;;  %v1942_v7 = vmul.f32 %v5130_v17, %v5130_v17  ;;  %v1943_v42 = vmul.f32 %v5144_v37, %v5144_v37  ;;  %v5162_v35 = vld [vmem:[%s1845_s19] ss:$0 sm:$0xff] }
 0x706   : > { %v5147_v5 = vsub.f32 %v5056_v22, %v1912_v19  ;;  %v1984_v41 = vsel %vm507_vm1, %v1942_v7, 0.0  ;;  %v1987_v11 = vsel %vm507_vm1, %v1943_v42, 0.0  ;;  %v4182_v22 = vld [vmem:[%s2110_s16 + $0x24] ss:$8 sps:$4 sm:$0xff]   ;;  %s5236_s16 = scalar_lea.vmem %s6233_s11, %s3789_s17  ;;  %s3192_s17 = scalar_lea.vmem %s6234_s12, %s4409_s25 }
 0x707   : > { %1985 = vadd.xlane.f32.xlu1 %v1984_v41  ;;  %1988 = vadd.xlane.f32.xlu0 %v1987_v11  ;;  %v5170_v41 = vld [vmem:[%s1847_s18] ss:$0 sm:$0xff] }
 0x708   : > { %v1944_v13 = vmul.f32 %v5147_v5, %v5147_v5  ;;  %2206 = vmatprep.subr.bf16.mxu0 %v4182_v22 }
 0x709   : > { %2207 = vmatpush1.bf16.msra.mxu0 %v4184_v45 }
 0x70a   : > { %v1990_v43 = vsel %vm507_vm1, %v1944_v13, 0.0  ;;  %2208 = vmatprep.subr.bf16.mxu0 %v4185_v4 }
 0x70b   : > { %1991 = vadd.xlane.f32.xlu1 %v1990_v43 }
 0x70d   : > { %2209 = vmatpush1.bf16.msra.mxu0 %v4187_v46 }
 0x70e   : > { %2210 = vmatprep.subr.bf16.mxu0 %v4188_v32 }
 0x711   : > { %2211 = vmatpush1.bf16.msra.mxu0 %v4190_v52 }
 0x765   : > { %v1947_v54 = vpop.xlane.xlu0 %1946 }
 0x766   : > { %v1993_v55 = vmul.f32 0.015625, %v1947_v54 }
 0x768   : > { %v2009_v58 = vadd.f32 1e-05, %v1993_v55 }
 0x769   : > { %v1950_v16 = vpop.xlane.xlu1 %1949  ;;  %v1953_v57 = vpop.xlane.xlu0 %1952 }
 0x76a   : > { %4207 = vrsqrt.f32 %v2009_v58  ;;  %v1994_v56 = vmul.f32 0.015625, %v1950_v16  ;;  %v1995_v63 = vmul.f32 0.015625, %v1953_v57 }
 0x76c   : > { %v2010_v0 = vadd.f32 1e-05, %v1994_v56  ;;  %v2011_v3 = vadd.f32 1e-05, %v1995_v63 }
 0x76d   : > { %v1956_v40 = vpop.xlane.xlu1 %1955 }
 0x76e   : > { %4209 = vrsqrt.f32 %v2010_v0  ;;  %v1996_v10 = vmul.f32 0.015625, %v1956_v40 }
 0x76f   : > { %4211 = vrsqrt.f32 %v2011_v3 }
 0x770   : > { %v2012_v18 = vadd.f32 1e-05, %v1996_v10 }
 0x772   : > { %4213 = vrsqrt.f32 %v2012_v18 }
 0x775   : > { %v1959_v8 = vpop.xlane.xlu0 %1958 }
 0x776   : > { %v1997_v53 = vmul.f32 0.015625, %v1959_v8 }
 0x777   : > { %v4208_v1 = vpop.eup %4207 }
 0x778   : > { %v2013_v36 = vadd.f32 1e-05, %v1997_v53  ;;  %v2041_v50 = vmul.f32 %v4208_v1, %v5062_v20 }
 0x779   : > { %v1962_v31 = vpop.xlane.xlu1 %1961  ;;  %v1965_v21 = vpop.xlane.xlu0 %1964 }
 0x77a   : > { %v1998_v44 = vmul.f32 0.015625, %v1962_v31  ;;  %v1999_v60 = vmul.f32 0.015625, %v1965_v21  ;;  %v2063_v30 = vmul.f32 %v5162_v35, %v2041_v50 }
 0x77b   : > { %v4210_v51 = vpop.eup %4209 }
 0x77c   : > { %v2014_v61 = vadd.f32 1e-05, %v1998_v44  ;;  %v2015_v19 = vadd.f32 1e-05, %v1999_v60  ;;  %v2042_v39 = vmul.f32 %v4210_v51, %v5070_v25  ;;  %v4212_v38 = vpop.eup %4211  ;;  %v2085_v22 = vadd.f32 %v5170_v41, %v2063_v30 }
 0x77d   : > { %v1968_v23 = vpop.xlane.xlu1 %1967  ;;  %v2043_v43 = vmul.f32 %v4212_v38, %v5064_v15 }
 0x77e   : > { %4215 = vrsqrt.f32 %v2014_v61  ;;  %v2000_v24 = vmul.f32 0.015625, %v1968_v23  ;;  %v2064_v42 = vmul.f32 %v5162_v35, %v2042_v39 }
 0x77f   : > { %4217 = vrsqrt.f32 %v2013_v36  ;;  %v4214_v13 = vpop.eup %4213  ;;  %v2065_v58 = vmul.f32 %v5162_v35, %v2043_v43 }
 0x780   : > { %v2016_v28 = vadd.f32 1e-05, %v2000_v24  ;;  %v2086_v45 = vadd.f32 %v5170_v41, %v2064_v42  ;;  %v2044_v25 = vmul.f32 %v4214_v13, %v5072_v27 }
 0x781   : > { %v2087_v0 = vadd.f32 %v5170_v41, %v2065_v58 }
 0x782   : > { %4219 = vrsqrt.f32 %v2016_v28  ;;  %v2101_v46 = vpack.c.bf16 %v2086_v45, %v2085_v22  ;;  %v2066_v54 = vmul.f32 %v5162_v35, %v2044_v25 }
 0x783   : > { %4221 = vrsqrt.f32 %v2015_v19 }
 0x784   : > { %v1971_v7 = vpop.xlane.xlu0 %1970  ;;  %3731 = vmatmul.mubr.msk.bf16.vlgmr.msra.gmra.mxu0 %vm507_vm1, %v2101_v46  ;;  %v2088_v15 = vadd.f32 %v5170_v41, %v2066_v54 }
 0x785   : > { %v2001_v11 = vmul.f32 0.015625, %v1971_v7  ;;  %2238 = vmatprep.mubr.bf16.mxu0 %v4431_v34 }
 0x786   : > { %v2102_v8 = vpack.c.bf16 %v2088_v15, %v2087_v0 }
 0x787   : > { %v2017_v55 = vadd.f32 1e-05, %v2001_v11 }
 0x788   : > { %v1974_v29 = vpop.xlane.xlu1 %1973  ;;  %v1977_v57 = vpop.xlane.xlu0 %1976 }
 0x789   : > { %v2002_v20 = vmul.f32 0.015625, %v1974_v29  ;;  %v2003_v63 = vmul.f32 0.015625, %v1977_v57 }
 0x78b   : > { %v2018_v4 = vadd.f32 1e-05, %v2002_v20  ;;  %v4216_v32 = vpop.eup %4215  ;;  %v2019_v44 = vadd.f32 1e-05, %v2003_v63 }
 0x78c   : > { %v1980_v52 = vpop.xlane.xlu1 %1979  ;;  %v4218_v16 = vpop.eup %4217  ;;  %v2046_v27 = vmul.f32 %v4216_v32, %v5082_v26  ;;  %3732 = vmatmul.mubr.msk.bf16.gmra.mxu0 %vm507_vm1, %v2102_v8 }
 0x78d   : > { %4223 = vrsqrt.f32 %v2018_v4  ;;  %v2004_v56 = vmul.f32 0.015625, %v1980_v52  ;;  %v2045_v3 = vmul.f32 %v4218_v16, %v5080_v33  ;;  %v1983_v61 = vpop.xlane.xlu0 %1982  ;;  %2248 = vmatprep.mubr.bf16.mxu0 %v4431_v34 }
 0x78e   : > { %4225 = vrsqrt.f32 %v2017_v55  ;;  %v2068_v10 = vmul.f32 %v5162_v35, %v2046_v27  ;;  %v2005_v23 = vmul.f32 0.015625, %v1983_v61 }
 0x78f   : > { %v2020_v40 = vadd.f32 1e-05, %v2004_v56  ;;  %v4220_v18 = vpop.eup %4219  ;;  %v2067_v36 = vmul.f32 %v5162_v35, %v2045_v3 }
 0x790   : > { %v1986_v53 = vpop.xlane.xlu1 %1985  ;;  %v4222_v31 = vpop.eup %4221  ;;  %v2090_v21 = vadd.f32 %v5170_v41, %v2068_v10  ;;  %v2048_v33 = vmul.f32 %v4220_v18, %v5094_v48  ;;  %v2021_v29 = vadd.f32 1e-05, %v2005_v23  ;;  %v4199_v23 = vld [vmem:[%s5236_s16 + $0x58] sm:$0xff]  }
 0x791   : > { %4227 = vrsqrt.f32 %v2020_v40  ;;  %v2006_v26 = vmul.f32 0.015625, %v1986_v53  ;;  %v2089_v24 = vadd.f32 %v5170_v41, %v2067_v36  ;;  %v2047_v1 = vmul.f32 %v4222_v31, %v5091_v47  ;;  %v1989_v30 = vpop.xlane.xlu0 %1988 }
 0x792   : > { %4229 = vrsqrt.f32 %v2019_v44  ;;  %v2070_v28 = vmul.f32 %v5162_v35, %v2048_v33  ;;  %v2007_v20 = vmul.f32 0.015625, %v1989_v30  ;;  %v4198_v33 = vld [vmem:[%s5236_s16 + $0x20] sm:$0xff]  }
 0x793   : > { %v2022_v60 = vadd.f32 1e-05, %v2006_v26  ;;  %v2103_v50 = vpack.c.bf16 %v2090_v21, %v2089_v24  ;;  %v2069_v7 = vmul.f32 %v5162_v35, %v2047_v1  ;;  %v4196_v26 = vld [vmem:[%s5236_s16 + $0x28] sm:$0xff]   ;;  %v4197_v21 = vld [vmem:[%s5236_s16 + $0x60] sm:$0xff]   ;;  %v4200_v24 = vld [vmem:[%s5236_s16 + $0x18] sm:$0xff]  }
 0x794   : > { %v1992_v19 = vpop.xlane.xlu1 %1991  ;;  %v2092_v38 = vadd.f32 %v5170_v41, %v2070_v28  ;;  %v2023_v25 = vadd.f32 1e-05, %v2007_v20  ;;  %v4201_v28 = vld [vmem:[%s5236_s16 + $0x50] sm:$0xff]  }
 0x795   : > { %3733 = vmatmul.mubr.msk.bf16.gmra.mxu0 %vm507_vm1, %v2103_v50  ;;  %4231 = vrsqrt.f32 %v2022_v60  ;;  %v2008_v48 = vmul.f32 0.015625, %v1992_v19  ;;  %v2091_v42 = vadd.f32 %v5170_v41, %v2069_v7  ;;  %v2120_v60 = vld [vmem:[%s2119_s20] sm:$0x3] }
 0x796   : > { %2258 = vmatprep.mubr.bf16.mxu0 %v4431_v34  ;;  %4233 = vrsqrt.f32 %v2021_v29  ;;  %v5257_v19 = vrot.slane %v2120_v60, %v786_v9  ;;  %v5261_v29 = vrot.slane %v2120_v60, %v790_v59 }
 0x797   : > { %v2024_v11 = vadd.f32 1e-05, %v2008_v48  ;;  %v2104_v22 = vpack.c.bf16 %v2092_v38, %v2091_v42 }
 0x799   : > { %4235 = vrsqrt.f32 %v2024_v11 }
 0x79a   : > { %v4224_v51 = vpop.eup %4223  ;;  %4237 = vrsqrt.f32 %v2023_v25 }
 0x79b   : > { %v4226_v39 = vpop.eup %4225  ;;  %v2050_v47 = vmul.f32 %v4224_v51, %v5106_v6  ;;  %v4202_v51 = vld [vmem:[%s5236_s16 + $0x10] sm:$0xff]  }
 0x79c   : > { %v2049_v13 = vmul.f32 %v4226_v39, %v5103_v49 }
 0x79d   : > { %v2072_v45 = vmul.f32 %v5162_v35, %v2050_v47  ;;  %3734 = vmatmul.mubr.msk.bf16.gmra.mxu0 %vm507_vm1, %v2104_v22  ;;  %v4203_v47 = vld [vmem:[%s5236_s16 + $0x48] sm:$0xff]  }
 0x79e   : > { %v4228_v43 = vpop.eup %4227  ;;  %v2071_v4 = vmul.f32 %v5162_v35, %v2049_v13  ;;  %2268 = vmatprep.mubr.bf16.mxu0 %v4431_v34 }
 0x79f   : > { %v4230_v46 = vpop.eup %4229  ;;  %v2094_v6 = vadd.f32 %v5170_v41, %v2072_v45  ;;  %v2052_v32 = vmul.f32 %v4228_v43, %v5118_v62 }
 0x7a0   : > { %v2093_v49 = vadd.f32 %v5170_v41, %v2071_v4  ;;  %v2051_v52 = vmul.f32 %v4230_v46, %v5115_v12 }
 0x7a1   : > { %v2074_v55 = vmul.f32 %v5162_v35, %v2052_v32 }
 0x7a2   : > { %v2105_v54 = vpack.c.bf16 %v2094_v6, %v2093_v49  ;;  %v4232_v58 = vpop.eup %4231  ;;  %v2073_v16 = vmul.f32 %v5162_v35, %v2051_v52  ;;  %v4204_v49 = vld [vmem:[%s5236_s16 + $0x8] sm:$0xff]  }
 0x7a3   : > { %v4234_v57 = vpop.eup %4233  ;;  %v2096_v56 = vadd.f32 %v5170_v41, %v2074_v55  ;;  %v2054_v62 = vmul.f32 %v4232_v58, %v5130_v17 }
 0x7a4   : > { %v2095_v15 = vadd.f32 %v5170_v41, %v2073_v16  ;;  %v2053_v27 = vmul.f32 %v4234_v57, %v5127_v2 }
 0x7a5   : > { %3735 = vmatmul.mubr.msk.bf16.gmra.mxu0 %vm507_vm1, %v2105_v54  ;;  %v2076_v63 = vmul.f32 %v5162_v35, %v2054_v62 }
 0x7a6   : > { %2278 = vmatprep.mubr.bf16.mxu0 %v4431_v34  ;;  %v2106_v12 = vpack.c.bf16 %v2096_v56, %v2095_v15  ;;  %v4236_v0 = vpop.eup %4235  ;;  %v2075_v3 = vmul.f32 %v5162_v35, %v2053_v27 }
 0x7a7   : > { %v4238_v40 = vpop.eup %4237  ;;  %v2098_v8 = vadd.f32 %v5170_v41, %v2076_v63  ;;  %v2056_v17 = vmul.f32 %v4236_v0, %v5147_v5  ;;  %v4193_v5 = vld [vmem:[%s5236_s16 + $0x70] sm:$0xff]   ;;  %v4205_v63 = vld [vmem:[%s5236_s16 + $0x40] sm:$0xff]  }
 0x7a8   : > { %v2097_v10 = vadd.f32 %v5170_v41, %v2075_v3  ;;  %v2055_v2 = vmul.f32 %v4238_v40, %v5144_v37  ;;  %v4192_v37 = vld [vmem:[%s5236_s16 + $0x38] sm:$0xff]  }
 0x7a9   : > { %v2078_v53 = vmul.f32 %v5162_v35, %v2056_v17 }
 0x7aa   : > { %v2107_v18 = vpack.c.bf16 %v2098_v8, %v2097_v10  ;;  %v2077_v31 = vmul.f32 %v5162_v35, %v2055_v2  ;;  %v4194_v35 = vld [vmem:[%s5236_s16 + $0x30] sm:$0xff]  }
 0x7ab   : > { %v2100_v44 = vadd.f32 %v5170_v41, %v2078_v53 }
 0x7ac   : > { %v2099_v36 = vadd.f32 %v5170_v41, %v2077_v31  ;;  %v4195_v41 = vld [vmem:[%s5236_s16 + $0x68] sm:$0xff]   ;;  %v4206_v31 = vld [vmem:[%s5236_s16] sm:$0xff]  }
 0x7ad   : > { %3736 = vmatmul.mubr.msk.bf16.gmra.mxu0 %vm507_vm1, %v2106_v12 }
 0x7ae   : > { %2288 = vmatprep.mubr.bf16.mxu0 %v4431_v34  ;;  %v2108_v61 = vpack.c.bf16 %v2100_v44, %v2099_v36 }
 0x7b5   : > { %3737 = vmatmul.mubr.msk.bf16.gmra.mxu0 %vm507_vm1, %v2107_v18 }
 0x7b6   : > { %2298 = vmatprep.mubr.bf16.mxu0 %v4431_v34  ;;  %v4191_v34 = vld [vmem:[%s5236_s16 + $0x78] sm:$0xff]  }
 0x7b7   : > { %3888 = vmatprep.subr.bf16.mxu0 %v4191_v34  ;;  %4016 = vmatprep.subr.bf16.mxu1 %v4191_v34 }
 0x7b8   : > { %3889 = vmatpush3.bf16.msra.mxu0 %v4192_v37  ;;  %4024 = vmatpush3.bf16.msra.mxu1 %v4192_v37 }
 0x7b9   : > { %3890 = vmatprep.subr.bf16.mxu0 %v4193_v5  ;;  %4017 = vmatprep.subr.bf16.mxu1 %v4193_v5 }
 0x7bc   : > { %3891 = vmatpush3.bf16.msra.mxu0 %v4194_v35  ;;  %4025 = vmatpush3.bf16.msra.mxu1 %v4194_v35 }
 0x7bd   : > { %3738 = vmatmul.mubr.msk.bf16.gmra.mxu0 %vm507_vm1, %v2108_v61  ;;  %3892 = vmatprep.subr.bf16.mxu0 %v4195_v41 }
 0x7be   : > { %4018 = vmatprep.subr.bf16.mxu1 %v4195_v41 }
 0x7c0   : > { %3893 = vmatpush3.bf16.msra.mxu0 %v4196_v26  ;;  %4026 = vmatpush3.bf16.msra.mxu1 %v4196_v26 }
 0x7c1   : > { %3894 = vmatprep.subr.bf16.mxu0 %v4197_v21  ;;  %4019 = vmatprep.subr.bf16.mxu1 %v4197_v21 }
 0x7c4   : > { %3895 = vmatpush3.bf16.msra.mxu0 %v4198_v33  ;;  %4027 = vmatpush3.bf16.msra.mxu1 %v4198_v33 }
 0x7c5   : > { %3896 = vmatprep.subr.bf16.mxu0 %v4199_v23  ;;  %4020 = vmatprep.subr.bf16.mxu1 %v4199_v23 }
 0x7c8   : > { %3897 = vmatpush3.bf16.msra.mxu0 %v4200_v24  ;;  %4028 = vmatpush3.bf16.msra.mxu1 %v4200_v24 }
 0x7c9   : > { %3898 = vmatprep.subr.bf16.mxu0 %v4201_v28  ;;  %4021 = vmatprep.subr.bf16.mxu1 %v4201_v28 }
 0x7cc   : > { %3899 = vmatpush3.bf16.msra.mxu0 %v4202_v51  ;;  %4029 = vmatpush3.bf16.msra.mxu1 %v4202_v51 }
 0x7cd   : > { %3900 = vmatprep.subr.bf16.mxu0 %v4203_v47  ;;  %4022 = vmatprep.subr.bf16.mxu1 %v4203_v47 }
 0x7d0   : > { %3901 = vmatpush3.bf16.msra.mxu0 %v4204_v49  ;;  %4030 = vmatpush3.bf16.msra.mxu1 %v4204_v49 }
 0x7d1   : > { %3902 = vmatprep.subr.bf16.mxu0 %v4205_v63  ;;  %4023 = vmatprep.subr.bf16.mxu1 %v4205_v63 }
 0x7d4   : > { %3903 = vmatpush3.bf16.msra.mxu0 %v4206_v31  ;;  %4031 = vmatpush3.bf16.msra.mxu1 %v4206_v31 }
 0x844   : > { %v2230_v1 = vpop.f32.mrf.mxu0 }
 0x845   : > { %v5264_v39 = vadd.f32 %v2230_v1, %v5257_v19 }
 0x846   : > { %v2232_v50 = vpop.f32.mrf.mxu0 }
 0x847   : > { %v5267_v30 = vadd.f32 %v2232_v50, %v5261_v29  ;;  %v5273_v9 = vmul.f32 0.70710677, %v5264_v39  ;;  %v5365_v49 = vmul.f32 0.5, %v5264_v39 }
 0x848   : > { %v2234_v7 = vpop.f32.mrf.mxu0 }
 0x849   : > { %v5270_v38 = vadd.f32 %v2234_v7, %v5257_v19  ;;  %v5277_v59 = vmul.f32 0.70710677, %v5267_v30  ;;  %v2373_v11 = vand.u32 2147483647, %v5273_v9  ;;  %vm2981_vm4 = vcmp.ge.f32.partialorder %v5273_v9, 0.0 }
 0x84a   : > { %v2236_v48 = vpop.f32.mrf.mxu0 }
 0x84b   : > { %v5280_v42 = vmul.f32 0.70710677, %v5270_v38  ;;  %v5283_v13 = vadd.f32 %v2236_v48, %v5261_v29  ;;  %v5287_v22 = vand.u32 2147483647, %v5277_v59  ;;  %v2405_v4 = vmul.f32 0.3275911, %v2373_v11 }
 0x84c   : > { %v2240_v20 = vpop.f32.mrf.mxu0  ;;  %v2789_v35 = vsub.f32 0.0, %v2373_v11  ;;  %vm2982_vm5 = vcmp.ge.f32.partialorder %v5277_v59, 0.0 }
 0x84d   : > { %v5290_v43 = vand.u32 2147483647, %v5280_v42  ;;  %v5293_v25 = vmul.f32 0.70710677, %v5283_v13  ;;  %v5296_v46 = vadd.f32 %v2240_v20, %v5257_v19  ;;  %v2406_v6 = vmul.f32 0.3275911, %v5287_v22 }
 0x84e   : > { %v2242_v45 = vpop.f32.mrf.mxu0  ;;  %v2437_v55 = vadd.f32 1.0, %v2405_v4  ;;  %v2790_v1 = vsub.f32 0.0, %v5287_v22  ;;  %v2821_v28 = vmul.f32 %v2789_v35, %v2373_v11  ;;  %v5368_v11 = vmul.f32 0.5, %v5267_v30 }
 0x84f   : > { %v2407_v52 = vmul.f32 0.3275911, %v5290_v43  ;;  %v5302_v54 = vand.u32 2147483647, %v5293_v25  ;;  %v5305_v58 = vmul.f32 0.70710677, %v5296_v46  ;;  %v2243_v51 = vadd.f32 %v2242_v45, %v5261_v29 }
 0x850   : > { %v2244_v32 = vpop.f32.mrf.mxu0  ;;  %v2438_v16 = vadd.f32 1.0, %v2406_v6  ;;  %4239 = vrcp.f32 %v2437_v55  ;;  %v2791_v48 = vsub.f32 0.0, %v5290_v43  ;;  %v2853_v55 = vmul.f32 1.442695, %v2821_v28 }
 0x851   : > { %v2439_v56 = vadd.f32 1.0, %v2407_v52  ;;  %v2408_v62 = vmul.f32 0.3275911, %v5302_v54  ;;  %v5311_v15 = vadd.f32 %v2244_v32, %v5257_v19  ;;  %v5314_v27 = vand.u32 2147483647, %v5305_v58 }
 0x852   : > { %v5307_v57 = vpop.f32.mrf.mxu0  ;;  %4241 = vrcp.f32 %v2438_v16  ;;  %v2822_v32 = vmul.f32 %v2790_v1, %v5287_v22  ;;  %v5371_v16 = vmul.f32 0.70710677, %v2243_v51  ;;  %vm2983_vm6 = vcmp.ge.f32.partialorder %v5280_v42, 0.0 }
 0x853   : > { %4243 = vrcp.f32 %v2439_v56  ;;  %v2440_v0 = vadd.f32 1.0, %v2408_v62  ;;  %v5318_v3 = vmul.f32 0.70710677, %v5311_v15  ;;  %v2409_v40 = vmul.f32 0.3275911, %v5314_v27 }
 0x854   : > { %6288 = vst [vmem:[#allocation5_spill] sm:$0xff] %v5371_v16  ;;  %v2823_v62 = vmul.f32 %v2791_v48, %v5290_v43  ;;  %v2793_v31 = vsub.f32 0.0, %v5314_v27  ;;  %v2378_v35 = vand.u32 2147483647, %v5371_v16  ;;  %vm2984_vm7 = vcmp.ge.f32.partialorder %v5293_v25, 0.0 }
 0x855   : > { %v2250_v12 = vpop.f32.mrf.mxu0  ;;  %4245 = vrcp.f32 %v2440_v0  ;;  %v5325_v10 = vand.u32 2147483647, %v5318_v3  ;;  %v2441_v2 = vadd.f32 1.0, %v2409_v40  ;;  %v2855_v0 = vmul.f32 1.442695, %v2822_v32 }
 0x856   : > { %v5322_v8 = vadd.f32 %v2250_v12, %v5257_v19  ;;  %v2792_v12 = vsub.f32 0.0, %v5302_v54  ;;  %v5383_v40 = vmul.f32 0.5, %v5270_v38  ;;  %v2857_v38 = vmul.f32 1.442695, %v2823_v62 }
 0x857   : > { %v2252_v17 = vpop.f32.mrf.mxu0  ;;  %v2411_v44 = vmul.f32 0.3275911, %v5325_v10  ;;  %4247 = vrcp.f32 %v2441_v2  ;;  %v5387_v2 = vmul.f32 0.5, %v5283_v13  ;;  %v2825_v48 = vmul.f32 %v2793_v31, %v5314_v27 }
 0x858   : > { %v5328_v18 = vmul.f32 0.70710677, %v5322_v8  ;;  %v5331_v53 = vadd.f32 %v2252_v17, %v5261_v29  ;;  %v2795_v62 = vsub.f32 0.0, %v5325_v10  ;;  %vm2985_vm8 = vcmp.ge.f32.partialorder %v5305_v58, 0.0 }
 0x859   : > { %v2443_v41 = vadd.f32 1.0, %v2411_v44  ;;  %v2254_v33 = vpop.f32.mrf.mxu0  ;;  %vm2987_vm9 = vcmp.ge.f32.partialorder %v5318_v3, 0.0 }
 0x85a   : > { %v5336_v36 = vand.u32 2147483647, %v5328_v18  ;;  %v5339_v61 = vmul.f32 0.70710677, %v5331_v53  ;;  %v5359_v7 = vadd.f32 %v2254_v33, %v5257_v19  ;;  %v2824_v33 = vmul.f32 %v2792_v12, %v5302_v54 }
 0x85b   : > { %4249 = vrcp.f32 %v2443_v41  ;;  %v2256_v44 = vpop.f32.mrf.mxu0  ;;  %v2247_v41 = vadd.f32 %v5307_v57, %v5261_v29  ;;  %v5403_v57 = vmul.f32 0.5, %v5296_v46  ;;  %v2794_v54 = vsub.f32 0.0, %v2378_v35 }
 0x85c   : > { %v2413_v26 = vmul.f32 0.3275911, %v5336_v36  ;;  %v5349_v21 = vand.u32 2147483647, %v5339_v61  ;;  %v5374_v56 = vmul.f32 0.70710677, %v5359_v7  ;;  %v5399_v1 = vadd.f32 %v2256_v44, %v5261_v29 }
 0x85d   : > { %v5341_v34 = vpop.eup %4239  ;;  %v2859_v32 = vmul.f32 1.442695, %v2824_v33  ;;  %v5426_v33 = vmul.f32 0.5, %v2247_v41  ;;  %vm2989_vm10 = vcmp.ge.f32.partialorder %v5328_v18, 0.0  ;;  %vm2990_vm11 = vcmp.ge.f32.partialorder %v5339_v61, 0.0 }
 0x85e   : > { %v2501_v23 = vmul.f32 1.0614054, %v5341_v34  ;;  %v2445_v47 = vadd.f32 1.0, %v2413_v26  ;;  %v2414_v20 = vmul.f32 0.3275911, %v5349_v21  ;;  %6289 = vst [vmem:[#allocation6_spill] sm:$0xff] %v5374_v56 }
 0x85f   : > { %v5343_v37 = vpop.eup %4241  ;;  %v5394_v26 = vand.u32 2147483647, %v5374_v56  ;;  %v5417_v27 = vmul.f32 0.70710677, %v5399_v1  ;;  %6293 = vst [vmem:[#allocation10_spill] sm:$0xff] %v5426_v33 }
 0x860   : > { %v5345_v5 = vpop.eup %4243  ;;  %v2502_v24 = vmul.f32 1.0614054, %v5343_v37  ;;  %v2533_v4 = vadd.f32 -1.4531521, %v2501_v23  ;;  %4251 = vrcp.f32 %v2445_v47  ;;  %v2446_v22 = vadd.f32 1.0, %v2414_v20 }
 0x861   : > { %v2503_v60 = vmul.f32 1.0614054, %v5345_v5  ;;  %4253 = vpow2.f32 %v2853_v55  ;;  %v5406_v47 = vmul.f32 0.5, %v2243_v51  ;;  %v5408_v20 = vmul.f32 0.70710677, %v2247_v41  ;;  %6292 = vst [vmem:[#allocation9_spill] sm:$0xff] %v5417_v27  ;;  %v2260_v51 = vpop.f32.mrf.mxu0 }
 0x862   : > { %v5355_v50 = vpop.eup %4245  ;;  %v2534_v6 = vadd.f32 -1.4531521, %v2502_v24  ;;  %v2565_v30 = vmul.f32 %v5341_v34, %v2533_v4  ;;  %4255 = vrcp.f32 %v2446_v22  ;;  %v2415_v4 = vmul.f32 0.3275911, %v5394_v26 }
 0x863   : > { %v2535_v45 = vadd.f32 -1.4531521, %v2503_v60  ;;  %v2504_v52 = vmul.f32 1.0614054, %v5355_v50  ;;  %4257 = vpow2.f32 %v2855_v0  ;;  %6290 = vst [vmem:[#allocation7_spill] sm:$0xff] %v5406_v47  ;;  %6291 = vst [vmem:[#allocation8_spill] sm:$0xff] %v5408_v20  ;;  %v2826_v0 = vmul.f32 %v2794_v54, %v2378_v35 }
 0x864   : > { %v5378_v39 = vpop.eup %4247  ;;  %v2566_v63 = vmul.f32 %v5343_v37, %v2534_v6  ;;  %v2597_v13 = vadd.f32 1.4214138, %v2565_v30  ;;  %4259 = vpow2.f32 %v2857_v38  ;;  %v2861_v30 = vmul.f32 1.442695, %v2825_v48 }
 0x865   : > { %v2567_v17 = vmul.f32 %v5345_v5, %v2535_v45  ;;  %v2536_v43 = vadd.f32 -1.4531521, %v2504_v52  ;;  %v2505_v23 = vmul.f32 1.0614054, %v5378_v39  ;;  %v2410_v52 = vmul.f32 0.3275911, %v2378_v35  ;;  %v2262_v35 = vpop.f32.mrf.mxu0 }
 0x866   : > { %v2598_v24 = vadd.f32 1.4214138, %v2566_v63  ;;  %v2629_v55 = vmul.f32 %v5341_v34, %v2597_v13  ;;  %v5421_v63 = vmul.f32 0.5, %v5311_v15  ;;  %v2447_v31 = vadd.f32 1.0, %v2415_v4 }
 0x867   : > { %v2599_v60 = vadd.f32 1.4214138, %v2567_v17  ;;  %v2568_v28 = vmul.f32 %v5355_v50, %v2536_v43  ;;  %v2537_v45 = vadd.f32 -1.4531521, %v2505_v23  ;;  %v2380_v43 = vand.u32 2147483647, %v5408_v20 }
 0x868   : > { %v5411_v6 = vpop.eup %4249  ;;  %v2630_v46 = vmul.f32 %v5343_v37, %v2598_v24  ;;  %4261 = vpow2.f32 %v2859_v32  ;;  %v2442_v38 = vadd.f32 1.0, %v2410_v52  ;;  %v2661_v13 = vadd.f32 -0.28449672, %v2629_v55 }
 0x869   : > { %v2631_v12 = vmul.f32 %v5345_v5, %v2599_v60  ;;  %v2600_v22 = vadd.f32 1.4214138, %v2568_v28  ;;  %v2507_v17 = vmul.f32 1.0614054, %v5411_v6  ;;  %v2569_v44 = vmul.f32 %v5378_v39, %v2537_v45 }
 0x86a   : > { %v2662_v24 = vadd.f32 -0.28449672, %v2630_v46  ;;  %v2827_v60 = vmul.f32 %v2795_v62, %v5325_v10  ;;  %v5432_v15 = vand.u32 2147483647, %v5417_v27  ;;  %4263 = vpow2.f32 %v2861_v30  ;;  %v2264_v30 = vpop.f32.mrf.mxu0 }
 0x86b   : > { %v2663_v28 = vadd.f32 -0.28449672, %v2631_v12  ;;  %v2632_v48 = vmul.f32 %v5355_v50, %v2600_v22  ;;  %v5436_v54 = vadd.f32 %v2260_v51, %v5257_v19  ;;  %v2863_v4 = vmul.f32 1.442695, %v2826_v0 }
 0x86c   : > { %v2539_v41 = vadd.f32 -1.4531521, %v2507_v17  ;;  %v2412_v32 = vmul.f32 0.3275911, %v2380_v43  ;;  %4265 = vrcp.f32 %v2447_v31  ;;  %v2601_v52 = vadd.f32 1.4214138, %v2569_v44 }
 0x86d   : > { %v5428_v23 = vpop.eup %4251  ;;  %4267 = vrcp.f32 %v2442_v38  ;;  %v5441_v10 = vmul.f32 0.5, %v5322_v8  ;;  %v2693_v62 = vmul.f32 %v5341_v34, %v2661_v13  ;;  %v2694_v51 = vmul.f32 %v5343_v37, %v2662_v24 }
 0x86e   : > { %v5438_v45 = vpop.eup %4253  ;;  %v2509_v55 = vmul.f32 1.0614054, %v5428_v23  ;;  %v2865_v12 = vmul.f32 1.442695, %v2827_v60  ;;  %v2416_v22 = vmul.f32 0.3275911, %v5432_v15  ;;  %v2695_v17 = vmul.f32 %v5345_v5, %v2663_v28 }
 0x86f   : > { %6294 = vst [vmem:[#allocation11_spill] sm:$0xff] %v5441_v10  ;;  %v5444_v46 = vpop.eup %4255  ;;  %v2664_v31 = vadd.f32 -0.28449672, %v2632_v48  ;;  %v5451_v44 = vmul.f32 0.70710677, %v5436_v54  ;;  %v5454_v8 = vadd.f32 %v2262_v35, %v5261_v29  ;;  %4269 = vpow2.f32 %v2863_v4 }
 0x870   : > { %v4258_v0 = vpop.eup %4257  ;;  %v2571_v38 = vmul.f32 %v5411_v6, %v2539_v41  ;;  %v2444_v13 = vadd.f32 1.0, %v2412_v32  ;;  %v2796_v14 = vsub.f32 0.0, %v2380_v43  ;;  %v2633_v24 = vmul.f32 %v5378_v39, %v2601_v52  ;;  %v2266_v52 = vpop.f32.mrf.mxu0 }
 0x871   : > { %6295 = vst [vmem:[#allocation12_spill] sm:$0xff] %v5451_v44  ;;  %v2541_v60 = vadd.f32 -1.4531521, %v2509_v55  ;;  %v2510_v33 = vmul.f32 1.0614054, %v5444_v46  ;;  %v5460_v47 = vadd.f32 %v2264_v30, %v5257_v19  ;;  %v4260_v28 = vpop.eup %4259  ;;  %4271 = vpow2.f32 %v2865_v12 }
 0x872   : > { %v2725_v48 = vadd.f32 0.2548296, %v2693_v62  ;;  %v2726_v20 = vadd.f32 0.2548296, %v2694_v51  ;;  %v2448_v16 = vadd.f32 1.0, %v2416_v22  ;;  %v2696_v4 = vmul.f32 %v5355_v50, %v2664_v31 }
 0x873   : > { %6296 = vst [vmem:[#allocation13_spill] sm:$0xff] %v5460_v47  ;;  %v2727_v35 = vadd.f32 0.2548296, %v2695_v17  ;;  %v5464_v41 = vand.u32 2147483647, %v5451_v44  ;;  %4273 = vrcp.f32 %v2444_v13  ;;  %v2828_v27 = vmul.f32 %v2796_v14, %v2380_v43 }
 0x874   : > { %v5467_v32 = vmul.f32 0.70710677, %v5454_v8  ;;  %v2603_v55 = vadd.f32 1.4214138, %v2571_v38  ;;  %v2797_v30 = vsub.f32 0.0, %v5336_v36  ;;  %v2573_v62 = vmul.f32 %v5428_v23, %v2541_v60 }
 0x875   : > { %v2665_v10 = vadd.f32 -0.28449672, %v2633_v24  ;;  %v2542_v51 = vadd.f32 -1.4531521, %v2510_v33  ;;  %v5472_v12 = vmul.f32 0.70710677, %v5460_v47  ;;  %v4262_v22 = vpop.eup %4261  ;;  %v2757_v17 = vmul.f32 %v5341_v34, %v2725_v48  ;;  %v2270_v33 = vpop.f32.mrf.mxu0 }
 0x876   : > { %6297 = vst [vmem:[#allocation14_spill] sm:$0xff] %v5467_v32  ;;  %v2758_v31 = vmul.f32 %v5343_v37, %v2726_v20  ;;  %4275 = vrcp.f32 %v2448_v16  ;;  %v5477_v44 = vadd.f32 %v2266_v52, %v5261_v29  ;;  %v2759_v14 = vmul.f32 %v5345_v5, %v2727_v35 }
 0x877   : > { %6298 = vst [vmem:[#allocation15_spill] sm:$0xff] %v5472_v12  ;;  %v2728_v43 = vadd.f32 0.2548296, %v2696_v4  ;;  %v2417_v38 = vmul.f32 0.3275911, %v5464_v41  ;;  %v5484_v24 = vpop.eup %4263  ;;  %v2635_v60 = vmul.f32 %v5411_v6, %v2603_v55  ;;  %v2829_v37 = vmul.f32 %v2797_v30, %v5336_v36 }
 0x878   : > { %6299 = vst [vmem:[#allocation16_spill] sm:$0xff] %v5477_v44  ;;  %v5482_v13 = vand.u32 2147483647, %v5467_v32  ;;  %v5487_v34 = vmul.f32 1.442695, %v2828_v27  ;;  %v2798_v16 = vsub.f32 0.0, %v5349_v21  ;;  %v2697_v5 = vmul.f32 %v5378_v39, %v2665_v10 }
 0x879   : > { %v5491_v20 = vpop.eup %4265  ;;  %v2605_v48 = vadd.f32 1.4214138, %v2573_v62  ;;  %v2574_v35 = vmul.f32 %v5444_v46, %v2542_v51  ;;  %v5496_v4 = vand.u32 2147483647, %v5472_v12  ;;  %v5501_v55 = vmul.f32 %v5438_v45, %v2757_v17 }
 0x87a   : > { %v5498_v52 = vpop.eup %4267  ;;  %v5503_v27 = vmul.f32 %v4258_v0, %v2758_v31  ;;  %v5506_v36 = vmul.f32 0.70710677, %v5477_v44  ;;  %v5509_v30 = vadd.f32 %v2270_v33, %v5257_v19  ;;  %v5511_v10 = vmul.f32 %v4260_v28, %v2759_v14  ;;  %v2272_v14 = vpop.f32.mrf.mxu0 }
 0x87b   : > { %6300 = vst [vmem:[#allocation17_spill] sm:$0xff] %v5498_v52  ;;  %v2760_v62 = vmul.f32 %v5355_v50, %v2728_v43  ;;  %v2449_v51 = vadd.f32 1.0, %v2417_v38  ;;  %v2418_v12 = vmul.f32 0.3275911, %v5482_v13  ;;  %v2667_v32 = vadd.f32 -0.28449672, %v2635_v60 }
 0x87c   : > { %6301 = vst [vmem:[#allocation18_spill] sm:$0xff] %v5506_v36  ;;  %6302 = vst [vmem:[#allocation19_spill] sm:$0xff] %v5509_v30  ;;  %v2869_v52 = vmul.f32 1.442695, %v2829_v37  ;;  %v2830_v45 = vmul.f32 %v2798_v16, %v5349_v21  ;;  %v2511_v0 = vmul.f32 1.0614054, %v5491_v20  ;;  %v5517_v17 = vpop.eup %4269  ;;  %v2637_v44 = vmul.f32 %v5428_v23, %v2605_v48 }
 0x87d   : > { %6303 = vst [vmem:[#allocation20_spill] sm:$0xff] %v5517_v17  ;;  %v2729_v31 = vadd.f32 0.2548296, %v2697_v5  ;;  %v2606_v33 = vadd.f32 1.4214138, %v2574_v35  ;;  %v2949_v50 = vsub.f32 1.0, %v5501_v55  ;;  %v5533_v16 = vmul.f32 %v4262_v22, %v2760_v62 }
 0x87e   : > { %v2419_v28 = vmul.f32 0.3275911, %v5496_v4  ;;  %v2950_v43 = vsub.f32 1.0, %v5503_v27  ;;  %v5526_v21 = vand.u32 2147483647, %v5506_v36  ;;  %v4272_v60 = vpop.eup %4271  ;;  %v2951_v37 = vsub.f32 1.0, %v5511_v10 }
 0x87f   : > { %v5529_v38 = vmul.f32 0.70710677, %v5509_v30  ;;  %4277 = vrcp.f32 %v2449_v51  ;;  %v2450_v5 = vadd.f32 1.0, %v2418_v12  ;;  %v2699_v48 = vmul.f32 %v5411_v6, %v2667_v32 }
 0x880   : > { %v2871_v35 = vmul.f32 1.442695, %v2830_v45  ;;  %v2543_v55 = vadd.f32 -1.4531521, %v2511_v0  ;;  %v5537_v27 = vadd.f32 %v2272_v14, %v5261_v29  ;;  %v5539_v17 = vpop.eup %4273  ;;  %v2761_v36 = vmul.f32 %v5378_v39, %v2729_v31  ;;  %v2274_v14 = vpop.f32.mrf.mxu0 }
 0x881   : > { %6304 = vst [vmem:[#allocation21_spill] sm:$0xff] %v5539_v17  ;;  %v2669_v30 = vadd.f32 -0.28449672, %v2637_v44  ;;  %v2638_v10 = vmul.f32 %v5444_v46, %v2606_v33  ;;  %v2451_v47 = vadd.f32 1.0, %v2419_v28  ;;  %v3013_v56 = vsub.f32 0.0, %v2949_v50 }
 0x882   : > { %4279 = vpow2.f32 %v2869_v52  ;;  %v2420_v22 = vmul.f32 0.3275911, %v5526_v21  ;;  %v5545_v12 = vand.u32 2147483647, %v5529_v38  ;;  %v3014_v62 = vsub.f32 0.0, %v2950_v43 }
 0x883   : > { %v5547_v32 = vpop.eup %4275  ;;  %v3015_v51 = vsub.f32 0.0, %v2951_v37  ;;  %v2952_v45 = vsub.f32 1.0, %v5533_v16  ;;  %4281 = vrcp.f32 %v2450_v5  ;;  %v2731_v39 = vadd.f32 0.2548296, %v2699_v48 }
 0x884   : > { %v2575_v44 = vmul.f32 %v5491_v20, %v2543_v55  ;;  %v2799_v0 = vsub.f32 0.0, %v5394_v26  ;;  %v5554_v52 = vmul.f32 0.70710677, %v5537_v27  ;;  %v2921_v31 = vmul.f32 %v5484_v24, %v2761_v36 }
 0x885   : > { %v2701_v33 = vmul.f32 %v5428_v23, %v2669_v30  ;;  %v2670_v28 = vadd.f32 -0.28449672, %v2638_v10  ;;  %4283 = vrcp.f32 %v2451_v47  ;;  %v2512_v16 = vmul.f32 1.0614054, %v5547_v32 }
 0x886   : > { %4285 = vpow2.f32 %v5487_v34  ;;  %v2452_v5 = vadd.f32 1.0, %v2420_v22  ;;  %v2421_v48 = vmul.f32 0.3275911, %v5545_v12  ;;  %v3045_v55 = vsel %vm2981_vm4, %v2949_v50, %v3013_v56  ;;  %v2276_v56 = vpop.f32.mrf.mxu0 }
 0x887   : > { %v3046_v17 = vsel %vm2982_vm5, %v2950_v43, %v3014_v62  ;;  %v5566_v24 = vmul.f32 0.5, %v5331_v53  ;;  %4287 = vpow2.f32 %v2871_v35  ;;  %v3047_v47 = vsel %vm2983_vm6, %v2951_v37, %v3015_v51 }
 0x888   : > { %v2763_v34 = vmul.f32 %v5411_v6, %v2731_v39  ;;  %v2607_v36 = vadd.f32 1.4214138, %v2575_v44  ;;  %v5572_v30 = vand.u32 2147483647, %v5554_v52  ;;  %v3016_v10 = vsub.f32 0.0, %v2952_v45 }
 0x889   : > { %v2953_v22 = vsub.f32 1.0, %v2921_v31  ;;  %v2733_v9 = vadd.f32 0.2548296, %v2701_v33  ;;  %v2831_v59 = vmul.f32 %v2799_v0, %v5394_v26  ;;  %v2702_v53 = vmul.f32 %v5444_v46, %v2670_v28 }
 0x88a   : > { %v2544_v50 = vadd.f32 -1.4531521, %v2512_v16  ;;  %4289 = vrcp.f32 %v2452_v5  ;;  %v2453_v42 = vadd.f32 1.0, %v2421_v48  ;;  %v3077_v43 = vadd.f32 1.0, %v3045_v55 }
 0x88b   : > { %v3078_v37 = vadd.f32 1.0, %v3046_v17  ;;  %v5578_v6 = vmul.f32 0.5, %v5359_v7  ;;  %v5581_v35 = vadd.f32 %v2274_v14, %v5257_v19  ;;  %v2923_v51 = vmul.f32 %v4272_v60, %v2763_v34 }
 0x88c   : > { %v5583_v62 = vpop.eup %4277  ;;  %v2639_v39 = vmul.f32 %v5491_v20, %v2607_v36  ;;  %v2422_v26 = vmul.f32 0.3275911, %v5572_v30  ;;  %v5588_v44 = vadd.f32 %v2276_v56, %v5261_v29  ;;  %v3079_v0 = vadd.f32 1.0, %v3047_v47 }
 0x88d   : > { %v3048_v17 = vsel %vm2984_vm7, %v2952_v45, %v3016_v10  ;;  %v3017_v31 = vsub.f32 0.0, %v2953_v22  ;;  %v2765_v7 = vmul.f32 %v5428_v23, %v2733_v9  ;;  %v2734_v33 = vadd.f32 0.2548296, %v2702_v53 }
 0x88e   : > { %v2873_v28 = vmul.f32 1.442695, %v2831_v59  ;;  %v2576_v14 = vmul.f32 %v5547_v32, %v2544_v50  ;;  %4291 = vrcp.f32 %v2453_v42  ;;  %v5595_v16 = vmul.f32 %v3077_v43, %v5365_v49 }
 0x88f   : > { %v4280_v60 = vpop.eup %4279  ;;  %v2800_v5 = vsub.f32 0.0, %v5432_v15  ;;  %v2513_v48 = vmul.f32 1.0614054, %v5583_v62  ;;  %v5601_v25 = vmul.f32 0.70710677, %v5581_v35  ;;  %v2955_v23 = vsub.f32 1.0, %v2923_v51 }
 0x890   : > { %v5603_v45 = vpop.eup %4281  ;;  %v2671_v55 = vadd.f32 -0.28449672, %v2639_v39  ;;  %v2454_v47 = vadd.f32 1.0, %v2422_v26  ;;  %v5606_v34 = vmul.f32 0.70710677, %v5588_v44  ;;  %v5609_v49 = vmul.f32 %v3078_v37, %v5368_v11 }
 0x891   : > { %6305 = vst [vmem:[#allocation22_spill] sm:$0xff] %v5601_v25  ;;  %v5612_v36 = vmul.f32 %v3079_v0, %v5383_v40  ;;  %v3080_v10 = vadd.f32 1.0, %v3048_v17  ;;  %v2925_v9 = vmul.f32 %v4280_v60, %v2765_v7  ;;  %v3049_v56 = vsel %vm2985_vm8, %v2953_v22, %v3017_v31 }
 0x892   : > { %v5614_v59 = vpop.eup %4283  ;;  %v2766_v53 = vmul.f32 %v5444_v46, %v2734_v33  ;;  %4293 = vpow2.f32 %v2873_v28  ;;  %v2608_v50 = vadd.f32 1.4214138, %v2576_v14  ;;  %v2832_v43 = vmul.f32 %v2800_v5, %v5432_v15 }
 0x893   : > { %v5619_v42 = vpop.eup %4285  ;;  %v2545_v11 = vadd.f32 -1.4531521, %v2513_v48  ;;  %v2514_v37 = vmul.f32 1.0614054, %v5603_v45  ;;  %v5624_v40 = vand.u32 2147483647, %v5601_v25  ;;  %v2703_v58 = vmul.f32 %v5491_v20, %v2671_v55 }
 0x894   : > { %v4288_v51 = vpop.eup %4287  ;;  %v3019_v39 = vsub.f32 0.0, %v2955_v23  ;;  %4295 = vrcp.f32 %v2454_v47  ;;  %v5629_v46 = vand.u32 2147483647, %v5606_v34  ;;  %v2957_v22 = vsub.f32 1.0, %v2925_v9 }
 0x895   : > { %v5632_v26 = vmul.f32 0.5, %v5399_v1  ;;  %v2801_v15 = vsub.f32 0.0, %v5464_v41  ;;  %v2515_v0 = vmul.f32 1.0614054, %v5614_v59  ;;  %v3081_v31 = vadd.f32 1.0, %v3049_v56 }
 0x896   : > { %v2926_v7 = vmul.f32 %v4288_v51, %v2766_v53  ;;  %v2640_v33 = vmul.f32 %v5547_v32, %v2608_v50  ;;  %v5642_v14 = vmul.f32 %v3080_v10, %v5387_v2  ;;  %v2577_v60 = vmul.f32 %v5583_v62, %v2545_v11 }
 0x897   : > { %v5639_v28 = vpop.eup %4289  ;;  %v2546_v1 = vadd.f32 -1.4531521, %v2514_v37  ;;  %v2423_v5 = vmul.f32 0.3275911, %v5624_v40  ;;  %v3051_v48 = vsel %vm2987_vm9, %v2955_v23, %v3019_v39  ;;  %v2735_v55 = vadd.f32 0.2548296, %v2703_v58 }
 0x898   : > { %v2875_v47 = vmul.f32 1.442695, %v2832_v43  ;;  %v2424_v9 = vmul.f32 0.3275911, %v5629_v46  ;;  %v3021_v56 = vsub.f32 0.0, %v2957_v22  ;;  %v2833_v53 = vmul.f32 %v2801_v15, %v5464_v41 }
 0x899   : > { %v2802_v50 = vsub.f32 0.0, %v5482_v13  ;;  %v2547_v51 = vadd.f32 -1.4531521, %v2515_v0  ;;  %v5652_v2 = vmul.f32 %v3081_v31, %v5403_v57  ;;  %v2958_v10 = vsub.f32 1.0, %v2926_v7 }
 0x89a   : > { %v2672_v11 = vadd.f32 -0.28449672, %v2640_v33  ;;  %v2516_v3 = vmul.f32 1.0614054, %v5639_v28  ;;  %v5659_v43 = vmul.f32 0.5, %v5436_v54  ;;  %v2578_v41 = vmul.f32 %v5603_v45, %v2546_v1 }
 0x89b   : > { %v5656_v23 = vpop.eup %4291  ;;  %v2609_v37 = vadd.f32 1.4214138, %v2577_v60  ;;  %v2455_v39 = vadd.f32 1.0, %v2423_v5  ;;  %v3083_v58 = vadd.f32 1.0, %v3051_v48  ;;  %v2767_v15 = vmul.f32 %v5491_v20, %v2735_v55  ;;  %v2280_v5 = vpop.f32.mrf.mxu0 }
 0x89c   : > { %4297 = vpow2.f32 %v2875_v47  ;;  %v2456_v57 = vadd.f32 1.0, %v2424_v9  ;;  %v3053_v0 = vsel %vm2989_vm10, %v2957_v22, %v3021_v56  ;;  %v2877_v31 = vmul.f32 1.442695, %v2833_v53 }
 0x89d   : > { %v2834_v7 = vmul.f32 %v2802_v50, %v5482_v13  ;;  %v2579_v33 = vmul.f32 %v5614_v59, %v2547_v51  ;;  %v3022_v17 = vsub.f32 0.0, %v2958_v10  ;;  %v2704_v54 = vmul.f32 %v5547_v32, %v2672_v11 }
 0x89e   : > { %v2548_v60 = vadd.f32 -1.4531521, %v2516_v3  ;;  %v2517_v1 = vmul.f32 1.0614054, %v5656_v23  ;;  %v2641_v20 = vmul.f32 %v5583_v62, %v2609_v37  ;;  %v2610_v55 = vadd.f32 1.4214138, %v2578_v41  ;;  %v2282_v41 = vpop.f32.mrf.mxu0 }
 0x89f   : > { %v4294_v48 = vpop.eup %4293  ;;  %v2803_v47 = vsub.f32 0.0, %v5496_v4  ;;  %4299 = vrcp.f32 %v2455_v39  ;;  %v5672_v22 = vmul.f32 0.5, %v5454_v8  ;;  %v2804_v13 = vsub.f32 0.0, %v5526_v21  ;;  %v6306_v39 = vld [vmem:[#allocation6_spill] sm:$0xff] }
 0x8a0   : > { %v2927_v18 = vmul.f32 %v4294_v48, %v2767_v15  ;;  %4301 = vrcp.f32 %v2456_v57  ;;  %v5678_v56 = vmul.f32 %v3083_v58, %v5421_v63  ;;  %v3085_v53 = vadd.f32 1.0, %v3053_v0  ;;  %v6307_v0 = vld [vmem:[#allocation13_spill] sm:$0xff] }
 0x8a1   : > { %v5675_v9 = vpop.eup %4295  ;;  %v2879_v50 = vmul.f32 1.442695, %v2834_v7  ;;  %v2611_v51 = vadd.f32 1.4214138, %v2579_v33  ;;  %v2736_v11 = vadd.f32 0.2548296, %v2704_v54  ;;  %4303 = vpow2.f32 %v2877_v31 }
 0x8a2   : > { %v2580_v3 = vmul.f32 %v5639_v28, %v2548_v60  ;;  %v2549_v37 = vadd.f32 -1.4531521, %v2517_v1  ;;  %v3054_v8 = vsel %vm2990_vm11, %v2958_v10, %v3022_v17  ;;  %vm2991_vm12 = vcmp.ge.f32.partialorder %v6306_v39, 0.0  ;;  %v6308_v54 = vld [vmem:[#allocation11_spill] sm:$0xff] }
 0x8a3   : > { %v2673_v15 = vadd.f32 -0.28449672, %v2641_v20  ;;  %v2642_v57 = vmul.f32 %v5603_v45, %v2610_v55  ;;  %v2835_v63 = vmul.f32 %v2803_v47, %v5496_v4  ;;  %v2959_v58 = vsub.f32 1.0, %v2927_v18  ;;  %v2284_v20 = vpop.f32.mrf.mxu0 }
 0x8a4   : > { %v5687_v7 = vmul.f32 0.5, %v6307_v0  ;;  %v2836_v31 = vmul.f32 %v2804_v13, %v5526_v21  ;;  %v2518_v33 = vmul.f32 1.0614054, %v5675_v9  ;;  %v5692_v60 = vmul.f32 %v3085_v53, %v6308_v54  ;;  %v6310_v53 = vld [vmem:[#allocation16_spill] sm:$0xff] }
 0x8a5   : > { %4305 = vpow2.f32 %v2879_v50  ;;  %v2643_v61 = vmul.f32 %v5614_v59, %v2611_v51  ;;  %v2805_v17 = vsub.f32 0.0, %v5545_v12  ;;  %v3086_v10 = vadd.f32 1.0, %v3054_v8 }
 0x8a6   : > { %6309 = vst [vmem:[#allocation6_spill] sm:$0xff] %v5692_v60  ;;  %v2768_v1 = vmul.f32 %v5547_v32, %v2736_v11  ;;  %v2612_v4 = vadd.f32 1.4214138, %v2580_v3  ;;  %v2581_v48 = vmul.f32 %v5656_v23, %v2549_v37  ;;  %v2705_v55 = vmul.f32 %v5583_v62, %v2673_v15  ;;  %v6311_v60 = vld [vmem:[#allocation19_spill] sm:$0xff] }
 0x8a7   : > { %v2674_v21 = vadd.f32 -0.28449672, %v2642_v57  ;;  %v2881_v47 = vmul.f32 1.442695, %v2835_v63  ;;  %v2806_v18 = vsub.f32 0.0, %v5572_v30  ;;  %v3023_v13 = vsub.f32 0.0, %v2959_v58 }
 0x8a8   : > { %v5701_v50 = vmul.f32 0.5, %v6310_v53  ;;  %v2883_v51 = vmul.f32 1.442695, %v2836_v31  ;;  %v2550_v0 = vadd.f32 -1.4531521, %v2518_v33  ;;  %v5704_v32 = vmul.f32 0.5, %v6311_v60  ;;  %v2286_v53 = vpop.f32.mrf.mxu0 }
 0x8a9   : > { %v4298_v54 = vpop.eup %4297  ;;  %v2675_v8 = vadd.f32 -0.28449672, %v2643_v61  ;;  %v2837_v11 = vmul.f32 %v2805_v17, %v5545_v12  ;;  %v5708_v3 = vadd.f32 %v2280_v5, %v5257_v19  ;;  %v5711_v37 = vmul.f32 %v3086_v10, %v5566_v24  ;;  %v6314_v10 = vld [vmem:[#allocation9_spill] sm:$0xff] }
 0x8aa   : > { %6312 = vst [vmem:[#allocation13_spill] sm:$0xff] %v5704_v32  ;;  %v2928_v15 = vmul.f32 %v4298_v54, %v2768_v1  ;;  %v2644_v57 = vmul.f32 %v5639_v28, %v2612_v4  ;;  %v2613_v63 = vadd.f32 1.4214138, %v2581_v48  ;;  %v2737_v31 = vadd.f32 0.2548296, %v2705_v55 }
 0x8ab   : > { %6313 = vst [vmem:[#allocation11_spill] sm:$0xff] %v5708_v3  ;;  %v2706_v33 = vmul.f32 %v5603_v45, %v2674_v21  ;;  %4307 = vpow2.f32 %v2881_v47  ;;  %v2838_v60 = vmul.f32 %v2806_v18, %v5572_v30  ;;  %v3055_v12 = vsel %vm2991_vm12, %v2959_v58, %v3023_v13  ;;  %v5738_v21 = vpop.f32.mrf.mxu0 }
 0x8ac   : > { %v5716_v61 = vpop.eup %4299  ;;  %4309 = vpow2.f32 %v2883_v51  ;;  %v5721_v24 = vmul.f32 0.5, %v5537_v27  ;;  %v2582_v5 = vmul.f32 %v5675_v9, %v2550_v0  ;;  %vm2992_vm13 = vcmp.ge.f32.partialorder %v6314_v10, 0.0 }
 0x8ad   : > { %v5724_v17 = vpop.eup %4301  ;;  %v2707_v1 = vmul.f32 %v5614_v59, %v2675_v8  ;;  %v2885_v4 = vmul.f32 1.442695, %v2837_v11  ;;  %v5729_v30 = vmul.f32 0.70710677, %v5708_v3  ;;  %v5732_v48 = vadd.f32 %v2282_v41, %v5261_v29 }
 0x8ae   : > { %v2960_v39 = vsub.f32 1.0, %v2928_v15  ;;  %v2676_v58 = vadd.f32 -0.28449672, %v2644_v57  ;;  %v2645_v27 = vmul.f32 %v5656_v23, %v2613_v63  ;;  %v5736_v55 = vmul.f32 0.5, %v5581_v35  ;;  %v4304_v47 = vpop.eup %4303 }
 0x8af   : > { %6315 = vst [vmem:[#allocation16_spill] sm:$0xff] %v5729_v30  ;;  %v3087_v18 = vadd.f32 1.0, %v3055_v12  ;;  %v2769_v13 = vmul.f32 %v5583_v62, %v2737_v31  ;;  %v2738_v51 = vadd.f32 0.2548296, %v2706_v33  ;;  %v2887_v0 = vmul.f32 1.442695, %v2838_v60  ;;  %v2292_v12 = vpop.f32.mrf.mxu0 }
 0x8b0   : > { %6316 = vst [vmem:[#allocation19_spill] sm:$0xff] %v5736_v55  ;;  %v2614_v54 = vadd.f32 1.4214138, %v2582_v5  ;;  %v2519_v8 = vmul.f32 1.0614054, %v5716_v61  ;;  %v5744_v11 = vadd.f32 %v2286_v53, %v5261_v29  ;;  %4311 = vpow2.f32 %v2885_v4 }
 0x8b1   : > { %v2520_v41 = vmul.f32 1.0614054, %v5724_v17  ;;  %v2739_v15 = vadd.f32 0.2548296, %v2707_v1  ;;  %v5747_v35 = vand.u32 2147483647, %v5729_v30  ;;  %v2708_v31 = vmul.f32 %v5639_v28, %v2676_v58 }
 0x8b2   : > { %v5750_v57 = vmul.f32 0.70710677, %v5732_v48  ;;  %v4306_v63 = vpop.eup %4305  ;;  %v3024_v62 = vsub.f32 0.0, %v2960_v39  ;;  %v2677_v33 = vadd.f32 -0.28449672, %v2645_v27  ;;  %v2807_v60 = vsub.f32 0.0, %v5624_v40 }
 0x8b3   : > { %v5755_v5 = vmul.f32 %v3087_v18, %v5578_v6  ;;  %v2929_v53 = vmul.f32 %v4304_v47, %v2769_v13  ;;  %v2770_v1 = vmul.f32 %v5603_v45, %v2738_v51  ;;  %v5759_v4 = vadd.f32 %v2284_v20, %v5257_v19  ;;  %v6321_v20 = vld [vmem:[#allocation12_spill] sm:$0xff]  ;;  %v5775_v51 = vpop.f32.mrf.mxu0 }
 0x8b4   : > { %6317 = vst [vmem:[#allocation9_spill] sm:$0xff] %v5750_v57  ;;  %v2646_v3 = vmul.f32 %v5675_v9, %v2614_v54  ;;  %v2551_v32 = vadd.f32 -1.4531521, %v2519_v8  ;;  %v2552_v55 = vadd.f32 -1.4531521, %v2520_v41  ;;  %v2771_v58 = vmul.f32 %v5614_v59, %v2739_v15 }
 0x8b5   : > { %6318 = vst [vmem:[#allocation23_spill] sm:$0xff] %v5755_v5  ;;  %6319 = vst [vmem:[#allocation24_spill] sm:$0xff] %v5759_v4  ;;  %v5763_v30 = vmul.f32 0.70710677, %v5744_v11  ;;  %4313 = vpow2.f32 %v2887_v0  ;;  %v2425_v27 = vmul.f32 0.3275911, %v5747_v35  ;;  %v3056_v45 = vsel %vm2992_vm13, %v2960_v39, %v3024_v62  ;;  %v2296_v5 = vpop.f32.mrf.mxu0 }
 0x8b6   : > { %v5768_v6 = vand.u32 2147483647, %v5750_v57  ;;  %vm2993_vm14 = vcmp.ge.f32.partialorder %v6321_v20, 0.0  ;;  %v2740_v47 = vadd.f32 0.2548296, %v2708_v31  ;;  %v2709_v18 = vmul.f32 %v5656_v23, %v2677_v33 }
 0x8b7   : > { %6320 = vst [vmem:[#allocation25_spill] sm:$0xff] %v5763_v30  ;;  %v2839_v13 = vmul.f32 %v2807_v60, %v5624_v40  ;;  %v2961_v54 = vsub.f32 1.0, %v2929_v53  ;;  %v2930_v59 = vmul.f32 %v4306_v63, %v2770_v1  ;;  %v2808_v0 = vsub.f32 0.0, %v5629_v46  ;;  %v6324_v1 = vld [vmem:[#allocation14_spill] sm:$0xff] }
 0x8b8   : > { %v5779_v8 = vmul.f32 0.70710677, %v5759_v4  ;;  %v4308_v41 = vpop.eup %4307  ;;  %v2678_v15 = vadd.f32 -0.28449672, %v2646_v3  ;;  %v2583_v10 = vmul.f32 %v5716_v61, %v2551_v32  ;;  %v2584_v39 = vmul.f32 %v5724_v17, %v2552_v55 }
 0x8b9   : > { %v5784_v62 = vand.u32 2147483647, %v5763_v30  ;;  %v4310_v31 = vpop.eup %4309  ;;  %v2931_v40 = vmul.f32 %v4308_v41, %v2771_v58  ;;  %v5787_v33 = vmul.f32 0.5, %v5588_v44  ;;  %v2457_v63 = vadd.f32 1.0, %v2425_v27  ;;  %v6325_v44 = vld [vmem:[#allocation15_spill] sm:$0xff] }
 0x8ba   : > { %6322 = vst [vmem:[#allocation12_spill] sm:$0xff] %v5779_v8  ;;  %v2426_v60 = vmul.f32 0.3275911, %v5768_v6  ;;  %v3088_v53 = vadd.f32 1.0, %v3056_v45  ;;  %vm2994_vm15 = vcmp.ge.f32.partialorder %v6324_v1, 0.0  ;;  %v2772_v3 = vmul.f32 %v5639_v28, %v2740_v47 }
 0x8bb   : > { %6323 = vst [vmem:[#allocation26_spill] sm:$0xff] %v5787_v33  ;;  %v2741_v4 = vadd.f32 0.2548296, %v2709_v18  ;;  %v2889_v32 = vmul.f32 1.442695, %v2839_v13  ;;  %v3025_v55 = vsub.f32 0.0, %v2961_v54  ;;  %v2840_v30 = vmul.f32 %v2808_v0, %v5629_v46 }
 0x8bc   : > { %v2962_v57 = vsub.f32 1.0, %v2930_v59  ;;  %v5794_v58 = vand.u32 2147483647, %v5779_v8  ;;  %vm2995_vm0 = vcmp.ge.f32.partialorder %v6325_v44, 0.0  ;;  %v2710_v27 = vmul.f32 %v5675_v9, %v2678_v15 }
 0x8bd   : > { %v2615_v41 = vadd.f32 1.4214138, %v2583_v10  ;;  %v2616_v45 = vadd.f32 1.4214138, %v2584_v39  ;;  %v2428_v33 = vmul.f32 0.3275911, %v5784_v62  ;;  %4315 = vrcp.f32 %v2457_v63  ;;  %v4312_v18 = vpop.eup %4311 }
 0x8be   : > { %v2963_v25 = vsub.f32 1.0, %v2931_v40  ;;  %v2458_v28 = vadd.f32 1.0, %v2426_v60  ;;  %v5800_v47 = vadd.f32 %v2296_v5, %v5261_v29  ;;  %v2932_v13 = vmul.f32 %v4310_v31, %v2772_v3 }
 0x8bf   : > { %v2773_v46 = vmul.f32 %v5656_v23, %v2741_v4  ;;  %4317 = vpow2.f32 %v2889_v32  ;;  %v5804_v59 = vadd.f32 %v2292_v12, %v5261_v29  ;;  %v5807_v0 = vmul.f32 %v3088_v53, %v5632_v26  ;;  %v5814_v23 = vpop.f32.mrf.mxu0  ;;  %v6328_v12 = vld [vmem:[#allocation18_spill] sm:$0xff] }
 0x8c0   : > { %6326 = vst [vmem:[#allocation14_spill] sm:$0xff] %v5800_v47  ;;  %v3057_v15 = vsel %vm2993_vm14, %v2961_v54, %v3025_v55  ;;  %v3026_v10 = vsub.f32 0.0, %v2962_v57  ;;  %v2427_v39 = vmul.f32 0.3275911, %v5794_v58  ;;  %v2742_v40 = vadd.f32 0.2548296, %v2710_v27 }
 0x8c1   : > { %6327 = vst [vmem:[#allocation15_spill] sm:$0xff] %v5804_v59  ;;  %v2647_v5 = vmul.f32 %v5716_v61, %v2615_v41  ;;  %v2648_v31 = vmul.f32 %v5724_v17, %v2616_v45  ;;  %v2460_v63 = vadd.f32 1.0, %v2428_v33  ;;  %v3027_v4 = vsub.f32 0.0, %v2963_v25 }
 0x8c2   : > { %vm2996_vm2 = vcmp.ge.f32.partialorder %v6328_v12, 0.0  ;;  %v2891_v60 = vmul.f32 1.442695, %v2840_v30  ;;  %4319 = vrcp.f32 %v2458_v28  ;;  %v5818_v26 = vmul.f32 0.70710677, %v5800_v47  ;;  %v4314_v20 = vpop.eup %4313 }
 0x8c3   : > { %v2964_v54 = vsub.f32 1.0, %v2932_v13  ;;  %v2933_v53 = vmul.f32 %v4312_v18, %v2773_v46  ;;  %v2809_v3 = vsub.f32 0.0, %v5747_v35  ;;  %v5822_v32 = vmul.f32 0.70710677, %v5804_v59  ;;  %v2302_v18 = vpop.f32.mrf.mxu0 }
 0x8c4   : > { %6329 = vst [vmem:[#allocation18_spill] sm:$0xff] %v5818_v26  ;;  %v3089_v55 = vadd.f32 1.0, %v3057_v15  ;;  %v3058_v33 = vsel %vm2994_vm15, %v2962_v57, %v3026_v10  ;;  %v2459_v27 = vadd.f32 1.0, %v2427_v39  ;;  %v5828_v30 = vadd.f32 %v5738_v21, %v5257_v19 }
 0x8c5   : > { %6330 = vst [vmem:[#allocation27_spill] sm:$0xff] %v5822_v32  ;;  %v2774_v41 = vmul.f32 %v5675_v9, %v2742_v40  ;;  %v2679_v45 = vadd.f32 -0.28449672, %v2647_v5  ;;  %v2680_v28 = vadd.f32 -0.28449672, %v2648_v31  ;;  %4321 = vrcp.f32 %v2460_v63 }
 0x8c6   : > { %6331 = vst [vmem:[#allocation28_spill] sm:$0xff] %v5828_v30  ;;  %v3059_v13 = vsel %vm2995_vm0, %v2963_v25, %v3027_v4  ;;  %4323 = vpow2.f32 %v2891_v60  ;;  %v5835_v46 = vadd.f32 %v5775_v51, %v5257_v19  ;;  %v5838_v57 = vand.u32 2147483647, %v5818_v26 }
 0x8c7   : > { %v3028_v1 = vsub.f32 0.0, %v2964_v54  ;;  %v2965_v21 = vsub.f32 1.0, %v2933_v53  ;;  %vm2997_vm3 = vcmp.ge.f32.partialorder %v5529_v38, 0.0  ;;  %v2841_v9 = vmul.f32 %v2809_v3, %v5747_v35 }
 0x8c8   : > { %6332 = vst [vmem:[#allocation29_spill] sm:$0xff] %v5835_v46  ;;  %v5843_v15 = vand.u32 2147483647, %v5822_v32  ;;  %v2810_v44 = vsub.f32 0.0, %v5768_v6  ;;  %4325 = vrcp.f32 %v2459_v27  ;;  %v5847_v25 = vmul.f32 0.70710677, %v5828_v30 }
 0x8c9   : > { %v5850_v51 = vadd.f32 %v2302_v18, %v5261_v29  ;;  %v3090_v10 = vadd.f32 1.0, %v3058_v33  ;;  %v2934_v39 = vmul.f32 %v4314_v20, %v2774_v41  ;;  %v2711_v40 = vmul.f32 %v5716_v61, %v2679_v45 }
 0x8ca   : > { %6333 = vst [vmem:[#allocation30_spill] sm:$0xff] %v5847_v25  ;;  %v2712_v5 = vmul.f32 %v5724_v17, %v2680_v28  ;;  %v5855_v35 = vmul.f32 %v3089_v55, %v5659_v43  ;;  %v3091_v31 = vadd.f32 1.0, %v3059_v13  ;;  %v5858_v63 = vmul.f32 0.70710677, %v5835_v46  ;;  %v5861_v60 = vpop.eup %4315  ;;  %v2304_v28 = vpop.f32.mrf.mxu0 }
 0x8cb   : > { %6334 = vst [vmem:[#allocation31_spill] sm:$0xff] %v5850_v51  ;;  %v2432_v4 = vmul.f32 0.3275911, %v5838_v57  ;;  %v3060_v53 = vsel %vm2996_vm2, %v2964_v54, %v3028_v1  ;;  %v2893_v3 = vmul.f32 1.442695, %v2841_v9  ;;  %v5866_v20 = vmul.f32 0.5, %v5732_v48 }
 0x8cc   : > { %6335 = vst [vmem:[#allocation32_spill] sm:$0xff] %v5858_v63  ;;  %v2430_v33 = vmul.f32 0.3275911, %v5843_v15  ;;  %v4318_v27 = vpop.eup %4317  ;;  %v3029_v43 = vsub.f32 0.0, %v2965_v21  ;;  %v2842_v55 = vmul.f32 %v2810_v44, %v5768_v6  ;;  %v5871_v41 = vand.u32 2147483647, %v5847_v25 }
 0x8cd   : > { %6336 = vst [vmem:[#allocation33_spill] sm:$0xff] %v5866_v20  ;;  %v5874_v45 = vmul.f32 0.70710677, %v5850_v51  ;;  %v5877_v12 = vmul.f32 %v3090_v10, %v5672_v22  ;;  %v2966_v54 = vsub.f32 1.0, %v2934_v39  ;;  %vm2998_vm4 = vcmp.ge.f32.partialorder %v5554_v52, 0.0 }
 0x8ce   : > { %v2743_v48 = vadd.f32 0.2548296, %v2711_v40  ;;  %v2744_v18 = vadd.f32 0.2548296, %v2712_v5  ;;  %v5881_v13 = vmul.f32 %v3091_v31, %v5687_v7  ;;  %v2521_v6 = vmul.f32 1.0614054, %v5861_v60 }
 0x8cf   : > { %6337 = vst [vmem:[#allocation34_spill] sm:$0xff] %v5874_v45  ;;  %v5885_v1 = vand.u32 2147483647, %v5858_v63  ;;  %v2464_v9 = vadd.f32 1.0, %v2432_v4  ;;  %v5887_v44 = vpop.eup %4319  ;;  %v3092_v30 = vadd.f32 1.0, %v3060_v53  ;;  %4327 = vpow2.f32 %v2893_v3 }
 0x8d0   : > { %6338 = vst [vmem:[#allocation35_spill] sm:$0xff] %v5881_v13  ;;  %v2462_v22 = vadd.f32 1.0, %v2430_v33  ;;  %v5890_v10 = vadd.f32 %v2304_v28, %v5257_v19  ;;  %v3061_v39 = vsel %vm2997_vm3, %v2965_v21, %v3029_v43  ;;  %v2895_v40 = vmul.f32 1.442695, %v2842_v55 }
 0x8d1   : > { %v2429_v7 = vmul.f32 0.3275911, %v5871_v41  ;;  %v5896_v5 = vand.u32 2147483647, %v5874_v45  ;;  %v3030_v31 = vsub.f32 0.0, %v2966_v54  ;;  %v2775_v4 = vmul.f32 %v5716_v61, %v2743_v48 }
 0x8d2   : > { %6339 = vst [vmem:[#allocation36_spill] sm:$0xff] %v5890_v10  ;;  %v2776_v51 = vmul.f32 %v5724_v17, %v2744_v18  ;;  %v5902_v53 = vadd.f32 %v5814_v23, %v5257_v19  ;;  %v5904_v3 = vpop.eup %4321  ;;  %v2553_v33 = vadd.f32 -1.4531521, %v2521_v6  ;;  %v2522_v38 = vmul.f32 1.0614054, %v5887_v44 }
 0x8d3   : > { %v2431_v21 = vmul.f32 0.3275911, %v5885_v1  ;;  %4329 = vrcp.f32 %v2464_v9  ;;  %v4324_v43 = vpop.eup %4323  ;;  %v5909_v55 = vmul.f32 %v3092_v30, %v5701_v50  ;;  %v2811_v61 = vsub.f32 0.0, %v5794_v58  ;;  %v2306_v9 = vpop.f32.mrf.mxu0 }
 0x8d4   : > { %6340 = vst [vmem:[#allocation37_spill] sm:$0xff] %v5902_v53  ;;  %4331 = vrcp.f32 %v2462_v22  ;;  %v5913_v17 = vmul.f32 0.70710677, %v5890_v10  ;;  %v5915_v19 = vadd.f32 1.0, %v3061_v39  ;;  %v2461_v23 = vadd.f32 1.0, %v2429_v7 }
 0x8d5   : > { %4333 = vpow2.f32 %v2895_v40  ;;  %v2434_v28 = vmul.f32 0.3275911, %v5896_v5  ;;  %v5918_v48 = vpop.eup %4325  ;;  %v5920_v18 = vmul.f32 %v4318_v27, %v2775_v4  ;;  %v2936_v6 = vmul.f32 %v4324_v43, %v2776_v51 }
 0x8d6   : > { %6341 = vst [vmem:[#allocation38_spill] sm:$0xff] %v5913_v17  ;;  %6342 = vst [vmem:[#allocation39_spill] sm:$0xff] %v5915_v19  ;;  %v2524_v50 = vmul.f32 1.0614054, %v5904_v3  ;;  %v5924_v30 = vmul.f32 0.70710677, %v5902_v53  ;;  %v3062_v22 = vsel %vm2998_vm4, %v2966_v54, %v3030_v31  ;;  %v2585_v39 = vmul.f32 %v5861_v60, %v2553_v33 }
 0x8d7   : > { %v2554_v40 = vadd.f32 -1.4531521, %v2522_v38  ;;  %v2463_v7 = vadd.f32 1.0, %v2431_v21  ;;  %v2843_v10 = vmul.f32 %v2811_v61, %v5794_v58  ;;  %v5931_v46 = vmul.f32 0.5, %v5744_v11 }
 0x8d8   : > { %6343 = vst [vmem:[#allocation40_spill] sm:$0xff] %v5924_v30  ;;  %v2812_v51 = vsub.f32 0.0, %v5784_v62  ;;  %v5935_v27 = vand.u32 2147483647, %v5913_v17  ;;  %vm3000_vm5 = vcmp.ge.f32.partialorder %v5606_v34, 0.0  ;;  %4335 = vrcp.f32 %v2461_v23 }
 0x8d9   : > { %6344 = vst [vmem:[#allocation41_spill] sm:$0xff] %v5931_v46  ;;  %v2523_v4 = vmul.f32 1.0614054, %v5918_v48  ;;  %v2466_v52 = vadd.f32 1.0, %v2434_v28  ;;  %v5940_v54 = vadd.f32 %v2306_v9, %v5261_v29  ;;  %v3094_v31 = vadd.f32 1.0, %v3062_v22  ;;  %v6347_v9 = vld [vmem:[#allocation17_spill] sm:$0xff] }
 0x8da   : > { %v2968_v33 = vsub.f32 1.0, %v2936_v6  ;;  %v2556_v58 = vadd.f32 -1.4531521, %v2524_v50  ;;  %v5943_v11 = vand.u32 2147483647, %v5924_v30  ;;  %v2586_v43 = vmul.f32 %v5887_v44, %v2554_v40 }
 0x8db   : > { %6345 = vst [vmem:[#allocation42_spill] sm:$0xff] %v5940_v54  ;;  %v2617_v21 = vadd.f32 1.4214138, %v2585_v39  ;;  %4337 = vrcp.f32 %v2463_v7  ;;  %v2897_v61 = vmul.f32 1.442695, %v2843_v10  ;;  %v2844_v53 = vmul.f32 %v2812_v51, %v5784_v62  ;;  %v6348_v62 = vld [vmem:[#allocation21_spill] sm:$0xff] }
 0x8dc   : > { %v2435_v23 = vmul.f32 0.3275911, %v5935_v27  ;;  %v3142_v29 = vpack.c.bf16 %v5642_v14, %v5609_v49  ;;  %v5951_v28 = vpop.eup %4327  ;;  %v2555_v6 = vadd.f32 -1.4531521, %v2523_v4  ;;  %4339 = vrcp.f32 %v2466_v52 }
 0x8dd   : > { %v5954_v50 = vmul.f32 0.70710677, %v5940_v54  ;;  %v2506_v22 = vmul.f32 1.0614054, %v6347_v9  ;;  %v3032_v39 = vsub.f32 0.0, %v2968_v33  ;;  %v2588_v40 = vmul.f32 %v5904_v3, %v2556_v58 }
 0x8de   : > { %v2433_v10 = vmul.f32 0.3275911, %v5943_v11  ;;  %3328 = vmatprep.mubr.bf16.mxu0 %v3142_v29  ;;  %v2508_v7 = vmul.f32 1.0614054, %v6348_v62  ;;  %v5961_v51 = vmul.f32 %v3094_v31, %v5721_v24  ;;  %v2649_v49 = vmul.f32 %v5861_v60, %v2617_v21 }
 0x8df   : > { %6346 = vst [vmem:[#allocation43_spill] sm:$0xff] %v5954_v50  ;;  %v2618_v14 = vadd.f32 1.4214138, %v2586_v43  ;;  %v5965_v4 = vand.u32 2147483647, %v5954_v50  ;;  %v6349_v52 = vpack.c.bf16 %v5612_v36, %v5595_v16  ;;  %v6350_v58 = vsub.f32 1.0, %v5920_v18 }
 0x8e0   : > { %v5970_v38 = vpop.eup %4329  ;;  %4341 = vpow2.f32 %v2897_v61  ;;  %v2467_v30 = vadd.f32 1.0, %v2435_v23  ;;  %v2538_v24 = vadd.f32 -1.4531521, %v2506_v22  ;;  %v2587_v21 = vmul.f32 %v5918_v48, %v2555_v6 }
 0x8e1   : > { %3329 = vmatmul.mubr.bf16.vlgmr.msra.gmra.mxu0 %v6349_v52  ;;  %v5974_v29 = vsub.f32 0.0, %v6350_v58  ;;  %v5976_v31 = vpop.eup %4331  ;;  %v2899_v43 = vmul.f32 1.442695, %v2844_v53  ;;  %v2813_v17 = vsub.f32 0.0, %v5871_v41  ;;  %v2436_v54 = vmul.f32 0.3275911, %v5965_v4 }
 0x8e2   : > { %v5981_v16 = vpop.eup %4333  ;;  %v3064_v36 = vsel %vm3000_vm5, %v2968_v33, %v3032_v39  ;;  %v2620_v52 = vadd.f32 1.4214138, %v2588_v40  ;;  %v2465_v58 = vadd.f32 1.0, %v2433_v10  ;;  %v2540_v25 = vadd.f32 -1.4531521, %v2508_v7 }
 0x8e3   : > { %v2681_v61 = vadd.f32 -0.28449672, %v2649_v49  ;;  %v2650_v23 = vmul.f32 %v5887_v44, %v2618_v14  ;;  %v2528_v22 = vmul.f32 1.0614054, %v5970_v38  ;;  %v2468_v45 = vadd.f32 1.0, %v2436_v54 }
 0x8e4   : > { %v2526_v53 = vmul.f32 1.0614054, %v5976_v31  ;;  %4343 = vrcp.f32 %v2467_v30  ;;  %v2570_v6 = vmul.f32 %v6347_v9, %v2538_v24  ;;  %v2572_v63 = vmul.f32 %v6348_v62, %v2540_v25 }
 0x8e5   : > { %v2619_v50 = vadd.f32 1.4214138, %v2587_v21  ;;  %v2845_v34 = vmul.f32 %v2813_v17, %v5871_v41  ;;  %v2814_v33 = vsub.f32 0.0, %v5843_v15  ;;  %4345 = vrcp.f32 %v2468_v45  ;;  %v5992_v39 = vpop.eup %4335 }
 0x8e6   : > { %v2652_v40 = vmul.f32 %v5904_v3, %v2620_v52  ;;  %4347 = vrcp.f32 %v2465_v58  ;;  %v2602_v10 = vadd.f32 1.4214138, %v2570_v6  ;;  %v2604_v54 = vadd.f32 1.4214138, %v2572_v63 }
 0x8e7   : > { %v5995_v7 = vadd.f32 1.0, %v3064_v36  ;;  %v2713_v30 = vmul.f32 %v5861_v60, %v2681_v61  ;;  %v2560_v49 = vadd.f32 -1.4531521, %v2528_v22  ;;  %v2816_v25 = vsub.f32 0.0, %v5838_v57 }
 0x8e8   : > { %v5999_v14 = vpop.eup %4337  ;;  %v2682_v41 = vadd.f32 -0.28449672, %v2650_v23  ;;  %v2558_v17 = vadd.f32 -1.4531521, %v2526_v53  ;;  %v2634_v45 = vmul.f32 %v6347_v9, %v2602_v10  ;;  %v2636_v24 = vmul.f32 %v6348_v62, %v2604_v54 }
 0x8e9   : > { %v2525_v21 = vmul.f32 1.0614054, %v5992_v39  ;;  %v6004_v52 = vmul.f32 1.442695, %v2845_v34  ;;  %v2846_v63 = vmul.f32 %v2814_v33, %v5843_v15  ;;  %v2815_v36 = vsub.f32 0.0, %v5885_v1  ;;  %v6008_v58 = vpop.eup %4339 }
 0x8ea   : > { %v2651_v61 = vmul.f32 %v5918_v48, %v2619_v50  ;;  %v2684_v22 = vadd.f32 -0.28449672, %v2652_v40  ;;  %v2666_v6 = vadd.f32 -0.28449672, %v2634_v45  ;;  %v2668_v23 = vadd.f32 -0.28449672, %v2636_v24 }
 0x8eb   : > { %v6011_v53 = vadd.f32 0.2548296, %v2713_v30  ;;  %v2527_v10 = vmul.f32 1.0614054, %v5999_v14  ;;  %v2592_v54 = vmul.f32 %v5970_v38, %v2560_v49  ;;  %v2848_v34 = vmul.f32 %v2816_v25, %v5838_v57 }
 0x8ec   : > { %v2714_v59 = vmul.f32 %v5887_v44, %v2682_v41  ;;  %v2590_v15 = vmul.f32 %v5976_v31, %v2558_v17  ;;  %v2698_v33 = vmul.f32 %v6347_v9, %v2666_v6  ;;  %v2700_v47 = vmul.f32 %v6348_v62, %v2668_v23  ;;  %v6351_v41 = vld [vmem:[#allocation5_spill] sm:$0xff]  ;;  %v6352_v17 = vld [vmem:[#allocation8_spill] sm:$0xff] }
 0x8ed   : > { %v6020_v50 = vpop.eup %4341  ;;  %v2557_v40 = vadd.f32 -1.4531521, %v2525_v21  ;;  %v2903_v45 = vmul.f32 1.442695, %v2846_v63  ;;  %v2847_v30 = vmul.f32 %v2815_v36, %v5885_v1  ;;  %v2530_v24 = vmul.f32 1.0614054, %v6008_v58 }
 0x8ee   : > { %v2683_v19 = vadd.f32 -0.28449672, %v2651_v61  ;;  %v2716_v49 = vmul.f32 %v5904_v3, %v2684_v22  ;;  %v2730_v57 = vadd.f32 0.2548296, %v2698_v33  ;;  %v2732_v25 = vadd.f32 0.2548296, %v2700_v47 }
 0x8ef   : > { %vm2986_vm6 = vcmp.ge.f32.partialorder %v6351_v41, 0.0  ;;  %vm2988_vm7 = vcmp.ge.f32.partialorder %v6352_v17, 0.0  ;;  %4349 = vpow2.f32 %v2899_v43  ;;  %v2559_v6 = vadd.f32 -1.4531521, %v2527_v10 }
 0x8f0   : > { %v2624_v23 = vadd.f32 1.4214138, %v2592_v54  ;;  %v2907_v20 = vmul.f32 1.442695, %v2848_v34  ;;  %v2746_v32 = vadd.f32 0.2548296, %v2714_v59  ;;  %v2762_v63 = vmul.f32 %v6347_v9, %v2730_v57 }
 0x8f1   : > { %v2622_v21 = vadd.f32 1.4214138, %v2590_v15  ;;  %v2764_v1 = vmul.f32 %v6348_v62, %v2732_v25  ;;  %v6029_v36 = vpop.eup %4343  ;;  %v2589_v61 = vmul.f32 %v5992_v39, %v2557_v40  ;;  %4351 = vpow2.f32 %v2903_v45  ;;  %v6353_v54 = vld [vmem:[#allocation20_spill] sm:$0xff] }
 0x8f2   : > { %v6032_v47 = vmul.f32 1.442695, %v2847_v30  ;;  %v2562_v22 = vadd.f32 -1.4531521, %v2530_v24  ;;  %v6034_v33 = vpop.eup %4345  ;;  %v2715_v43 = vmul.f32 %v5918_v48, %v2683_v19  ;;  %v2748_v10 = vadd.f32 0.2548296, %v2716_v49 }
 0x8f3   : > { %v2922_v59 = vmul.f32 %v6353_v54, %v2762_v63  ;;  %v2924_v34 = vmul.f32 %v5619_v42, %v2764_v1  ;;  %v6039_v9 = vpop.eup %4347  ;;  %v2591_v62 = vmul.f32 %v5999_v14, %v2559_v6  ;;  %v2656_v15 = vmul.f32 %v5970_v38, %v2624_v23 }
 0x8f4   : > { %4353 = vpow2.f32 %v2907_v20  ;;  %v2532_v40 = vmul.f32 1.0614054, %v6034_v33  ;;  %v2654_v45 = vmul.f32 %v5976_v31, %v2622_v21  ;;  %v2531_v30 = vmul.f32 1.0614054, %v6029_v36 }
 0x8f5   : > { %v2954_v24 = vsub.f32 1.0, %v2922_v59  ;;  %v2956_v19 = vsub.f32 1.0, %v2924_v34  ;;  %v2621_v49 = vadd.f32 1.4214138, %v2589_v61  ;;  %v2594_v57 = vmul.f32 %v6008_v58, %v2562_v22 }
 0x8f6   : > { %v2564_v25 = vadd.f32 -1.4531521, %v2532_v40  ;;  %v2820_v42 = vsub.f32 0.0, %v5965_v4  ;;  %v2780_v63 = vmul.f32 %v5904_v3, %v2748_v10  ;;  %v2529_v6 = vmul.f32 1.0614054, %v6039_v9 }
 0x8f7   : > { %v3018_v23 = vsub.f32 0.0, %v2954_v24  ;;  %v3020_v20 = vsub.f32 0.0, %v2956_v19  ;;  %v2623_v1 = vadd.f32 1.4214138, %v2591_v62  ;;  %v2688_v54 = vadd.f32 -0.28449672, %v2656_v15 }
 0x8f8   : > { %v2818_v21 = vsub.f32 0.0, %v5896_v5  ;;  %v2596_v26 = vmul.f32 %v6034_v33, %v2564_v25  ;;  %v2686_v59 = vadd.f32 -0.28449672, %v2654_v45  ;;  %v2563_v34 = vadd.f32 -1.4531521, %v2531_v30 }
 0x8f9   : > { %v3050_v61 = vsel %vm2986_vm6, %v2954_v24, %v3018_v23  ;;  %v3052_v22 = vsel %vm2988_vm7, %v2956_v19, %v3020_v20  ;;  %v2626_v40 = vadd.f32 1.4214138, %v2594_v57  ;;  %v2852_v10 = vmul.f32 %v2820_v42, %v5965_v4  ;;  %v6354_v4 = vld [vmem:[#allocation7_spill] sm:$0xff]  ;;  %v6355_v57 = vld [vmem:[#allocation10_spill] sm:$0xff] }
 0x8fa   : > { %v2628_v3 = vadd.f32 1.4214138, %v2596_v26  ;;  %v3082_v46 = vadd.f32 1.0, %v3050_v61  ;;  %v2778_v62 = vmul.f32 %v5887_v44, %v2746_v32  ;;  %v2747_v15 = vadd.f32 0.2548296, %v2715_v43 }
 0x8fb   : > { %v2561_v8 = vadd.f32 -1.4531521, %v2529_v6  ;;  %v3084_v13 = vadd.f32 1.0, %v3052_v22  ;;  %v2653_v25 = vmul.f32 %v5992_v39, %v2621_v49  ;;  %v2720_v45 = vmul.f32 %v5970_v38, %v2688_v54 }
 0x8fc   : > { %v2850_v41 = vmul.f32 %v2818_v21, %v5896_v5  ;;  %v2660_v30 = vmul.f32 %v6034_v33, %v2628_v3  ;;  %v4350_v17 = vpop.eup %4349  ;;  %v2655_v24 = vmul.f32 %v5999_v14, %v2623_v1  ;;  %v2595_v26 = vmul.f32 %v6029_v36, %v2563_v34 }
 0x8fd   : > { %v3114_v19 = vmul.f32 %v3082_v46, %v6354_v4  ;;  %v3116_v32 = vmul.f32 %v3084_v13, %v6355_v57  ;;  %v6066_v44 = vmul.f32 %v4350_v17, %v2780_v63  ;;  %v2718_v43 = vmul.f32 %v5976_v31, %v2686_v59  ;;  %v6359_v57 = vld [vmem:[#allocation6_spill] sm:$0xff] }
 0x8fe   : > { %v2658_v49 = vmul.f32 %v6008_v58, %v2626_v40  ;;  %v2915_v42 = vmul.f32 1.442695, %v2852_v10  ;;  %v4352_v6 = vpop.eup %4351  ;;  %v2593_v5 = vmul.f32 %v6039_v9, %v2561_v8  ;;  %v2819_v23 = vsub.f32 0.0, %v5935_v27 }
 0x8ff   : > { %v3144_v20 = vpack.c.bf16 %v3116_v32, %v3114_v19  ;;  %v3146_v1 = vpack.c.bf16 %v5807_v0, %v5711_v37  ;;  %v2752_v54 = vadd.f32 0.2548296, %v2720_v45  ;;  %v2911_v46 = vmul.f32 1.442695, %v2850_v41  ;;  %v6356_v37 = vld [vmem:[#allocation22_spill] sm:$0xff]  ;;  %v6357_v0 = vld [vmem:[#allocation25_spill] sm:$0xff] }
 0x900   : > { %v2692_v21 = vadd.f32 -0.28449672, %v2660_v30  ;;  %v3143_v13 = vpack.c.bf16 %v5678_v56, %v5652_v2  ;;  %4355 = vpow2.f32 %v6004_v52  ;;  %v2687_v59 = vadd.f32 -0.28449672, %v2655_v24  ;;  %v6360_v32 = vld [vmem:[#allocation23_spill] sm:$0xff] }
 0x901   : > { %v4354_v63 = vpop.eup %4353  ;;  %v2817_v34 = vsub.f32 0.0, %v5943_v11  ;;  %v2627_v61 = vadd.f32 1.4214138, %v2595_v26  ;;  %3336 = vmatprep.mubr.bf16.mxu1 %v3144_v20  ;;  %v2938_v8 = vmul.f32 %v5981_v16, %v2778_v62  ;;  %v2750_v22 = vadd.f32 0.2548296, %v2718_v43  ;;  %v6358_v62 = vld [vmem:[#allocation9_spill] sm:$0xff] }
 0x902   : > { %v2690_v40 = vadd.f32 -0.28449672, %v2658_v49  ;;  %4357 = vpow2.f32 %v2915_v42  ;;  %3337 = vmatmul.mubr.bf16.vlgmr.msra.gmra.mxu1 %v3143_v13  ;;  %vm2999_vm8 = vcmp.ge.f32.partialorder %v6356_v37, 0.0  ;;  %vm3004_vm9 = vcmp.ge.f32.partialorder %v6357_v0, 0.0  ;;  %v6361_v20 = vld [vmem:[#allocation26_spill] sm:$0xff] }
 0x903   : > { %v2685_v3 = vadd.f32 -0.28449672, %v2653_v25  ;;  %4359 = vpow2.f32 %v6032_v47  ;;  %v2625_v2 = vadd.f32 1.4214138, %v2593_v5  ;;  %v2851_v56 = vmul.f32 %v2819_v23, %v5935_v27  ;;  %3344 = vmatprep.mubr.bf16.mxu1 %v3146_v1 }
 0x904   : > { %v2972_v52 = vsub.f32 1.0, %v6066_v44  ;;  %v2784_v10 = vmul.f32 %v5970_v38, %v2752_v54  ;;  %4361 = vpow2.f32 %v2911_v46  ;;  %v2724_v16 = vmul.f32 %v6034_v33, %v2692_v21  ;;  %v6363_v21 = vld [vmem:[#allocation16_spill] sm:$0xff] }
 0x905   : > { %vm3002_vm10 = vcmp.ge.f32.partialorder %v6358_v62, 0.0  ;;  %v2779_v45 = vmul.f32 %v5918_v48, %v2747_v15  ;;  %v2719_v41 = vmul.f32 %v5999_v14, %v2687_v59  ;;  %v2849_v25 = vmul.f32 %v2817_v34, %v5943_v11 }
 0x906   : > { %v2659_v47 = vmul.f32 %v6029_v36, %v2627_v61  ;;  %v2777_v27 = vmul.f32 %v5861_v60, %v6011_v53  ;;  %v2970_v30 = vsub.f32 1.0, %v2938_v8  ;;  %v2782_v17 = vmul.f32 %v5976_v31, %v2750_v22 }
 0x907   : > { %v2722_v38 = vmul.f32 %v6008_v58, %v2690_v40  ;;  %v2717_v24 = vmul.f32 %v5992_v39, %v2685_v3  ;;  %v2657_v26 = vmul.f32 %v6039_v9, %v2625_v2  ;;  %v2913_v4 = vmul.f32 1.442695, %v2851_v56  ;;  %v6364_v56 = vld [vmem:[#allocation35_spill] sm:$0xff] }
 0x908   : > { %v3148_v48 = vpack.c.bf16 %v5909_v55, %v5877_v12  ;;  %v3036_v15 = vsub.f32 0.0, %v2972_v52  ;;  %v2944_v11 = vmul.f32 %v4354_v63, %v2784_v10  ;;  %v2756_v19 = vadd.f32 0.2548296, %v2724_v16 }
 0x909   : > { %v3145_v44 = vpack.c.bf16 %v6360_v32, %v6359_v57  ;;  %v2939_v60 = vmul.f32 %v6020_v50, %v2779_v45  ;;  %v2751_v53 = vadd.f32 0.2548296, %v2719_v41  ;;  %v2909_v31 = vmul.f32 1.442695, %v2849_v25  ;;  %v6365_v25 = vld [vmem:[#allocation12_spill] sm:$0xff] }
 0x90a   : > { %v2691_v43 = vadd.f32 -0.28449672, %v2659_v47  ;;  %v2937_v49 = vmul.f32 %v5951_v28, %v2777_v27  ;;  %v3034_v42 = vsub.f32 0.0, %v2970_v30  ;;  %v2942_v5 = vmul.f32 %v4352_v6, %v2782_v17  ;;  %v6366_v27 = vld [vmem:[#allocation41_spill] sm:$0xff]  ;;  %v6367_v17 = vld [vmem:[#allocation18_spill] sm:$0xff] }
 0x90b   : > { %v2754_v23 = vadd.f32 0.2548296, %v2722_v38  ;;  %3345 = vmatmul.mubr.bf16.gmra.mxu1 %v3145_v44  ;;  %v3128_v12 = vmul.f32 %v5995_v7, %v6361_v20  ;;  %v2749_v55 = vadd.f32 0.2548296, %v2717_v24  ;;  %v2689_v1 = vadd.f32 -0.28449672, %v2657_v26 }
 0x90c   : > { %4363 = vpow2.f32 %v2913_v4  ;;  %3352 = vmatprep.mubr.bf16.mxu1 %v3148_v48  ;;  %v6362_v54 = vsub.f32 1.0, %v5920_v18  ;;  %v3068_v28 = vsel %vm3004_vm9, %v2972_v52, %v3036_v15  ;;  %v2976_v46 = vsub.f32 1.0, %v2944_v11  ;;  %v6368_v24 = vld [vmem:[#allocation19_spill] sm:$0xff]  ;;  %v6370_v15 = vld [vmem:[#allocation33_spill] sm:$0xff] }
 0x90d   : > { %v2788_v6 = vmul.f32 %v6034_v33, %v2756_v19  ;;  %vm3001_vm11 = vcmp.ge.f32.partialorder %v6363_v21, 0.0  ;;  %v2971_v13 = vsub.f32 1.0, %v2939_v60  ;;  %v2783_v7 = vmul.f32 %v5999_v14, %v2751_v53  ;;  %v4356_v59 = vpop.eup %4355  ;;  %v6369_v26 = vld [vmem:[#allocation27_spill] sm:$0xff]  ;;  %v6371_v44 = vld [vmem:[#allocation13_spill] sm:$0xff]  ;;  %v6374_v21 = vld [vmem:[#allocation24_spill] sm:$0xff] }
 0x90e   : > { %v3063_v50 = vsel %vm2999_vm8, %v6362_v54, %v5974_v29  ;;  %4365 = vpow2.f32 %v2909_v31  ;;  %v2723_v63 = vmul.f32 %v6029_v36, %v2691_v43  ;;  %v2969_v34 = vsub.f32 1.0, %v2937_v49  ;;  %v6372_v60 = vld [vmem:[#allocation39_spill] sm:$0xff] }
 0x90f   : > { %v3066_v18 = vsel %vm3002_vm10, %v2970_v30, %v3034_v42  ;;  %v2974_v29 = vsub.f32 1.0, %v2942_v5  ;;  %v2786_v61 = vmul.f32 %v6008_v58, %v2754_v23  ;;  %v4358_v8 = vpop.eup %4357  ;;  %v3100_v22 = vadd.f32 1.0, %v3068_v28 }
 0x910   : > { %v2781_v33 = vmul.f32 %v5992_v39, %v2749_v55  ;;  %v2721_v40 = vmul.f32 %v6039_v9, %v2689_v1  ;;  %v3150_v37 = vpack.c.bf16 %v3128_v12, %v5961_v51  ;;  %v4360_v14 = vpop.eup %4359  ;;  %v3095_v0 = vadd.f32 1.0, %v3063_v50 }
 0x911   : > { %v3040_v3 = vsub.f32 0.0, %v2976_v46  ;;  %v2948_v2 = vmul.f32 %v4358_v8, %v2788_v6  ;;  %v3147_v52 = vpack.c.bf16 %v6364_v56, %v5855_v35  ;;  %v4362_v10 = vpop.eup %4361  ;;  %v3098_v16 = vadd.f32 1.0, %v3066_v18  ;;  %v6376_v8 = vld [vmem:[#allocation43_spill] sm:$0xff] }
 0x912   : > { %v3035_v62 = vsub.f32 0.0, %v2971_v13  ;;  %v2943_v45 = vmul.f32 %v4360_v14, %v2783_v7  ;;  %v2755_v58 = vadd.f32 0.2548296, %v2723_v63  ;;  %v3033_v41 = vsub.f32 0.0, %v2969_v34 }
 0x913   : > { %vm3003_vm12 = vcmp.ge.f32.partialorder %v6365_v25, 0.0  ;;  %v3038_v39 = vsub.f32 0.0, %v2974_v29  ;;  %v2946_v47 = vmul.f32 %v4362_v10, %v2786_v61  ;;  %3353 = vmatmul.mubr.bf16.gmra.mxu1 %v3147_v52  ;;  %v3132_v51 = vmul.f32 %v3100_v22, %v6366_v27  ;;  %v6377_v22 = vld [vmem:[#allocation11_spill] sm:$0xff]  ;;  %v6380_v10 = vld [vmem:[#allocation30_spill] sm:$0xff] }
 0x914   : > { %v2941_v30 = vmul.f32 %v4356_v59, %v2781_v33  ;;  %vm3008_vm13 = vcmp.ge.f32.partialorder %v6367_v17, 0.0  ;;  %v2753_v38 = vadd.f32 0.2548296, %v2721_v40  ;;  %3360 = vmatprep.mubr.bf16.mxu1 %v3150_v37  ;;  %v3127_v35 = vmul.f32 %v3095_v0, %v6368_v24  ;;  %v6375_v59 = vld [vmem:[#allocation15_spill] sm:$0xff]  ;;  %v6378_v37 = vld [vmem:[#allocation32_spill] sm:$0xff] }
 0x915   : > { %vm3006_vm14 = vcmp.ge.f32.partialorder %v6369_v26, 0.0  ;;  %v3072_v4 = vsel %vm3008_vm13, %v2976_v46, %v3040_v3  ;;  %v2980_v48 = vsub.f32 1.0, %v2948_v2  ;;  %v3130_v11 = vmul.f32 %v3098_v16, %v6370_v15  ;;  %v6379_v2 = vld [vmem:[#allocation34_spill] sm:$0xff]  ;;  %v6383_v26 = vld [vmem:[#allocation31_spill] sm:$0xff]  ;;  %v6384_v15 = vld [vmem:[#allocation28_spill] sm:$0xff] }
 0x916   : > { %v3067_v19 = vsel %vm3003_vm12, %v2971_v13, %v3035_v62  ;;  %v2975_v57 = vsub.f32 1.0, %v2943_v45  ;;  %v2787_v32 = vmul.f32 %v6029_v36, %v2755_v58  ;;  %v3125_v53 = vmul.f32 %v6372_v60, %v6371_v44  ;;  %v6373_v36 = vld [vmem:[#allocation14_spill] sm:$0xff] }
 0x917   : > { %v3065_v31 = vsel %vm3001_vm11, %v2969_v34, %v3033_v41  ;;  %v3070_v43 = vsel %vm3006_vm14, %v2974_v29, %v3038_v39  ;;  %v2978_v49 = vsub.f32 1.0, %v2946_v47  ;;  %v2973_v42 = vsub.f32 1.0, %v2941_v30 }
 0x918   : > { %v3104_v5 = vadd.f32 1.0, %v3072_v4  ;;  %v2785_v23 = vmul.f32 %v6039_v9, %v2753_v38  ;;  %v3152_v20 = vpack.c.bf16 %v3132_v51, %v3130_v11  ;;  %v3099_v55 = vadd.f32 1.0, %v3067_v19  ;;  %v6381_v51 = vld [vmem:[#allocation42_spill] sm:$0xff]  ;;  %v6382_v38 = vld [vmem:[#allocation29_spill] sm:$0xff] }
 0x919   : > { %v4364_v12 = vpop.eup %4363  ;;  %v3044_v1 = vsub.f32 0.0, %v2980_v48  ;;  %v3149_v54 = vpack.c.bf16 %v3127_v35, %v3125_v53  ;;  %v3102_v50 = vadd.f32 1.0, %v3070_v43  ;;  %v3039_v28 = vsub.f32 0.0, %v2975_v57  ;;  %v6386_v53 = vld [vmem:[#allocation40_spill] sm:$0xff] }
 0x91a   : > { %v2336_v46 = vmul.f32 0.5, %v6373_v36  ;;  %v2947_v6 = vmul.f32 %v4364_v12, %v2787_v32  ;;  %v3097_v7 = vadd.f32 1.0, %v3065_v31  ;;  %v2331_v63 = vmul.f32 0.5, %v6374_v21  ;;  %v6388_v12 = vld [vmem:[#allocation37_spill] sm:$0xff]  ;;  %v6156_v36 = vld [vmem:[%s3192_s17] ss:$0 sm:$0xff] }
 0x91b   : > { %v4366_v13 = vpop.eup %4365  ;;  %v2334_v34 = vmul.f32 0.5, %v6375_v59  ;;  %v3042_v18 = vsub.f32 0.0, %v2978_v49  ;;  %3361 = vmatmul.mubr.bf16.gmra.mxu1 %v3149_v54  ;;  %v3037_v29 = vsub.f32 0.0, %v2973_v42  ;;  %vm3012_vm15 = vcmp.ge.f32.partialorder %v6376_v8, 0.0 }
 0x91c   : > { %v3136_v9 = vmul.f32 %v3104_v5, %v2336_v46  ;;  %v2945_v61 = vmul.f32 %v4366_v13, %v2785_v23  ;;  %3368 = vmatprep.mubr.bf16.mxu1 %v3152_v20  ;;  %v2329_v33 = vmul.f32 0.5, %v6377_v22  ;;  %v3131_v40 = vmul.f32 %v3099_v55, %v2331_v63  ;;  %v6387_v23 = vld [vmem:[#allocation36_spill] sm:$0xff] }
 0x91d   : > { %vm3007_vm0 = vcmp.ge.f32.partialorder %v6378_v37, 0.0  ;;  %v3076_v14 = vsel %vm3012_vm15, %v2980_v48, %v3044_v1  ;;  %v3134_v0 = vmul.f32 %v3102_v50, %v2334_v34  ;;  %vm3010_vm2 = vcmp.ge.f32.partialorder %v6379_v2, 0.0  ;;  %v4367_v63 = vld [vmem:[#allocation2] sm:$0xff] }
 0x91e   : > { %v3071_v3 = vsel %vm3007_vm0, %v2975_v57, %v3039_v28  ;;  %v2979_v56 = vsub.f32 1.0, %v2947_v6  ;;  %v3129_v52 = vmul.f32 %v3097_v7, %v2329_v33  ;;  %vm3005_vm3 = vcmp.ge.f32.partialorder %v6380_v10, 0.0  ;;  %v6385_v57 = vld [vmem:[#allocation38_spill] sm:$0xff]  ;;  %v4370_v10 = vld [vmem:[#allocation2 + $0x18] sm:$0xff] }
 0x91f   : > { %v3074_v16 = vsel %vm3010_vm2, %v2978_v49, %v3042_v18  ;;  %v3069_v62 = vsel %vm3005_vm3, %v2973_v42, %v3037_v29  ;;  %v2977_v45 = vsub.f32 1.0, %v2945_v61  ;;  %v3108_v58 = vadd.f32 1.0, %v3076_v14  ;;  %v4368_v29 = vld [vmem:[#allocation2 + $0x8] sm:$0xff]  ;;  %v4369_v14 = vld [vmem:[#allocation2 + $0x10] sm:$0xff] }
 0x920   : > { %v3154_v41 = vpack.c.bf16 %v3136_v9, %v3134_v0  ;;  %v3103_v25 = vadd.f32 1.0, %v3071_v3  ;;  %v3151_v39 = vpack.c.bf16 %v3131_v40, %v3129_v52  ;;  %v3106_v47 = vadd.f32 1.0, %v3074_v16 }
 0x921   : > { %v3043_v27 = vsub.f32 0.0, %v2979_v56  ;;  %v2340_v30 = vmul.f32 0.5, %v6381_v51  ;;  %v3101_v17 = vadd.f32 1.0, %v3069_v62  ;;  %v2335_v24 = vmul.f32 0.5, %v6382_v38 }
 0x922   : > { %v3041_v35 = vsub.f32 0.0, %v2977_v45  ;;  %v2338_v4 = vmul.f32 0.5, %v6383_v26  ;;  %v2333_v11 = vmul.f32 0.5, %v6384_v15  ;;  %vm3011_vm4 = vcmp.ge.f32.partialorder %v6385_v57, 0.0 }
 0x923   : > { %3369 = vmatmul.mubr.bf16.gmra.mxu1 %v3151_v39  ;;  %v3140_v48 = vmul.f32 %v3108_v58, %v2340_v30  ;;  %v3135_v19 = vmul.f32 %v3103_v25, %v2335_v24  ;;  %v3075_v44 = vsel %vm3011_vm4, %v2979_v56, %v3043_v27  ;;  %vm3009_vm5 = vcmp.ge.f32.partialorder %v6386_v53, 0.0  ;;  %v4371_v25 = vld [vmem:[#allocation2 + $0x20] sm:$0xff] }
 0x924   : > { %3376 = vmatprep.mubr.bf16.mxu1 %v3154_v41  ;;  %v3138_v32 = vmul.f32 %v3106_v47, %v2338_v4  ;;  %v3133_v60 = vmul.f32 %v3101_v17, %v2333_v11  ;;  %v3073_v31 = vsel %vm3009_vm5, %v2977_v45, %v3041_v35  ;;  %v3107_v49 = vadd.f32 1.0, %v3075_v44  ;;  %v4372_v17 = vld [vmem:[#allocation2 + $0x28] sm:$0xff]  ;;  %v4374_v44 = vld [vmem:[#allocation2 + $0x38] sm:$0xff] }
 0x925   : > { %v3105_v5 = vadd.f32 1.0, %v3073_v31  ;;  %v2339_v20 = vmul.f32 0.5, %v6387_v23  ;;  %v2337_v55 = vmul.f32 0.5, %v6388_v12 }
 0x926   : > { %v3156_v43 = vpack.c.bf16 %v3140_v48, %v3138_v32  ;;  %v3153_v42 = vpack.c.bf16 %v3135_v19, %v3133_v60  ;;  %v4373_v48 = vld [vmem:[#allocation2 + $0x30] sm:$0xff] }
 0x927   : > { %v3139_v1 = vmul.f32 %v3107_v49, %v2339_v20  ;;  %v3137_v54 = vmul.f32 %v3105_v5, %v2337_v55 }
 0x929   : > { %v3155_v50 = vpack.c.bf16 %v3139_v1, %v3137_v54  ;;  %v4376_v1 = vld [vmem:[#allocation2 + $0x48] sm:$0xff] }
 0x92b   : > { %3377 = vmatmul.mubr.bf16.gmra.mxu1 %v3153_v42  ;;  %v4375_v42 = vld [vmem:[#allocation2 + $0x40] sm:$0xff] }
 0x92c   : > { %3384 = vmatprep.mubr.bf16.mxu1 %v3156_v43 }
 0x933   : > { %3385 = vmatmul.mubr.bf16.gmra.mxu1 %v3155_v50 }
 0x9a1   : > { %v3904_v28 = vpop.f32.mrf.mxu0 }
 0x9a3   : > { %v3905_v46 = vpop.f32.mrf.mxu0 }
 0x9a4   : > { %v3906_v6 = vadd.f32 %v3905_v46, %v3904_v28 }
 0x9a5   : > { %v3907_v13 = vpop.f32.mrf.mxu0 }
 0x9a6   : > { %v3331_v7 = vadd.f32 %v3906_v6, %v6156_v36 }
 0x9a7   : > { %v3908_v21 = vpop.f32.mrf.mxu0 }
 0x9a8   : > { %v6159_v59 = vadd.f32 %v4367_v63, %v3331_v7  ;;  %v3909_v34 = vadd.f32 %v3908_v21, %v3907_v13  ;;  %v4377_v13 = vld [vmem:[#allocation2 + $0x50] sm:$0xff] }
 0x9aa   : > { %3409 = vst.msk [vmem:[#allocation2] sm:$0xff] %vm507_vm1, %v6159_v59  ;;  %v3334_v18 = vadd.f32 %v3909_v34, %v6156_v36 }
 0x9ac   : > { %v6164_v9 = vadd.f32 %v4368_v29, %v3334_v18  ;;  %v4378_v29 = vld [vmem:[#allocation2 + $0x58] sm:$0xff] }
 0x9ae   : > { %3410 = vst.msk [vmem:[#allocation2 + $0x8] sm:$0xff] %vm507_vm1, %v6164_v9 }
 0x9c2   : > { %v3910_v61 = vpop.f32.mrf.mxu1 }
 0x9c4   : > { %v3911_v8 = vpop.f32.mrf.mxu1 }
 0x9c5   : > { %v3912_v22 = vadd.f32 %v3911_v8, %v3910_v61 }
 0x9c6   : > { %v3913_v33 = vpop.f32.mrf.mxu1 }
 0x9c7   : > { %v3339_v40 = vadd.f32 %v3912_v22, %v6156_v36 }
 0x9c8   : > { %v3914_v37 = vpop.f32.mrf.mxu1 }
 0x9c9   : > { %v3395_v0 = vadd.f32 %v4369_v14, %v3339_v40  ;;  %v3915_v3 = vadd.f32 %v3914_v37, %v3913_v33  ;;  %v4379_v37 = vld [vmem:[#allocation2 + $0x60] sm:$0xff] }
 0x9cb   : > { %v3916_v2 = vpop.f32.mrf.mxu1  ;;  %3411 = vst.msk [vmem:[#allocation2 + $0x10] sm:$0xff] %vm507_vm1, %v3395_v0  ;;  %v3342_v56 = vadd.f32 %v3915_v3, %v6156_v36 }
 0x9cd   : > { %v3917_v52 = vpop.f32.mrf.mxu1  ;;  %v3396_v16 = vadd.f32 %v4370_v10, %v3342_v56 }
 0x9ce   : > { %v3918_v62 = vadd.f32 %v3917_v52, %v3916_v2  ;;  %v4380_v52 = vld [vmem:[#allocation2 + $0x68] sm:$0xff] }
 0x9cf   : > { %v3919_v45 = vpop.f32.mrf.mxu1  ;;  %3412 = vst.msk [vmem:[#allocation2 + $0x18] sm:$0xff] %vm507_vm1, %v3396_v16 }
 0x9d0   : > { %v3347_v58 = vadd.f32 %v3918_v62, %v6156_v36 }
 0x9d1   : > { %v3920_v41 = vpop.f32.mrf.mxu1 }
 0x9d2   : > { %v3397_v39 = vadd.f32 %v4371_v25, %v3347_v58  ;;  %v3921_v47 = vadd.f32 %v3920_v41, %v3919_v45  ;;  %v4381_v41 = vld [vmem:[#allocation2 + $0x70] sm:$0xff] }
 0x9d3   : > { %v3922_v27 = vpop.f32.mrf.mxu1 }
 0x9d4   : > { %3413 = vst.msk [vmem:[#allocation2 + $0x20] sm:$0xff] %vm507_vm1, %v3397_v39  ;;  %v3350_v51 = vadd.f32 %v3921_v47, %v6156_v36 }
 0x9d5   : > { %v3923_v30 = vpop.f32.mrf.mxu1 }
 0x9d6   : > { %v3398_v38 = vadd.f32 %v4372_v17, %v3350_v51  ;;  %v3924_v24 = vadd.f32 %v3923_v30, %v3922_v27  ;;  %v4382_v27 = vld [vmem:[#allocation2 + $0x78] sm:$0xff] }
 0x9d7   : > { %v3925_v35 = vpop.f32.mrf.mxu1 }
 0x9d8   : > { %3414 = vst.msk [vmem:[#allocation2 + $0x28] sm:$0xff] %vm507_vm1, %v3398_v38  ;;  %v3355_v26 = vadd.f32 %v3924_v24, %v6156_v36 }
 0x9d9   : > { %v3926_v4 = vpop.f32.mrf.mxu1 }
 0x9da   : > { %v3399_v15 = vadd.f32 %v4373_v48, %v3355_v26  ;;  %v3927_v11 = vadd.f32 %v3926_v4, %v3925_v35 }
 0x9db   : > { %v3928_v19 = vpop.f32.mrf.mxu1 }
 0x9dc   : > { %3415 = vst.msk [vmem:[#allocation2 + $0x30] sm:$0xff] %vm507_vm1, %v3399_v15  ;;  %v3358_v57 = vadd.f32 %v3927_v11, %v6156_v36 }
 0x9dd   : > { %v3929_v32 = vpop.f32.mrf.mxu1 }
 0x9de   : > { %v3400_v60 = vadd.f32 %v4374_v44, %v3358_v57  ;;  %v3930_v53 = vadd.f32 %v3929_v32, %v3928_v19 }
 0x9df   : > { %v3931_v31 = vpop.f32.mrf.mxu1 }
 0x9e0   : > { %3416 = vst.msk [vmem:[#allocation2 + $0x38] sm:$0xff] %vm507_vm1, %v3400_v60  ;;  %v3363_v43 = vadd.f32 %v3930_v53, %v6156_v36 }
 0x9e1   : > { %v3932_v49 = vpop.f32.mrf.mxu1 }
 0x9e2   : > { %v3401_v5 = vadd.f32 %v4375_v42, %v3363_v43  ;;  %v3933_v23 = vadd.f32 %v3932_v49, %v3931_v31 }
 0x9e3   : > { %v3934_v20 = vpop.f32.mrf.mxu1 }
 0x9e4   : > { %3417 = vst.msk [vmem:[#allocation2 + $0x40] sm:$0xff] %vm507_vm1, %v3401_v5  ;;  %v3366_v12 = vadd.f32 %v3933_v23, %v6156_v36 }
 0x9e5   : > { %v3935_v55 = vpop.f32.mrf.mxu1 }
 0x9e6   : > { %v3402_v54 = vadd.f32 %v4376_v1, %v3366_v12  ;;  %v3936_v50 = vadd.f32 %v3935_v55, %v3934_v20 }
 0x9e7   : > { %v3937_v28 = vpop.f32.mrf.mxu1 }
 0x9e8   : > { %3418 = vst.msk [vmem:[#allocation2 + $0x48] sm:$0xff] %vm507_vm1, %v3402_v54  ;;  %v3371_v46 = vadd.f32 %v3936_v50, %v6156_v36 }
 0x9e9   : > { %v3938_v6 = vpop.f32.mrf.mxu1 }
 0x9ea   : > { %v3403_v7 = vadd.f32 %v4377_v13, %v3371_v46  ;;  %v3939_v21 = vadd.f32 %v3938_v6, %v3937_v28 }
 0x9eb   : > { %v3940_v63 = vpop.f32.mrf.mxu1 }
 0x9ec   : > { %3419 = vst.msk [vmem:[#allocation2 + $0x50] sm:$0xff] %vm507_vm1, %v3403_v7  ;;  %v3374_v34 = vadd.f32 %v3939_v21, %v6156_v36 }
 0x9ed   : > { %v3941_v18 = vpop.f32.mrf.mxu1 }
 0x9ee   : > { %v3404_v61 = vadd.f32 %v4378_v29, %v3374_v34  ;;  %v3942_v8 = vadd.f32 %v3941_v18, %v3940_v63 }
 0x9ef   : > { %v3943_v22 = vpop.f32.mrf.mxu1 }
 0x9f0   : > { %3420 = vst.msk [vmem:[#allocation2 + $0x58] sm:$0xff] %vm507_vm1, %v3404_v61  ;;  %v3379_v33 = vadd.f32 %v3942_v8, %v6156_v36 }
 0x9f1   : > { %v3944_v40 = vpop.f32.mrf.mxu1 }
 0x9f2   : > { %v3405_v14 = vadd.f32 %v4379_v37, %v3379_v33  ;;  %v3945_v0 = vadd.f32 %v3944_v40, %v3943_v22 }
 0x9f3   : > { %v3946_v3 = vpop.f32.mrf.mxu1 }
 0x9f4   : > { %3421 = vst.msk [vmem:[#allocation2 + $0x60] sm:$0xff] %vm507_vm1, %v3405_v14  ;;  %v3382_v2 = vadd.f32 %v3945_v0, %v6156_v36 }
 0x9f5   : > { %v3947_v56 = vpop.f32.mrf.mxu1 }
 0x9f6   : > { %v3406_v10 = vadd.f32 %v4380_v52, %v3382_v2  ;;  %v3948_v16 = vadd.f32 %v3947_v56, %v3946_v3 }
 0x9f7   : > { %v3949_v62 = vpop.f32.mrf.mxu1 }
 0x9f8   : > { %3422 = vst.msk [vmem:[#allocation2 + $0x68] sm:$0xff] %vm507_vm1, %v3406_v10  ;;  %v3387_v45 = vadd.f32 %v3948_v16, %v6156_v36 }
 0x9f9   : > { %v3950_v58 = vpop.f32.mrf.mxu1 }
 0x9fa   : > { %v3407_v25 = vadd.f32 %v4381_v41, %v3387_v45  ;;  %v3951_v39 = vadd.f32 %v3950_v58, %v3949_v62 }
 0x9fc   : > { %3423 = vst.msk [vmem:[#allocation2 + $0x70] sm:$0xff] %vm507_vm1, %v3407_v25  ;;  %v3390_v47 = vadd.f32 %v3951_v39, %v6156_v36  ;;  %3428 = sbr.rel (%p3758_p8) target bundleno = 2584 (0xa18), region = 87 }
 0x9fe   : > { %v3408_v51 = vadd.f32 %v4382_v27, %v3390_v47 }
 0xa00   : > { %3424 = vst.msk [vmem:[#allocation2 + $0x78] sm:$0xff] %vm507_vm1, %v3408_v51 }
 0xa01   : > { %v6389_v30 = vld [vmem:[#allocation4_spill] sm:$0xff]  ;;  %v3510_v38 = vsel %vm507_vm1, %v6159_v59, 0.0  ;;  %vm3548_vm7 = vcmask 516096  }
 0xa02   : > { %v3431_v17 = vadd.s32 8, %v6389_v30 }
 0xa04   : > { %vm3447_vm6 = vcmp.lt.s32.totalorder %v3431_v17, 9 }
 0xa05   : > { %v3495_v24 = vsel %vm3447_vm6, %v6164_v9, 0.0 }
 0xa06   : > { %v3511_v35 = vsel %vm507_vm1, %v3495_v24, 0.0 }
 0xa07   : > { %v3512_v26 = vadd.f32 %v3511_v35, %v3510_v38 }
 0xa09   : > { %v3541_v36 = vrot.slane %v3512_v26, 4 }
 0xa0b   : > { %v3542_v4 = vadd.f32 %v3541_v36, %v3512_v26 }
 0xa0d   : > { %v3543_v48 = vrot.slane %v3542_v4, 2 }
 0xa0f   : > { %v3544_v15 = vadd.f32 %v3543_v48, %v3542_v4 }
 0xa11   : > { %v3545_v11 = vrot.slane %v3544_v15, 1 }
 0xa13   : > { %v3546_v19 = vadd.f32 %v3545_v11, %v3544_v15 }
 0xa15   : > { %v3547_v57 = vmul.f32 0.11111111, %v3546_v19 }
 0xa17   : > { %3549 = vst.msk [vmem:[%s6390_s24] sm:$0x1] %vm3548_vm7, %v3547_v57 }
 0xa18 PF: > { %s23_s29 = sadd.s32 1, %s4425_s29   ;;  %s6391_s25 = smov %s4417_s27 }
 0xa19   : > { %p20_p9 = scmp.ge.s32.totalorder %s23_s29, 6   ;;  %s6392_s26 = smov %s4421_s28 }
 0xa1a   : > { %s6393_s27 = smov %s6396_s30  ;;  %s6394_s28 = smov %s6400_s14 }
 0xa1b   :  { %22 = sbr.rel (!%p20_p9) target bundleno = 3 (0x3), region = 143 }

</bundles_post_ra>
